<compile_context>
chip_gen: v7x
topology: tpu7x:2x2x1
jax: 0.10.0
libtpu: 0.0.40
codegen_flags: <defaults>
</compile_context>

<pallas_src>
from functools import partial

import jax
import jax.numpy as jnp
from jax.experimental import pallas as pl
from jax.experimental.pallas import tpu as pltpu

BN_EPS = 1e-5
EXPANSION = 4          # BottleNeck.expansion
LANE = 128             # output channels padded to a multiple of the TPU lane width
TM_MAX, TN_MAX, TK_MAX = 512, 256, 512


def _round_up(x, m):
    return -(-x // m) * m


def _pick_tile(dim, max_tile, align):
    """Tile for one GEMM dim: the full dim if it fits a single block (legal even when
    unaligned), otherwise an `align`-multiple tile, preferring one that divides `dim`."""
    if dim <= max_tile:
        return dim
    for t in range(max_tile, align - 1, -align):
        if dim % t == 0:
            return t
    return max_tile


# ----------------------------------------------------------------------------- #
# Fused tiled GEMM kernels:  O = act(P @ W + b [+ R])                             #
# ----------------------------------------------------------------------------- #
def _gemm_kernel(p_ref, w_ref, b_ref, o_ref, acc_ref, *, relu):
    @pl.when(pl.program_id(2) == 0)
    def _():
        acc_ref[...] = jnp.zeros_like(acc_ref)

    acc_ref[...] += jnp.dot(p_ref[...], w_ref[...],
                            preferred_element_type=jnp.float32)

    @pl.when(pl.program_id(2) == pl.num_programs(2) - 1)
    def _():
        y = acc_ref[...] + b_ref[...]
        if relu:
            y = jnp.maximum(y, 0.0)
        o_ref[...] = y.astype(o_ref.dtype)


def _gemm_res_kernel(p_ref, w_ref, b_ref, r_ref, o_ref, acc_ref, *, relu):
    @pl.when(pl.program_id(2) == 0)
    def _():
        acc_ref[...] = jnp.zeros_like(acc_ref)

    acc_ref[...] += jnp.dot(p_ref[...], w_ref[...],
                            preferred_element_type=jnp.float32)

    @pl.when(pl.program_id(2) == pl.num_programs(2) - 1)
    def _():
        y = acc_ref[...] + b_ref[...] + r_ref[...].astype(jnp.float32)
        if relu:
            y = jnp.maximum(y, 0.0)
        o_ref[...] = y.astype(o_ref.dtype)


def fused_matmul(p, w, b, residual=None, relu=True, out_dtype=jnp.bfloat16):
    """act(p @ w + b [+ residual]); p/w/residual bf16, b f32, accumulation in f32."""
    M, K = p.shape
    Kw, N = w.shape
    assert K == Kw and b.shape == (1, N)

    tm = _pick_tile(M, TM_MAX, 8)
    tn = _pick_tile(N, TN_MAX, LANE)
    tk = _pick_tile(K, TK_MAX, LANE)
    Mp, Np, Kp = _round_up(M, tm), _round_up(N, tn), _round_up(K, tk)

    p = jnp.pad(p, ((0, Mp - M), (0, Kp - K)))
    w = jnp.pad(w, ((0, Kp - K), (0, Np - N)))
    b = jnp.pad(b, ((0, 0), (0, Np - N)))

    in_specs = [
        pl.BlockSpec((tm, tk), lambda i, j, k: (i, k)),
        pl.BlockSpec((tk, tn), lambda i, j, k: (k, j)),
        pl.BlockSpec((1, tn), lambda i, j, k: (0, j)),
    ]
    args = [p, w, b]
    if residual is None:
        kernel = partial(_gemm_kernel, relu=relu)
    else:
        assert residual.shape == (M, N)
        r = jnp.pad(residual, ((0, Mp - M), (0, Np - N)))
        in_specs.append(pl.BlockSpec((tm, tn), lambda i, j, k: (i, j)))
        args.append(r)
        kernel = partial(_gemm_res_kernel, relu=relu)

    out = pl.pallas_call(
        kernel,
        grid=(Mp // tm, Np // tn, Kp // tk),
        in_specs=in_specs,
        out_specs=pl.BlockSpec((tm, tn), lambda i, j, k: (i, j)),
        out_shape=jax.ShapeDtypeStruct((Mp, Np), out_dtype),
        scratch_shapes=[pltpu.VMEM((tm, tn), jnp.float32)],
        compiler_params=pltpu.CompilerParams(
            dimension_semantics=("parallel", "parallel", "arbitrary")),
    )(*args)
    return out[:M, :N]


# ----------------------------------------------------------------------------- #
# Direct 3x3 stride-1 conv kernel (no HBM im2col): 9 taps accumulated in VMEM     #
# ----------------------------------------------------------------------------- #
def _conv3x3_kernel(x_ref, w_ref, b_ref, o_ref, acc_ref, *, relu):
    # x_ref: (TR+2, Wo+2, Cx) row-strip incl. halo (bf16)
    # w_ref: (9*Cx, tn) tap-major folded weights (bf16)
    # b_ref: (1, tn) f32; o_ref: (TR, Wo, tn); acc_ref: (TR*Wo, tn) f32 scratch
    TR, Wo, tn = o_ref.shape
    Cx = x_ref.shape[-1]
    acc_ref[...] = jnp.zeros_like(acc_ref)
    t = 0
    for ky in range(3):
        for kx in range(3):
            patch = x_ref[ky:ky + TR, kx:kx + Wo, :].reshape(TR * Wo, Cx)
            acc_ref[...] += jnp.dot(patch, w_ref[t * Cx:(t + 1) * Cx, :],
                                    preferred_element_type=jnp.float32)
            t += 1
    y = acc_ref[...] + b_ref[...]
    if relu:
        y = jnp.maximum(y, 0.0)
    o_ref[...] = y.reshape(TR, Wo, tn).astype(o_ref.dtype)


def _conv3x3_s1_pallas(x_nhwc, w_mat, b_mat, relu):
    N, H, W, Cx = x_nhwc.shape
    Coutp = w_mat.shape[1]
    Ho, Wo = H, W
    TR = min(16, Ho)
    Hop = _round_up(Ho, TR)
    n_strips = Hop // TR
    Wp = Wo + 2

    xp = jnp.pad(x_nhwc, ((0, 0), (1, 1 + Hop - Ho), (1, 1), (0, 0)))
    # Row strips with a 2-row halo (duplicates only 2/TR of rows vs 9x for im2col).
    strips = jnp.stack(
        [xp[:, s * TR:s * TR + TR + 2] for s in range(n_strips)], axis=1)
    # strips: (N, n_strips, TR+2, Wp, Cx)

    tn = _pick_tile(Coutp, TN_MAX, LANE)

    out = pl.pallas_call(
        partial(_conv3x3_kernel, relu=relu),
        grid=(N, n_strips, Coutp // tn),
        in_specs=[
            pl.BlockSpec((None, None, TR + 2, Wp, Cx),
                         lambda n, s, j: (n, s, 0, 0, 0)),
            pl.BlockSpec((9 * Cx, tn), lambda n, s, j: (0, j)),
            pl.BlockSpec((1, tn), lambda n, s, j: (0, j)),
        ],
        out_specs=pl.BlockSpec((None, TR, Wo, tn), lambda n, s, j: (n, s, 0, j)),
        out_shape=jax.ShapeDtypeStruct((N, Hop, Wo, Coutp), jnp.bfloat16),
        scratch_shapes=[pltpu.VMEM((TR * Wo, tn), jnp.float32)],
        compiler_params=pltpu.CompilerParams(
            dimension_semantics=("parallel", "parallel", "parallel")),
    )(strips, w_mat, b_mat)
    return out[:, :Ho]


# ----------------------------------------------------------------------------- #
# Conv + BN (+ residual) (+ ReLU) wrappers                                        #
# ----------------------------------------------------------------------------- #
def conv_norm_pallas(x_nhwc, w_oihw, bn, stride, relu, residual=None):
    """PyTorch ConvNormLayer semantics: Conv2d(no bias, pad=(k-1)//2) + BN(eval),
    optional fused residual add and ReLU.  Activations are NHWC bf16; the input's
    channel dim may be zero-padded (>= the conv's true ch_in); the output channel
    dim is zero-padded to a multiple of 128 (exact-zero propagation)."""
    gamma, beta, mean, var = bn
    scale = gamma / jnp.sqrt(var + BN_EPS)
    w_f = (w_oihw * scale[:, None, None, None]).astype(jnp.float32)
    b_f = (beta - mean * scale).astype(jnp.float32)

    Cout, Cin_w, K, _ = w_oihw.shape
    N, H, W, Cx = x_nhwc.shape
    assert Cx >= Cin_w
    Coutp = _round_up(Cout, LANE)

    # (Cout, Cin, K, K) -> (K, K, Cx, Coutp) zero-padded -> (K*K*Cx, Coutp) bf16
    w_mat = jnp.transpose(w_f, (2, 3, 1, 0))
    w_mat = jnp.pad(w_mat, ((0, 0), (0, 0), (0, Cx - Cin_w), (0, Coutp - Cout)))
    w_mat = w_mat.reshape(K * K * Cx, Coutp).astype(jnp.bfloat16)
    b_mat = jnp.pad(b_f, (0, Coutp - Cout)).reshape(1, Coutp)

    x_bf16 = x_nhwc.astype(jnp.bfloat16)

    if K == 1:
        xs = x_bf16[:, ::stride, ::stride, :] if stride > 1 else x_bf16
        _, Ho, Wo, _ = xs.shape
        M = N * Ho * Wo
        r = None
        if residual is not None:
            assert residual.shape[-1] == Coutp
            r = residual.reshape(M, Coutp).astype(jnp.bfloat16)
        out = fused_matmul(xs.reshape(M, Cx), w_mat, b_mat, residual=r, relu=relu)
        return out.reshape(N, Ho, Wo, Coutp)

    assert K == 3
    if stride == 1 and residual is None:
        return _conv3x3_s1_pallas(x_bf16, w_mat, b_mat, relu)

    # TODO(synk): the stride-2 3x3 (first block of a downsampling stage) still
    # materializes im2col patches in HBM; a strided direct-conv kernel would remove it.
    pad = 1
    Ho = (H + 2 * pad - K) // stride + 1
    Wo = (W + 2 * pad - K) // stride + 1
    xp = jnp.pad(x_bf16, ((0, 0), (pad, pad), (pad, pad), (0, 0)))
    cols = []
    for ky in range(K):
        for kx in range(K):
            cols.append(xp[:, ky:ky + stride * Ho:stride,
                           kx:kx + stride * Wo:stride, :])
    M = N * Ho * Wo
    patches = jnp.concatenate(cols, axis=-1).reshape(M, K * K * Cx)
    r = None
    if residual is not None:
        assert residual.shape[-1] == Coutp
        r = residual.reshape(M, Coutp).astype(jnp.bfloat16)
    out = fused_matmul(patches, w_mat, b_mat, residual=r, relu=relu)
    return out.reshape(N, Ho, Wo, Coutp)


def conv_norm_ref(x_nhwc, w_oihw, bn, stride, relu, residual=None):
    """Pure-JAX (lax.conv) reference computing the same bf16-quantized math."""
    gamma, beta, mean, var = bn
    scale = gamma / jnp.sqrt(var + BN_EPS)
    w_f = (w_oihw * scale[:, None, None, None]).astype(jnp.float32)
    b_f = beta - mean * scale
    K = w_oihw.shape[-1]
    pad = (K - 1) // 2
    y = jax.lax.conv_general_dilated(
        x_nhwc.astype(jnp.bfloat16),
        jnp.transpose(w_f, (2, 3, 1, 0)).astype(jnp.bfloat16),
        window_strides=(stride, stride),
        padding=[(pad, pad), (pad, pad)],
        dimension_numbers=("NHWC", "HWIO", "NHWC"),
        preferred_element_type=jnp.float32)
    y = y + b_f
    if residual is not None:
        y = y + residual.astype(jnp.float32)
    if relu:
        y = jnp.maximum(y, 0.0)
    return y.astype(jnp.bfloat16)


# ----------------------------------------------------------------------------- #
# BottleNeck block and Blocks container                                           #
# ----------------------------------------------------------------------------- #
def bottleneck_forward(x_nhwc, p, stride, shortcut, conv_fn, variant="b"):
    # variant 'a' puts the stride on branch2a, otherwise on branch2b
    stride1, stride2 = (stride, 1) if variant == "a" else (1, stride)
    out = conv_fn(x_nhwc, p["branch2a"]["w"], p["branch2a"]["bn"], stride1, relu=True)
    out = conv_fn(out, p["branch2b"]["w"], p["branch2b"]["bn"], stride2, relu=True)
    if shortcut:
        short = x_nhwc
    else:
        # TODO(synk): variant 'd' (AvgPool2d + 1x1) shortcut not implemented; variant 'b' used.
        # TODO(synk): the shortcut-projection GEMM is not yet fused into the branch2c
        # pallas_call (its result makes one HBM round trip before the residual add).
        short = conv_fn(x_nhwc, p["short"]["w"], p["short"]["bn"], stride, relu=False)
    # branch2c conv+BN with fused residual add and final ReLU
    out = conv_fn(out, p["branch2c"]["w"], p["branch2c"]["bn"], 1, relu=True, residual=short)
    return out


def blocks_forward(x_nchw, blocks_params, stage_num, conv_fn=conv_norm_pallas):
    x = jnp.transpose(x_nchw, (0, 2, 3, 1)).astype(jnp.bfloat16)  # NCHW -> NHWC bf16
    for i, p in enumerate(blocks_params):
        stride = 2 if (i == 0 and stage_num != 2) else 1
        x = bottleneck_forward(x, p, stride, shortcut=(i != 0), conv_fn=conv_fn)
    ch_final = blocks_params[-1]["branch2c"]["w"].shape[0]
    x = x[..., :ch_final]                                         # drop channel padding
    return jnp.transpose(x, (0, 3, 1, 2)).astype(jnp.float32)     # NHWC -> NCHW


@partial(jax.jit, static_argnames=("stage_num", "use_pallas"))
def _forward(x_nchw, params, stage_num, use_pallas):
    conv_fn = conv_norm_pallas if use_pallas else conv_norm_ref
    return blocks_forward(x_nchw, params, stage_num, conv_fn)


# ----------------------------------------------------------------------------- #
# Deterministic parameter initialization                                          #
# ----------------------------------------------------------------------------- #
def init_conv_norm(key, ch_in, ch_out, k):
    k1, k2, k3, k4, k5 = jax.random.split(key, 5)
    w = jax.random.normal(k1, (ch_out, ch_in, k, k), jnp.float32) / jnp.sqrt(k * k * ch_in)
    gamma = 1.0 + 0.1 * jax.random.normal(k2, (ch_out,), jnp.float32)
    beta = 0.1 * jax.random.normal(k3, (ch_out,), jnp.float32)
    mean = 0.1 * jax.random.normal(k4, (ch_out,), jnp.float32)
    var = jnp.abs(jax.random.normal(k5, (ch_out,), jnp.float32)) + 0.5
    return {"w": w, "bn": (gamma, beta, mean, var)}


def init_bottleneck(key, ch_in, ch_out, shortcut):
    keys = jax.random.split(key, 4)
    width = ch_out
    p = {
        "branch2a": init_conv_norm(keys[0], ch_in, width, 1),
        "branch2b": init_conv_norm(keys[1], width, width, 3),
        "branch2c": init_conv_norm(keys[2], width, ch_out * EXPANSION, 1),
    }
    if not shortcut:
        p["short"] = init_conv_norm(keys[3], ch_in, ch_out * EXPANSION, 1)
    return p


def init_blocks(key, ch_in, ch_out, count):
    params = []
    for i in range(count):
        key, sub = jax.random.split(key)
        params.append(init_bottleneck(sub, ch_in, ch_out, shortcut=(i != 0)))
        if i == 0:
            ch_in = ch_out * EXPANSION
    return params


# ----------------------------------------------------------------------------- #
if __name__ == "__main__":
    key = jax.random.PRNGKey(0)
    kx, kp = jax.random.split(key)

    # Blocks(BottleNeck, ch_in=4, ch_out=4, count=2, stage_num=3) on (2, 4, 16, 16) NCHW.
    N, Cin, H, W = 2, 4, 16, 16
    ch_out, count, stage_num = 4, 2, 3  # stage_num != 2 -> first block has stride 2

    x = jax.random.normal(kx, (N, Cin, H, W), jnp.float32)
    params = init_blocks(kp, Cin, ch_out, count)

    out = jax.block_until_ready(_forward(x, params, stage_num=stage_num, use_pallas=True))
    expected_shape = (N, ch_out * EXPANSION, H // 2, W // 2)
    assert out.shape == expected_shape, (out.shape, expected_shape)

    # Cross-check against a pure-JAX (lax.conv) reference of the same bf16 math.
    ref = jax.block_until_ready(_forward(x, params, stage_num=stage_num, use_pallas=False))
    err = float(jnp.max(jnp.abs(out - ref)))
    assert jnp.allclose(out, ref, atol=5e-2, rtol=5e-2), err

    print("KERNEL_OK")
</pallas_src>

<mosaic_0001>
module attributes {stable_mosaic.version = 11 : i64} {
  func.func @_gemm_kernel(%arg0: i32, %arg1: i32, %arg2: i32, %arg3: memref<512x4xbf16, #tpu.memory_space<vmem>>, %arg4: memref<4x128xbf16, #tpu.memory_space<vmem>>, %arg5: memref<1x128xf32, #tpu.memory_space<vmem>>, %arg6: memref<512x128xbf16, #tpu.memory_space<vmem>>, %arg7: memref<512x128xf32, #tpu.memory_space<vmem>>) attributes {dimension_semantics = [#tpu.dimension_semantics<parallel>, #tpu.dimension_semantics<parallel>, #tpu.dimension_semantics<arbitrary>], iteration_bounds = array<i64: 1, 1, 1>, scalar_prefetch = 0 : i64, scratch_operands = 1 : i64, tpu.core_type = #tpu.core_type<tc>, window_params = [{transform_indices = @transform_0, window_bounds = array<i64: 512, 4>}, {transform_indices = @transform_1, window_bounds = array<i64: 4, 128>}, {transform_indices = @transform_2, window_bounds = array<i64: 1, 128>}, {transform_indices = @transform_3, window_bounds = array<i64: 512, 128>}]} {
    %c0_i32 = arith.constant 0 : i32
    %0 = arith.cmpi eq, %arg2, %c0_i32 : i32
    %1 = arith.extui %0 : i1 to i32
    %c0_i32_0 = arith.constant 0 : i32
    %2 = arith.cmpi ne, %1, %c0_i32_0 : i32
    scf.if %2 {
      %cst_10 = arith.constant 0.000000e+00 : f32
      %12 = vector.broadcast %cst_10 : f32 to vector<512x128xf32>
      %c0_11 = arith.constant 0 : index
      %c0_12 = arith.constant 0 : index
      %13 = vector.load %arg7[%c0_11, %c0_12] : memref<512x128xf32, #tpu.memory_space<vmem>>, vector<512x128xf32>
      tpu.vector_store %arg7[%c0_11, %c0_12], %12 {strides = array<i32>} : memref<512x128xf32, #tpu.memory_space<vmem>>, vector<512x128xf32>,
    } else {
    }
    %c0 = arith.constant 0 : index
    %c0_1 = arith.constant 0 : index
    %3 = vector.load %arg7[%c0, %c0_1] : memref<512x128xf32, #tpu.memory_space<vmem>>, vector<512x128xf32>
    %c0_2 = arith.constant 0 : index
    %c0_3 = arith.constant 0 : index
    %4 = vector.load %arg3[%c0_2, %c0_3] : memref<512x4xbf16, #tpu.memory_space<vmem>>, vector<512x4xbf16>
    %c0_4 = arith.constant 0 : index
    %c0_5 = arith.constant 0 : index
    %5 = vector.load %arg4[%c0_4, %c0_5] : memref<4x128xbf16, #tpu.memory_space<vmem>>, vector<4x128xbf16>
    %cst = arith.constant dense<0.000000e+00> : vector<512x128xf32>
    %6 = tpu.matmul %4, %5, %cst {dimension_numbers = #tpu.dot_dimension_numbers<[1], [0], [0], [1], [0, 0, 1, 1], [], []>} : vector<512x4xbf16>, vector<4x128xbf16>, vector<512x128xf32> -> vector<512x128xf32>
    %7 = arith.addf %3, %6 : vector<512x128xf32>
    %c0_6 = arith.constant 0 : index
    %c0_7 = arith.constant 0 : index
    %8 = vector.load %arg7[%c0_6, %c0_7] : memref<512x128xf32, #tpu.memory_space<vmem>>, vector<512x128xf32>
    tpu.vector_store %arg7[%c0_6, %c0_7], %7 {strides = array<i32>} : memref<512x128xf32, #tpu.memory_space<vmem>>, vector<512x128xf32>,
    %c0_i32_8 = arith.constant 0 : i32
    %9 = arith.cmpi eq, %arg2, %c0_i32_8 : i32
    %10 = arith.extui %9 : i1 to i32
    %c0_i32_9 = arith.constant 0 : i32
    %11 = arith.cmpi ne, %10, %c0_i32_9 : i32
    scf.if %11 {
      %c0_10 = arith.constant 0 : index
      %c0_11 = arith.constant 0 : index
      %12 = vector.load %arg7[%c0_10, %c0_11] : memref<512x128xf32, #tpu.memory_space<vmem>>, vector<512x128xf32>
      %c0_12 = arith.constant 0 : index
      %c0_13 = arith.constant 0 : index
      %13 = vector.load %arg5[%c0_12, %c0_13] : memref<1x128xf32, #tpu.memory_space<vmem>>, vector<1x128xf32>
      %14 = vector.broadcast %13 : vector<1x128xf32> to vector<512x128xf32>
      %15 = arith.addf %12, %14 : vector<512x128xf32>
      %cst_14 = arith.constant 0.000000e+00 : f32
      %16 = vector.broadcast %cst_14 : f32 to vector<512x128xf32>
      %17 = arith.maximumf %15, %16 : vector<512x128xf32>
      %18 = arith.truncf %17 : vector<512x128xf32> to vector<512x128xbf16>
      %c0_15 = arith.constant 0 : index
      %c0_16 = arith.constant 0 : index
      %19 = vector.load %arg6[%c0_15, %c0_16] : memref<512x128xbf16, #tpu.memory_space<vmem>>, vector<512x128xbf16>
      tpu.vector_store %arg6[%c0_15, %c0_16], %18 {strides = array<i32>} : memref<512x128xbf16, #tpu.memory_space<vmem>>, vector<512x128xbf16>,
    } else {
    }
    return
  }
  func.func @transform_0(%arg0: i32, %arg1: i32, %arg2: i32) -> (i32, i32) {
    %c0_i32 = arith.constant 0 : i32
    return %arg0, %arg2 : i32, i32
  }
  func.func @transform_1(%arg0: i32, %arg1: i32, %arg2: i32) -> (i32, i32) {
    %c0_i32 = arith.constant 0 : i32
    return %arg2, %arg1 : i32, i32
  }
  func.func @transform_2(%arg0: i32, %arg1: i32, %arg2: i32) -> (i32, i32) {
    %c0_i32 = arith.constant 0 : i32
    %c0_i32_0 = arith.constant 0 : i32
    return %c0_i32, %arg1 : i32, i32
  }
  func.func @transform_3(%arg0: i32, %arg1: i32, %arg2: i32) -> (i32, i32) {
    %c0_i32 = arith.constant 0 : i32
    return %arg0, %arg1 : i32, i32
  }
}

module attributes {stable_mosaic.version = 11 : i64} {
  func.func @_gemm_kernel(%arg0: i32, %arg1: i32, %arg2: i32, %arg3: memref<128x384xbf16, #tpu.memory_space<vmem>>, %arg4: memref<384x128xbf16, #tpu.memory_space<vmem>>, %arg5: memref<1x128xf32, #tpu.memory_space<vmem>>, %arg6: memref<128x128xbf16, #tpu.memory_space<vmem>>, %arg7: memref<128x128xf32, #tpu.memory_space<vmem>>) attributes {dimension_semantics = [#tpu.dimension_semantics<parallel>, #tpu.dimension_semantics<parallel>, #tpu.dimension_semantics<arbitrary>], iteration_bounds = array<i64: 1, 1, 3>, scalar_prefetch = 0 : i64, scratch_operands = 1 : i64, tpu.core_type = #tpu.core_type<tc>, window_params = [{transform_indices = @transform_0, window_bounds = array<i64: 128, 384>}, {transform_indices = @transform_1, window_bounds = array<i64: 384, 128>}, {transform_indices = @transform_2, window_bounds = array<i64: 1, 128>}, {transform_indices = @transform_3, window_bounds = array<i64: 128, 128>}]} {
    %c0_i32 = arith.constant 0 : i32
    %0 = arith.cmpi eq, %arg2, %c0_i32 : i32
    %1 = arith.extui %0 : i1 to i32
    %c0_i32_0 = arith.constant 0 : i32
    %2 = arith.cmpi ne, %1, %c0_i32_0 : i32
    scf.if %2 {
      %cst_9 = arith.constant 0.000000e+00 : f32
      %12 = vector.broadcast %cst_9 : f32 to vector<128x128xf32>
      %c0_10 = arith.constant 0 : index
      %c0_11 = arith.constant 0 : index
      %13 = vector.load %arg7[%c0_10, %c0_11] : memref<128x128xf32, #tpu.memory_space<vmem>>, vector<128x128xf32>
      tpu.vector_store %arg7[%c0_10, %c0_11], %12 {strides = array<i32>} : memref<128x128xf32, #tpu.memory_space<vmem>>, vector<128x128xf32>,
    } else {
    }
    %c0 = arith.constant 0 : index
    %c0_1 = arith.constant 0 : index
    %3 = vector.load %arg7[%c0, %c0_1] : memref<128x128xf32, #tpu.memory_space<vmem>>, vector<128x128xf32>
    %c0_2 = arith.constant 0 : index
    %c0_3 = arith.constant 0 : index
    %4 = vector.load %arg3[%c0_2, %c0_3] : memref<128x384xbf16, #tpu.memory_space<vmem>>, vector<128x384xbf16>
    %c0_4 = arith.constant 0 : index
    %c0_5 = arith.constant 0 : index
    %5 = vector.load %arg4[%c0_4, %c0_5] : memref<384x128xbf16, #tpu.memory_space<vmem>>, vector<384x128xbf16>
    %cst = arith.constant dense<0.000000e+00> : vector<128x128xf32>
    %6 = tpu.matmul %4, %5, %cst {dimension_numbers = #tpu.dot_dimension_numbers<[1], [0], [0], [1], [0, 0, 1, 1], [], []>} : vector<128x384xbf16>, vector<384x128xbf16>, vector<128x128xf32> -> vector<128x128xf32>
    %7 = arith.addf %3, %6 : vector<128x128xf32>
    %c0_6 = arith.constant 0 : index
    %c0_7 = arith.constant 0 : index
    %8 = vector.load %arg7[%c0_6, %c0_7] : memref<128x128xf32, #tpu.memory_space<vmem>>, vector<128x128xf32>
    tpu.vector_store %arg7[%c0_6, %c0_7], %7 {strides = array<i32>} : memref<128x128xf32, #tpu.memory_space<vmem>>, vector<128x128xf32>,
    %c2_i32 = arith.constant 2 : i32
    %9 = arith.cmpi eq, %arg2, %c2_i32 : i32
    %10 = arith.extui %9 : i1 to i32
    %c0_i32_8 = arith.constant 0 : i32
    %11 = arith.cmpi ne, %10, %c0_i32_8 : i32
    scf.if %11 {
      %c0_9 = arith.constant 0 : index
      %c0_10 = arith.constant 0 : index
      %12 = vector.load %arg7[%c0_9, %c0_10] : memref<128x128xf32, #tpu.memory_space<vmem>>, vector<128x128xf32>
      %c0_11 = arith.constant 0 : index
      %c0_12 = arith.constant 0 : index
      %13 = vector.load %arg5[%c0_11, %c0_12] : memref<1x128xf32, #tpu.memory_space<vmem>>, vector<1x128xf32>
      %14 = vector.broadcast %13 : vector<1x128xf32> to vector<128x128xf32>
      %15 = arith.addf %12, %14 : vector<128x128xf32>
      %cst_13 = arith.constant 0.000000e+00 : f32
      %16 = vector.broadcast %cst_13 : f32 to vector<128x128xf32>
      %17 = arith.maximumf %15, %16 : vector<128x128xf32>
      %18 = arith.truncf %17 : vector<128x128xf32> to vector<128x128xbf16>
      %c0_14 = arith.constant 0 : index
      %c0_15 = arith.constant 0 : index
      %19 = vector.load %arg6[%c0_14, %c0_15] : memref<128x128xbf16, #tpu.memory_space<vmem>>, vector<128x128xbf16>
      tpu.vector_store %arg6[%c0_14, %c0_15], %18 {strides = array<i32>} : memref<128x128xbf16, #tpu.memory_space<vmem>>, vector<128x128xbf16>,
    } else {
    }
    return
  }
  func.func @transform_0(%arg0: i32, %arg1: i32, %arg2: i32) -> (i32, i32) {
    %c0_i32 = arith.constant 0 : i32
    return %arg0, %arg2 : i32, i32
  }
  func.func @transform_1(%arg0: i32, %arg1: i32, %arg2: i32) -> (i32, i32) {
    %c0_i32 = arith.constant 0 : i32
    return %arg2, %arg1 : i32, i32
  }
  func.func @transform_2(%arg0: i32, %arg1: i32, %arg2: i32) -> (i32, i32) {
    %c0_i32 = arith.constant 0 : i32
    %c0_i32_0 = arith.constant 0 : i32
    return %c0_i32, %arg1 : i32, i32
  }
  func.func @transform_3(%arg0: i32, %arg1: i32, %arg2: i32) -> (i32, i32) {
    %c0_i32 = arith.constant 0 : i32
    return %arg0, %arg1 : i32, i32
  }
}

module attributes {stable_mosaic.version = 11 : i64} {
  func.func @_gemm_res_kernel(%arg0: i32, %arg1: i32, %arg2: i32, %arg3: memref<128x128xbf16, #tpu.memory_space<vmem>>, %arg4: memref<128x128xbf16, #tpu.memory_space<vmem>>, %arg5: memref<1x128xf32, #tpu.memory_space<vmem>>, %arg6: memref<128x128xbf16, #tpu.memory_space<vmem>>, %arg7: memref<128x128xbf16, #tpu.memory_space<vmem>>, %arg8: memref<128x128xf32, #tpu.memory_space<vmem>>) attributes {dimension_semantics = [#tpu.dimension_semantics<parallel>, #tpu.dimension_semantics<parallel>, #tpu.dimension_semantics<arbitrary>], iteration_bounds = array<i64: 1, 1, 1>, scalar_prefetch = 0 : i64, scratch_operands = 1 : i64, tpu.core_type = #tpu.core_type<tc>, window_params = [{transform_indices = @transform_0, window_bounds = array<i64: 128, 128>}, {transform_indices = @transform_1, window_bounds = array<i64: 128, 128>}, {transform_indices = @transform_2, window_bounds = array<i64: 1, 128>}, {transform_indices = @transform_3, window_bounds = array<i64: 128, 128>}, {transform_indices = @transform_4, window_bounds = array<i64: 128, 128>}]} {
    %c0_i32 = arith.constant 0 : i32
    %0 = arith.cmpi eq, %arg2, %c0_i32 : i32
    %1 = arith.extui %0 : i1 to i32
    %c0_i32_0 = arith.constant 0 : i32
    %2 = arith.cmpi ne, %1, %c0_i32_0 : i32
    scf.if %2 {
      %cst_10 = arith.constant 0.000000e+00 : f32
      %12 = vector.broadcast %cst_10 : f32 to vector<128x128xf32>
      %c0_11 = arith.constant 0 : index
      %c0_12 = arith.constant 0 : index
      %13 = vector.load %arg8[%c0_11, %c0_12] : memref<128x128xf32, #tpu.memory_space<vmem>>, vector<128x128xf32>
      tpu.vector_store %arg8[%c0_11, %c0_12], %12 {strides = array<i32>} : memref<128x128xf32, #tpu.memory_space<vmem>>, vector<128x128xf32>,
    } else {
    }
    %c0 = arith.constant 0 : index
    %c0_1 = arith.constant 0 : index
    %3 = vector.load %arg8[%c0, %c0_1] : memref<128x128xf32, #tpu.memory_space<vmem>>, vector<128x128xf32>
    %c0_2 = arith.constant 0 : index
    %c0_3 = arith.constant 0 : index
    %4 = vector.load %arg3[%c0_2, %c0_3] : memref<128x128xbf16, #tpu.memory_space<vmem>>, vector<128x128xbf16>
    %c0_4 = arith.constant 0 : index
    %c0_5 = arith.constant 0 : index
    %5 = vector.load %arg4[%c0_4, %c0_5] : memref<128x128xbf16, #tpu.memory_space<vmem>>, vector<128x128xbf16>
    %cst = arith.constant dense<0.000000e+00> : vector<128x128xf32>
    %6 = tpu.matmul %4, %5, %cst {dimension_numbers = #tpu.dot_dimension_numbers<[1], [0], [0], [1], [0, 0, 1, 1], [], []>} : vector<128x128xbf16>, vector<128x128xbf16>, vector<128x128xf32> -> vector<128x128xf32>
    %7 = arith.addf %3, %6 : vector<128x128xf32>
    %c0_6 = arith.constant 0 : index
    %c0_7 = arith.constant 0 : index
    %8 = vector.load %arg8[%c0_6, %c0_7] : memref<128x128xf32, #tpu.memory_space<vmem>>, vector<128x128xf32>
    tpu.vector_store %arg8[%c0_6, %c0_7], %7 {strides = array<i32>} : memref<128x128xf32, #tpu.memory_space<vmem>>, vector<128x128xf32>,
    %c0_i32_8 = arith.constant 0 : i32
    %9 = arith.cmpi eq, %arg2, %c0_i32_8 : i32
    %10 = arith.extui %9 : i1 to i32
    %c0_i32_9 = arith.constant 0 : i32
    %11 = arith.cmpi ne, %10, %c0_i32_9 : i32
    scf.if %11 {
      %c0_10 = arith.constant 0 : index
      %c0_11 = arith.constant 0 : index
      %12 = vector.load %arg8[%c0_10, %c0_11] : memref<128x128xf32, #tpu.memory_space<vmem>>, vector<128x128xf32>
      %c0_12 = arith.constant 0 : index
      %c0_13 = arith.constant 0 : index
      %13 = vector.load %arg5[%c0_12, %c0_13] : memref<1x128xf32, #tpu.memory_space<vmem>>, vector<1x128xf32>
      %14 = vector.broadcast %13 : vector<1x128xf32> to vector<128x128xf32>
      %15 = arith.addf %12, %14 : vector<128x128xf32>
      %c0_14 = arith.constant 0 : index
      %c0_15 = arith.constant 0 : index
      %16 = vector.load %arg6[%c0_14, %c0_15] : memref<128x128xbf16, #tpu.memory_space<vmem>>, vector<128x128xbf16>
      %17 = arith.extf %16 : vector<128x128xbf16> to vector<128x128xf32>
      %18 = arith.addf %15, %17 : vector<128x128xf32>
      %cst_16 = arith.constant 0.000000e+00 : f32
      %19 = vector.broadcast %cst_16 : f32 to vector<128x128xf32>
      %20 = arith.maximumf %18, %19 : vector<128x128xf32>
      %21 = arith.truncf %20 : vector<128x128xf32> to vector<128x128xbf16>
      %c0_17 = arith.constant 0 : index
      %c0_18 = arith.constant 0 : index
      %22 = vector.load %arg7[%c0_17, %c0_18] : memref<128x128xbf16, #tpu.memory_space<vmem>>, vector<128x128xbf16>
      tpu.vector_store %arg7[%c0_17, %c0_18], %21 {strides = array<i32>} : memref<128x128xbf16, #tpu.memory_space<vmem>>, vector<128x128xbf16>,
    } else {
    }
    return
  }
  func.func @transform_0(%arg0: i32, %arg1: i32, %arg2: i32) -> (i32, i32) {
    %c0_i32 = arith.constant 0 : i32
    return %arg0, %arg2 : i32, i32
  }
  func.func @transform_1(%arg0: i32, %arg1: i32, %arg2: i32) -> (i32, i32) {
    %c0_i32 = arith.constant 0 : i32
    return %arg2, %arg1 : i32, i32
  }
  func.func @transform_2(%arg0: i32, %arg1: i32, %arg2: i32) -> (i32, i32) {
    %c0_i32 = arith.constant 0 : i32
    %c0_i32_0 = arith.constant 0 : i32
    return %c0_i32, %arg1 : i32, i32
  }
  func.func @transform_3(%arg0: i32, %arg1: i32, %arg2: i32) -> (i32, i32) {
    %c0_i32 = arith.constant 0 : i32
    return %arg0, %arg1 : i32, i32
  }
  func.func @transform_4(%arg0: i32, %arg1: i32, %arg2: i32) -> (i32, i32) {
    %c0_i32 = arith.constant 0 : i32
    return %arg0, %arg1 : i32, i32
  }
}

module attributes {stable_mosaic.version = 11 : i64} {
  func.func @_gemm_kernel(%arg0: i32, %arg1: i32, %arg2: i32, %arg3: memref<128x4xbf16, #tpu.memory_space<vmem>>, %arg4: memref<4x128xbf16, #tpu.memory_space<vmem>>, %arg5: memref<1x128xf32, #tpu.memory_space<vmem>>, %arg6: memref<128x128xbf16, #tpu.memory_space<vmem>>, %arg7: memref<128x128xf32, #tpu.memory_space<vmem>>) attributes {dimension_semantics = [#tpu.dimension_semantics<parallel>, #tpu.dimension_semantics<parallel>, #tpu.dimension_semantics<arbitrary>], iteration_bounds = array<i64: 1, 1, 1>, scalar_prefetch = 0 : i64, scratch_operands = 1 : i64, tpu.core_type = #tpu.core_type<tc>, window_params = [{transform_indices = @transform_0, window_bounds = array<i64: 128, 4>}, {transform_indices = @transform_1, window_bounds = array<i64: 4, 128>}, {transform_indices = @transform_2, window_bounds = array<i64: 1, 128>}, {transform_indices = @transform_3, window_bounds = array<i64: 128, 128>}]} {
    %c0_i32 = arith.constant 0 : i32
    %0 = arith.cmpi eq, %arg2, %c0_i32 : i32
    %1 = arith.extui %0 : i1 to i32
    %c0_i32_0 = arith.constant 0 : i32
    %2 = arith.cmpi ne, %1, %c0_i32_0 : i32
    scf.if %2 {
      %cst_10 = arith.constant 0.000000e+00 : f32
      %12 = vector.broadcast %cst_10 : f32 to vector<128x128xf32>
      %c0_11 = arith.constant 0 : index
      %c0_12 = arith.constant 0 : index
      %13 = vector.load %arg7[%c0_11, %c0_12] : memref<128x128xf32, #tpu.memory_space<vmem>>, vector<128x128xf32>
      tpu.vector_store %arg7[%c0_11, %c0_12], %12 {strides = array<i32>} : memref<128x128xf32, #tpu.memory_space<vmem>>, vector<128x128xf32>,
    } else {
    }
    %c0 = arith.constant 0 : index
    %c0_1 = arith.constant 0 : index
    %3 = vector.load %arg7[%c0, %c0_1] : memref<128x128xf32, #tpu.memory_space<vmem>>, vector<128x128xf32>
    %c0_2 = arith.constant 0 : index
    %c0_3 = arith.constant 0 : index
    %4 = vector.load %arg3[%c0_2, %c0_3] : memref<128x4xbf16, #tpu.memory_space<vmem>>, vector<128x4xbf16>
    %c0_4 = arith.constant 0 : index
    %c0_5 = arith.constant 0 : index
    %5 = vector.load %arg4[%c0_4, %c0_5] : memref<4x128xbf16, #tpu.memory_space<vmem>>, vector<4x128xbf16>
    %cst = arith.constant dense<0.000000e+00> : vector<128x128xf32>
    %6 = tpu.matmul %4, %5, %cst {dimension_numbers = #tpu.dot_dimension_numbers<[1], [0], [0], [1], [0, 0, 1, 1], [], []>} : vector<128x4xbf16>, vector<4x128xbf16>, vector<128x128xf32> -> vector<128x128xf32>
    %7 = arith.addf %3, %6 : vector<128x128xf32>
    %c0_6 = arith.constant 0 : index
    %c0_7 = arith.constant 0 : index
    %8 = vector.load %arg7[%c0_6, %c0_7] : memref<128x128xf32, #tpu.memory_space<vmem>>, vector<128x128xf32>
    tpu.vector_store %arg7[%c0_6, %c0_7], %7 {strides = array<i32>} : memref<128x128xf32, #tpu.memory_space<vmem>>, vector<128x128xf32>,
    %c0_i32_8 = arith.constant 0 : i32
    %9 = arith.cmpi eq, %arg2, %c0_i32_8 : i32
    %10 = arith.extui %9 : i1 to i32
    %c0_i32_9 = arith.constant 0 : i32
    %11 = arith.cmpi ne, %10, %c0_i32_9 : i32
    scf.if %11 {
      %c0_10 = arith.constant 0 : index
      %c0_11 = arith.constant 0 : index
      %12 = vector.load %arg7[%c0_10, %c0_11] : memref<128x128xf32, #tpu.memory_space<vmem>>, vector<128x128xf32>
      %c0_12 = arith.constant 0 : index
      %c0_13 = arith.constant 0 : index
      %13 = vector.load %arg5[%c0_12, %c0_13] : memref<1x128xf32, #tpu.memory_space<vmem>>, vector<1x128xf32>
      %14 = vector.broadcast %13 : vector<1x128xf32> to vector<128x128xf32>
      %15 = arith.addf %12, %14 : vector<128x128xf32>
      %16 = arith.truncf %15 : vector<128x128xf32> to vector<128x128xbf16>
      %c0_14 = arith.constant 0 : index
      %c0_15 = arith.constant 0 : index
      %17 = vector.load %arg6[%c0_14, %c0_15] : memref<128x128xbf16, #tpu.memory_space<vmem>>, vector<128x128xbf16>
      tpu.vector_store %arg6[%c0_14, %c0_15], %16 {strides = array<i32>} : memref<128x128xbf16, #tpu.memory_space<vmem>>, vector<128x128xbf16>,
    } else {
    }
    return
  }
  func.func @transform_0(%arg0: i32, %arg1: i32, %arg2: i32) -> (i32, i32) {
    %c0_i32 = arith.constant 0 : i32
    return %arg0, %arg2 : i32, i32
  }
  func.func @transform_1(%arg0: i32, %arg1: i32, %arg2: i32) -> (i32, i32) {
    %c0_i32 = arith.constant 0 : i32
    return %arg2, %arg1 : i32, i32
  }
  func.func @transform_2(%arg0: i32, %arg1: i32, %arg2: i32) -> (i32, i32) {
    %c0_i32 = arith.constant 0 : i32
    %c0_i32_0 = arith.constant 0 : i32
    return %c0_i32, %arg1 : i32, i32
  }
  func.func @transform_3(%arg0: i32, %arg1: i32, %arg2: i32) -> (i32, i32) {
    %c0_i32 = arith.constant 0 : i32
    return %arg0, %arg1 : i32, i32
  }
}

module attributes {stable_mosaic.version = 11 : i64} {
  func.func @_gemm_kernel(%arg0: i32, %arg1: i32, %arg2: i32, %arg3: memref<128x128xbf16, #tpu.memory_space<vmem>>, %arg4: memref<128x128xbf16, #tpu.memory_space<vmem>>, %arg5: memref<1x128xf32, #tpu.memory_space<vmem>>, %arg6: memref<128x128xbf16, #tpu.memory_space<vmem>>, %arg7: memref<128x128xf32, #tpu.memory_space<vmem>>) attributes {dimension_semantics = [#tpu.dimension_semantics<parallel>, #tpu.dimension_semantics<parallel>, #tpu.dimension_semantics<arbitrary>], iteration_bounds = array<i64: 1, 1, 1>, scalar_prefetch = 0 : i64, scratch_operands = 1 : i64, tpu.core_type = #tpu.core_type<tc>, window_params = [{transform_indices = @transform_0, window_bounds = array<i64: 128, 128>}, {transform_indices = @transform_1, window_bounds = array<i64: 128, 128>}, {transform_indices = @transform_2, window_bounds = array<i64: 1, 128>}, {transform_indices = @transform_3, window_bounds = array<i64: 128, 128>}]} {
    %c0_i32 = arith.constant 0 : i32
    %0 = arith.cmpi eq, %arg2, %c0_i32 : i32
    %1 = arith.extui %0 : i1 to i32
    %c0_i32_0 = arith.constant 0 : i32
    %2 = arith.cmpi ne, %1, %c0_i32_0 : i32
    scf.if %2 {
      %cst_10 = arith.constant 0.000000e+00 : f32
      %12 = vector.broadcast %cst_10 : f32 to vector<128x128xf32>
      %c0_11 = arith.constant 0 : index
      %c0_12 = arith.constant 0 : index
      %13 = vector.load %arg7[%c0_11, %c0_12] : memref<128x128xf32, #tpu.memory_space<vmem>>, vector<128x128xf32>
      tpu.vector_store %arg7[%c0_11, %c0_12], %12 {strides = array<i32>} : memref<128x128xf32, #tpu.memory_space<vmem>>, vector<128x128xf32>,
    } else {
    }
    %c0 = arith.constant 0 : index
    %c0_1 = arith.constant 0 : index
    %3 = vector.load %arg7[%c0, %c0_1] : memref<128x128xf32, #tpu.memory_space<vmem>>, vector<128x128xf32>
    %c0_2 = arith.constant 0 : index
    %c0_3 = arith.constant 0 : index
    %4 = vector.load %arg3[%c0_2, %c0_3] : memref<128x128xbf16, #tpu.memory_space<vmem>>, vector<128x128xbf16>
    %c0_4 = arith.constant 0 : index
    %c0_5 = arith.constant 0 : index
    %5 = vector.load %arg4[%c0_4, %c0_5] : memref<128x128xbf16, #tpu.memory_space<vmem>>, vector<128x128xbf16>
    %cst = arith.constant dense<0.000000e+00> : vector<128x128xf32>
    %6 = tpu.matmul %4, %5, %cst {dimension_numbers = #tpu.dot_dimension_numbers<[1], [0], [0], [1], [0, 0, 1, 1], [], []>} : vector<128x128xbf16>, vector<128x128xbf16>, vector<128x128xf32> -> vector<128x128xf32>
    %7 = arith.addf %3, %6 : vector<128x128xf32>
    %c0_6 = arith.constant 0 : index
    %c0_7 = arith.constant 0 : index
    %8 = vector.load %arg7[%c0_6, %c0_7] : memref<128x128xf32, #tpu.memory_space<vmem>>, vector<128x128xf32>
    tpu.vector_store %arg7[%c0_6, %c0_7], %7 {strides = array<i32>} : memref<128x128xf32, #tpu.memory_space<vmem>>, vector<128x128xf32>,
    %c0_i32_8 = arith.constant 0 : i32
    %9 = arith.cmpi eq, %arg2, %c0_i32_8 : i32
    %10 = arith.extui %9 : i1 to i32
    %c0_i32_9 = arith.constant 0 : i32
    %11 = arith.cmpi ne, %10, %c0_i32_9 : i32
    scf.if %11 {
      %c0_10 = arith.constant 0 : index
      %c0_11 = arith.constant 0 : index
      %12 = vector.load %arg7[%c0_10, %c0_11] : memref<128x128xf32, #tpu.memory_space<vmem>>, vector<128x128xf32>
      %c0_12 = arith.constant 0 : index
      %c0_13 = arith.constant 0 : index
      %13 = vector.load %arg5[%c0_12, %c0_13] : memref<1x128xf32, #tpu.memory_space<vmem>>, vector<1x128xf32>
      %14 = vector.broadcast %13 : vector<1x128xf32> to vector<128x128xf32>
      %15 = arith.addf %12, %14 : vector<128x128xf32>
      %cst_14 = arith.constant 0.000000e+00 : f32
      %16 = vector.broadcast %cst_14 : f32 to vector<128x128xf32>
      %17 = arith.maximumf %15, %16 : vector<128x128xf32>
      %18 = arith.truncf %17 : vector<128x128xf32> to vector<128x128xbf16>
      %c0_15 = arith.constant 0 : index
      %c0_16 = arith.constant 0 : index
      %19 = vector.load %arg6[%c0_15, %c0_16] : memref<128x128xbf16, #tpu.memory_space<vmem>>, vector<128x128xbf16>
      tpu.vector_store %arg6[%c0_15, %c0_16], %18 {strides = array<i32>} : memref<128x128xbf16, #tpu.memory_space<vmem>>, vector<128x128xbf16>,
    } else {
    }
    return
  }
  func.func @transform_0(%arg0: i32, %arg1: i32, %arg2: i32) -> (i32, i32) {
    %c0_i32 = arith.constant 0 : i32
    return %arg0, %arg2 : i32, i32
  }
  func.func @transform_1(%arg0: i32, %arg1: i32, %arg2: i32) -> (i32, i32) {
    %c0_i32 = arith.constant 0 : i32
    return %arg2, %arg1 : i32, i32
  }
  func.func @transform_2(%arg0: i32, %arg1: i32, %arg2: i32) -> (i32, i32) {
    %c0_i32 = arith.constant 0 : i32
    %c0_i32_0 = arith.constant 0 : i32
    return %c0_i32, %arg1 : i32, i32
  }
  func.func @transform_3(%arg0: i32, %arg1: i32, %arg2: i32) -> (i32, i32) {
    %c0_i32 = arith.constant 0 : i32
    return %arg0, %arg1 : i32, i32
  }
}

module attributes {stable_mosaic.version = 11 : i64} {
  func.func @_conv3x3_kernel(%arg0: i32, %arg1: i32, %arg2: i32, %arg3: memref<1x1x10x10x128xbf16, #tpu.memory_space<vmem>>, %arg4: memref<1152x128xbf16, #tpu.memory_space<vmem>>, %arg5: memref<1x128xf32, #tpu.memory_space<vmem>>, %arg6: memref<1x8x8x128xbf16, #tpu.memory_space<vmem>>, %arg7: memref<64x128xf32, #tpu.memory_space<vmem>>) attributes {dimension_semantics = [#tpu.dimension_semantics<parallel>, #tpu.dimension_semantics<parallel>, #tpu.dimension_semantics<parallel>], iteration_bounds = array<i64: 2, 1, 1>, scalar_prefetch = 0 : i64, scratch_operands = 1 : i64, tpu.core_type = #tpu.core_type<tc>, window_params = [{transform_indices = @transform_0, window_bounds = array<i64: 1, 1, 10, 10, 128>}, {transform_indices = @transform_1, window_bounds = array<i64: 1152, 128>}, {transform_indices = @transform_2, window_bounds = array<i64: 1, 128>}, {transform_indices = @transform_3, window_bounds = array<i64: 1, 8, 8, 128>}]} {
    %cst = arith.constant 0.000000e+00 : f32
    %0 = vector.broadcast %cst : f32 to vector<64x128xf32>
    %c0 = arith.constant 0 : index
    %c0_0 = arith.constant 0 : index
    %1 = vector.load %arg7[%c0, %c0_0] : memref<64x128xf32, #tpu.memory_space<vmem>>, vector<64x128xf32>
    tpu.vector_store %arg7[%c0, %c0_0], %0 {strides = array<i32>} : memref<64x128xf32, #tpu.memory_space<vmem>>, vector<64x128xf32>,
    %c0_1 = arith.constant 0 : index
    %c0_2 = arith.constant 0 : index
    %c0_3 = arith.constant 0 : index
    %c0_4 = arith.constant 0 : index
    %c0_5 = arith.constant 0 : index
    %2 = vector.load %arg3[%c0_1, %c0_2, %c0_3, %c0_4, %c0_5] : memref<1x1x10x10x128xbf16, #tpu.memory_space<vmem>>, vector<1x1x8x8x128xbf16>
    %3 = vector.shape_cast %2 : vector<1x1x8x8x128xbf16> to vector<8x8x128xbf16>
    %4 = vector.shape_cast %3 : vector<8x8x128xbf16> to vector<64x128xbf16>
    %c0_6 = arith.constant 0 : index
    %c0_7 = arith.constant 0 : index
    %5 = vector.load %arg7[%c0_6, %c0_7] : memref<64x128xf32, #tpu.memory_space<vmem>>, vector<64x128xf32>
    %c0_8 = arith.constant 0 : index
    %c0_9 = arith.constant 0 : index
    %6 = vector.load %arg4[%c0_8, %c0_9] : memref<1152x128xbf16, #tpu.memory_space<vmem>>, vector<128x128xbf16>
    %cst_10 = arith.constant dense<0.000000e+00> : vector<64x128xf32>
    %7 = tpu.matmul %4, %6, %cst_10 {dimension_numbers = #tpu.dot_dimension_numbers<[1], [0], [0], [1], [0, 0, 1, 1], [], []>} : vector<64x128xbf16>, vector<128x128xbf16>, vector<64x128xf32> -> vector<64x128xf32>
    %8 = arith.addf %5, %7 : vector<64x128xf32>
    %c0_11 = arith.constant 0 : index
    %c0_12 = arith.constant 0 : index
    %9 = vector.load %arg7[%c0_11, %c0_12] : memref<64x128xf32, #tpu.memory_space<vmem>>, vector<64x128xf32>
    tpu.vector_store %arg7[%c0_11, %c0_12], %8 {strides = array<i32>} : memref<64x128xf32, #tpu.memory_space<vmem>>, vector<64x128xf32>,
    %c0_13 = arith.constant 0 : index
    %c0_14 = arith.constant 0 : index
    %c0_15 = arith.constant 0 : index
    %c1 = arith.constant 1 : index
    %c0_16 = arith.constant 0 : index
    %10 = vector.load %arg3[%c0_13, %c0_14, %c0_15, %c1, %c0_16] : memref<1x1x10x10x128xbf16, #tpu.memory_space<vmem>>, vector<1x1x8x8x128xbf16>
    %11 = vector.shape_cast %10 : vector<1x1x8x8x128xbf16> to vector<8x8x128xbf16>
    %12 = vector.shape_cast %11 : vector<8x8x128xbf16> to vector<64x128xbf16>
    %c0_17 = arith.constant 0 : index
    %c0_18 = arith.constant 0 : index
    %13 = vector.load %arg7[%c0_17, %c0_18] : memref<64x128xf32, #tpu.memory_space<vmem>>, vector<64x128xf32>
    %c128 = arith.constant 128 : index
    %c0_19 = arith.constant 0 : index
    %14 = vector.load %arg4[%c128, %c0_19] : memref<1152x128xbf16, #tpu.memory_space<vmem>>, vector<128x128xbf16>
    %cst_20 = arith.constant dense<0.000000e+00> : vector<64x128xf32>
    %15 = tpu.matmul %12, %14, %cst_20 {dimension_numbers = #tpu.dot_dimension_numbers<[1], [0], [0], [1], [0, 0, 1, 1], [], []>} : vector<64x128xbf16>, vector<128x128xbf16>, vector<64x128xf32> -> vector<64x128xf32>
    %16 = arith.addf %13, %15 : vector<64x128xf32>
    %c0_21 = arith.constant 0 : index
    %c0_22 = arith.constant 0 : index
    %17 = vector.load %arg7[%c0_21, %c0_22] : memref<64x128xf32, #tpu.memory_space<vmem>>, vector<64x128xf32>
    tpu.vector_store %arg7[%c0_21, %c0_22], %16 {strides = array<i32>} : memref<64x128xf32, #tpu.memory_space<vmem>>, vector<64x128xf32>,
    %c0_23 = arith.constant 0 : index
    %c0_24 = arith.constant 0 : index
    %c0_25 = arith.constant 0 : index
    %c2 = arith.constant 2 : index
    %c0_26 = arith.constant 0 : index
    %18 = vector.load %arg3[%c0_23, %c0_24, %c0_25, %c2, %c0_26] : memref<1x1x10x10x128xbf16, #tpu.memory_space<vmem>>, vector<1x1x8x8x128xbf16>
    %19 = vector.shape_cast %18 : vector<1x1x8x8x128xbf16> to vector<8x8x128xbf16>
    %20 = vector.shape_cast %19 : vector<8x8x128xbf16> to vector<64x128xbf16>
    %c0_27 = arith.constant 0 : index
    %c0_28 = arith.constant 0 : index
    %21 = vector.load %arg7[%c0_27, %c0_28] : memref<64x128xf32, #tpu.memory_space<vmem>>, vector<64x128xf32>
    %c256 = arith.constant 256 : index
    %c0_29 = arith.constant 0 : index
    %22 = vector.load %arg4[%c256, %c0_29] : memref<1152x128xbf16, #tpu.memory_space<vmem>>, vector<128x128xbf16>
    %cst_30 = arith.constant dense<0.000000e+00> : vector<64x128xf32>
    %23 = tpu.matmul %20, %22, %cst_30 {dimension_numbers = #tpu.dot_dimension_numbers<[1], [0], [0], [1], [0, 0, 1, 1], [], []>} : vector<64x128xbf16>, vector<128x128xbf16>, vector<64x128xf32> -> vector<64x128xf32>
    %24 = arith.addf %21, %23 : vector<64x128xf32>
    %c0_31 = arith.constant 0 : index
    %c0_32 = arith.constant 0 : index
    %25 = vector.load %arg7[%c0_31, %c0_32] : memref<64x128xf32, #tpu.memory_space<vmem>>, vector<64x128xf32>
    tpu.vector_store %arg7[%c0_31, %c0_32], %24 {strides = array<i32>} : memref<64x128xf32, #tpu.memory_space<vmem>>, vector<64x128xf32>,
    %c0_33 = arith.constant 0 : index
    %c0_34 = arith.constant 0 : index
    %c1_35 = arith.constant 1 : index
    %c0_36 = arith.constant 0 : index
    %c0_37 = arith.constant 0 : index
    %26 = vector.load %arg3[%c0_33, %c0_34, %c1_35, %c0_36, %c0_37] : memref<1x1x10x10x128xbf16, #tpu.memory_space<vmem>>, vector<1x1x8x8x128xbf16>
    %27 = vector.shape_cast %26 : vector<1x1x8x8x128xbf16> to vector<8x8x128xbf16>
    %28 = vector.shape_cast %27 : vector<8x8x128xbf16> to vector<64x128xbf16>
    %c0_38 = arith.constant 0 : index
    %c0_39 = arith.constant 0 : index
    %29 = vector.load %arg7[%c0_38, %c0_39] : memref<64x128xf32, #tpu.memory_space<vmem>>, vector<64x128xf32>
    %c384 = arith.constant 384 : index
    %c0_40 = arith.constant 0 : index
    %30 = vector.load %arg4[%c384, %c0_40] : memref<1152x128xbf16, #tpu.memory_space<vmem>>, vector<128x128xbf16>
    %cst_41 = arith.constant dense<0.000000e+00> : vector<64x128xf32>
    %31 = tpu.matmul %28, %30, %cst_41 {dimension_numbers = #tpu.dot_dimension_numbers<[1], [0], [0], [1], [0, 0, 1, 1], [], []>} : vector<64x128xbf16>, vector<128x128xbf16>, vector<64x128xf32> -> vector<64x128xf32>
    %32 = arith.addf %29, %31 : vector<64x128xf32>
    %c0_42 = arith.constant 0 : index
    %c0_43 = arith.constant 0 : index
    %33 = vector.load %arg7[%c0_42, %c0_43] : memref<64x128xf32, #tpu.memory_space<vmem>>, vector<64x128xf32>
    tpu.vector_store %arg7[%c0_42, %c0_43], %32 {strides = array<i32>} : memref<64x128xf32, #tpu.memory_space<vmem>>, vector<64x128xf32>,
    %c0_44 = arith.constant 0 : index
    %c0_45 = arith.constant 0 : index
    %c1_46 = arith.constant 1 : index
    %c1_47 = arith.constant 1 : index
    %c0_48 = arith.constant 0 : index
    %34 = vector.load %arg3[%c0_44, %c0_45, %c1_46, %c1_47, %c0_48] : memref<1x1x10x10x128xbf16, #tpu.memory_space<vmem>>, vector<1x1x8x8x128xbf16>
    %35 = vector.shape_cast %34 : vector<1x1x8x8x128xbf16> to vector<8x8x128xbf16>
    %36 = vector.shape_cast %35 : vector<8x8x128xbf16> to vector<64x128xbf16>
    %c0_49 = arith.constant 0 : index
    %c0_50 = arith.constant 0 : index
    %37 = vector.load %arg7[%c0_49, %c0_50] : memref<64x128xf32, #tpu.memory_space<vmem>>, vector<64x128xf32>
    %c512 = arith.constant 512 : index
    %c0_51 = arith.constant 0 : index
    %38 = vector.load %arg4[%c512, %c0_51] : memref<1152x128xbf16, #tpu.memory_space<vmem>>, vector<128x128xbf16>
    %cst_52 = arith.constant dense<0.000000e+00> : vector<64x128xf32>
    %39 = tpu.matmul %36, %38, %cst_52 {dimension_numbers = #tpu.dot_dimension_numbers<[1], [0], [0], [1], [0, 0, 1, 1], [], []>} : vector<64x128xbf16>, vector<128x128xbf16>, vector<64x128xf32> -> vector<64x128xf32>
    %40 = arith.addf %37, %39 : vector<64x128xf32>
    %c0_53 = arith.constant 0 : index
    %c0_54 = arith.constant 0 : index
    %41 = vector.load %arg7[%c0_53, %c0_54] : memref<64x128xf32, #tpu.memory_space<vmem>>, vector<64x128xf32>
    tpu.vector_store %arg7[%c0_53, %c0_54], %40 {strides = array<i32>} : memref<64x128xf32, #tpu.memory_space<vmem>>, vector<64x128xf32>,
    %c0_55 = arith.constant 0 : index
    %c0_56 = arith.constant 0 : index
    %c1_57 = arith.constant 1 : index
    %c2_58 = arith.constant 2 : index
    %c0_59 = arith.constant 0 : index
    %42 = vector.load %arg3[%c0_55, %c0_56, %c1_57, %c2_58, %c0_59] : memref<1x1x10x10x128xbf16, #tpu.memory_space<vmem>>, vector<1x1x8x8x128xbf16>
    %43 = vector.shape_cast %42 : vector<1x1x8x8x128xbf16> to vector<8x8x128xbf16>
    %44 = vector.shape_cast %43 : vector<8x8x128xbf16> to vector<64x128xbf16>
    %c0_60 = arith.constant 0 : index
    %c0_61 = arith.constant 0 : index
    %45 = vector.load %arg7[%c0_60, %c0_61] : memref<64x128xf32, #tpu.memory_space<vmem>>, vector<64x128xf32>
    %c640 = arith.constant 640 : index
    %c0_62 = arith.constant 0 : index
    %46 = vector.load %arg4[%c640, %c0_62] : memref<1152x128xbf16, #tpu.memory_space<vmem>>, vector<128x128xbf16>
    %cst_63 = arith.constant dense<0.000000e+00> : vector<64x128xf32>
    %47 = tpu.matmul %44, %46, %cst_63 {dimension_numbers = #tpu.dot_dimension_numbers<[1], [0], [0], [1], [0, 0, 1, 1], [], []>} : vector<64x128xbf16>, vector<128x128xbf16>, vector<64x128xf32> -> vector<64x128xf32>
    %48 = arith.addf %45, %47 : vector<64x128xf32>
    %c0_64 = arith.constant 0 : index
    %c0_65 = arith.constant 0 : index
    %49 = vector.load %arg7[%c0_64, %c0_65] : memref<64x128xf32, #tpu.memory_space<vmem>>, vector<64x128xf32>
    tpu.vector_store %arg7[%c0_64, %c0_65], %48 {strides = array<i32>} : memref<64x128xf32, #tpu.memory_space<vmem>>, vector<64x128xf32>,
    %c0_66 = arith.constant 0 : index
    %c0_67 = arith.constant 0 : index
    %c2_68 = arith.constant 2 : index
    %c0_69 = arith.constant 0 : index
    %c0_70 = arith.constant 0 : index
    %50 = vector.load %arg3[%c0_66, %c0_67, %c2_68, %c0_69, %c0_70] : memref<1x1x10x10x128xbf16, #tpu.memory_space<vmem>>, vector<1x1x8x8x128xbf16>
    %51 = vector.shape_cast %50 : vector<1x1x8x8x128xbf16> to vector<8x8x128xbf16>
    %52 = vector.shape_cast %51 : vector<8x8x128xbf16> to vector<64x128xbf16>
    %c0_71 = arith.constant 0 : index
    %c0_72 = arith.constant 0 : index
    %53 = vector.load %arg7[%c0_71, %c0_72] : memref<64x128xf32, #tpu.memory_space<vmem>>, vector<64x128xf32>
    %c768 = arith.constant 768 : index
    %c0_73 = arith.constant 0 : index
    %54 = vector.load %arg4[%c768, %c0_73] : memref<1152x128xbf16, #tpu.memory_space<vmem>>, vector<128x128xbf16>
    %cst_74 = arith.constant dense<0.000000e+00> : vector<64x128xf32>
    %55 = tpu.matmul %52, %54, %cst_74 {dimension_numbers = #tpu.dot_dimension_numbers<[1], [0], [0], [1], [0, 0, 1, 1], [], []>} : vector<64x128xbf16>, vector<128x128xbf16>, vector<64x128xf32> -> vector<64x128xf32>
    %56 = arith.addf %53, %55 : vector<64x128xf32>
    %c0_75 = arith.constant 0 : index
    %c0_76 = arith.constant 0 : index
    %57 = vector.load %arg7[%c0_75, %c0_76] : memref<64x128xf32, #tpu.memory_space<vmem>>, vector<64x128xf32>
    tpu.vector_store %arg7[%c0_75, %c0_76], %56 {strides = array<i32>} : memref<64x128xf32, #tpu.memory_space<vmem>>, vector<64x128xf32>,
    %c0_77 = arith.constant 0 : index
    %c0_78 = arith.constant 0 : index
    %c2_79 = arith.constant 2 : index
    %c1_80 = arith.constant 1 : index
    %c0_81 = arith.constant 0 : index
    %58 = vector.load %arg3[%c0_77, %c0_78, %c2_79, %c1_80, %c0_81] : memref<1x1x10x10x128xbf16, #tpu.memory_space<vmem>>, vector<1x1x8x8x128xbf16>
    %59 = vector.shape_cast %58 : vector<1x1x8x8x128xbf16> to vector<8x8x128xbf16>
    %60 = vector.shape_cast %59 : vector<8x8x128xbf16> to vector<64x128xbf16>
    %c0_82 = arith.constant 0 : index
    %c0_83 = arith.constant 0 : index
    %61 = vector.load %arg7[%c0_82, %c0_83] : memref<64x128xf32, #tpu.memory_space<vmem>>, vector<64x128xf32>
    %c896 = arith.constant 896 : index
    %c0_84 = arith.constant 0 : index
    %62 = vector.load %arg4[%c896, %c0_84] : memref<1152x128xbf16, #tpu.memory_space<vmem>>, vector<128x128xbf16>
    %cst_85 = arith.constant dense<0.000000e+00> : vector<64x128xf32>
    %63 = tpu.matmul %60, %62, %cst_85 {dimension_numbers = #tpu.dot_dimension_numbers<[1], [0], [0], [1], [0, 0, 1, 1], [], []>} : vector<64x128xbf16>, vector<128x128xbf16>, vector<64x128xf32> -> vector<64x128xf32>
    %64 = arith.addf %61, %63 : vector<64x128xf32>
    %c0_86 = arith.constant 0 : index
    %c0_87 = arith.constant 0 : index
    %65 = vector.load %arg7[%c0_86, %c0_87] : memref<64x128xf32, #tpu.memory_space<vmem>>, vector<64x128xf32>
    tpu.vector_store %arg7[%c0_86, %c0_87], %64 {strides = array<i32>} : memref<64x128xf32, #tpu.memory_space<vmem>>, vector<64x128xf32>,
    %c0_88 = arith.constant 0 : index
    %c0_89 = arith.constant 0 : index
    %c2_90 = arith.constant 2 : index
    %c2_91 = arith.constant 2 : index
    %c0_92 = arith.constant 0 : index
    %66 = vector.load %arg3[%c0_88, %c0_89, %c2_90, %c2_91, %c0_92] : memref<1x1x10x10x128xbf16, #tpu.memory_space<vmem>>, vector<1x1x8x8x128xbf16>
    %67 = vector.shape_cast %66 : vector<1x1x8x8x128xbf16> to vector<8x8x128xbf16>
    %68 = vector.shape_cast %67 : vector<8x8x128xbf16> to vector<64x128xbf16>
    %c0_93 = arith.constant 0 : index
    %c0_94 = arith.constant 0 : index
    %69 = vector.load %arg7[%c0_93, %c0_94] : memref<64x128xf32, #tpu.memory_space<vmem>>, vector<64x128xf32>
    %c1024 = arith.constant 1024 : index
    %c0_95 = arith.constant 0 : index
    %70 = vector.load %arg4[%c1024, %c0_95] : memref<1152x128xbf16, #tpu.memory_space<vmem>>, vector<128x128xbf16>
    %cst_96 = arith.constant dense<0.000000e+00> : vector<64x128xf32>
    %71 = tpu.matmul %68, %70, %cst_96 {dimension_numbers = #tpu.dot_dimension_numbers<[1], [0], [0], [1], [0, 0, 1, 1], [], []>} : vector<64x128xbf16>, vector<128x128xbf16>, vector<64x128xf32> -> vector<64x128xf32>
    %72 = arith.addf %69, %71 : vector<64x128xf32>
    %c0_97 = arith.constant 0 : index
    %c0_98 = arith.constant 0 : index
    %73 = vector.load %arg7[%c0_97, %c0_98] : memref<64x128xf32, #tpu.memory_space<vmem>>, vector<64x128xf32>
    tpu.vector_store %arg7[%c0_97, %c0_98], %72 {strides = array<i32>} : memref<64x128xf32, #tpu.memory_space<vmem>>, vector<64x128xf32>,
    %c0_99 = arith.constant 0 : index
    %c0_100 = arith.constant 0 : index
    %74 = vector.load %arg7[%c0_99, %c0_100] : memref<64x128xf32, #tpu.memory_space<vmem>>, vector<64x128xf32>
    %c0_101 = arith.constant 0 : index
    %c0_102 = arith.constant 0 : index
    %75 = vector.load %arg5[%c0_101, %c0_102] : memref<1x128xf32, #tpu.memory_space<vmem>>, vector<1x128xf32>
    %76 = vector.broadcast %75 : vector<1x128xf32> to vector<64x128xf32>
    %77 = arith.addf %74, %76 : vector<64x128xf32>
    %cst_103 = arith.constant 0.000000e+00 : f32
    %78 = vector.broadcast %cst_103 : f32 to vector<64x128xf32>
    %79 = arith.maximumf %77, %78 : vector<64x128xf32>
    %80 = vector.shape_cast %79 : vector<64x128xf32> to vector<8x8x128xf32>
    %81 = arith.truncf %80 : vector<8x8x128xf32> to vector<8x8x128xbf16>
    %c0_104 = arith.constant 0 : index
    %c0_105 = arith.constant 0 : index
    %c0_106 = arith.constant 0 : index
    %c0_107 = arith.constant 0 : index
    %82 = vector.load %arg6[%c0_104, %c0_105, %c0_106, %c0_107] : memref<1x8x8x128xbf16, #tpu.memory_space<vmem>>, vector<1x8x8x128xbf16>
    %83 = vector.shape_cast %82 : vector<1x8x8x128xbf16> to vector<8x8x128xbf16>
    %84 = vector.shape_cast %81 : vector<8x8x128xbf16> to vector<1x8x8x128xbf16>
    tpu.vector_store %arg6[%c0_104, %c0_105, %c0_106, %c0_107], %84 {strides = array<i32>} : memref<1x8x8x128xbf16, #tpu.memory_space<vmem>>, vector<1x8x8x128xbf16>,
    return
  }
  func.func @transform_0(%arg0: i32, %arg1: i32, %arg2: i32) -> (i32, i32, i32, i32, i32) {
    %c0_i32 = arith.constant 0 : i32
    %c0_i32_0 = arith.constant 0 : i32
    %c0_i32_1 = arith.constant 0 : i32
    %c0_i32_2 = arith.constant 0 : i32
    return %arg0, %arg1, %c0_i32, %c0_i32_0, %c0_i32_1 : i32, i32, i32, i32, i32
  }
  func.func @transform_1(%arg0: i32, %arg1: i32, %arg2: i32) -> (i32, i32) {
    %c0_i32 = arith.constant 0 : i32
    %c0_i32_0 = arith.constant 0 : i32
    return %c0_i32, %arg2 : i32, i32
  }
  func.func @transform_2(%arg0: i32, %arg1: i32, %arg2: i32) -> (i32, i32) {
    %c0_i32 = arith.constant 0 : i32
    %c0_i32_0 = arith.constant 0 : i32
    return %c0_i32, %arg2 : i32, i32
  }
  func.func @transform_3(%arg0: i32, %arg1: i32, %arg2: i32) -> (i32, i32, i32, i32) {
    %c0_i32 = arith.constant 0 : i32
    %c0_i32_0 = arith.constant 0 : i32
    return %arg0, %arg1, %c0_i32, %arg2 : i32, i32, i32, i32
  }
}

</mosaic_0001>

<bundles_post_ra>
// kernel: _forward.7
= control target key start
LH: loop header
LB: loop body
LE: loop exit
PB: predicated region body
PF: predicated region fallthrough
CT: control target
= control target key end

     0   :  { %vm469_vm0 = vcmask 1041408   ;;  %vm372_vm1 = vcmask 31744   ;;  %s2251_s1 = inlined_call_operand.vmem [shape: bf16[4,128], index: 1, kind: input, shape index: {}]   ;;  %s2252_s0 = inlined_call_operand.vmem [shape: bf16[512,4], index: 0, kind: input, shape index: {}]   ;;  %s2253_s2 = inlined_call_operand.vmem [shape: f32[1,128], index: 2, kind: input, shape index: {}]   ;;  %s2254_s3 = inlined_call_operand.vmem [shape: bf16[512,128], index: 3, kind: output, shape index: {}]  }
   0x1   :  { %v211_v0 = vld [vmem:[%s2251_s1] sm:$0x3]  ;;  %v1905_v4 = vld [vmem:[%s2252_s0 + $0x8] sm:$0xff]   ;;  %v1907_v6 = vld [vmem:[%s2252_s0 + $0x10] sm:$0xff]  }
   0x2   :  { %1901 = vmatprep.subr.msk.bf16.mxu0 %vm469_vm0, %v211_v0  ;;  %1902 = vmatprep.subr.msk.bf16.mxu1 %vm469_vm0, %v211_v0  ;;  %v471_v1 = vsel %vm469_vm0, %v211_v0, 0  ;;  %v1903_v2 = vld [vmem:[%s2252_s0] sm:$0xff]   ;;  %v1906_v5 = vld [vmem:[%s2252_s0 + $0x88] sm:$0xff]   ;;  %v1908_v7 = vld [vmem:[%s2252_s0 + $0x90] sm:$0xff]  }
   0x3   :  { %1834 = vmatpush3.bf16.msra.mxu0 %v471_v1  ;;  %1900 = vmatpush3.bf16.msra.mxu1 %v471_v1  ;;  %v1904_v3 = vld [vmem:[%s2252_s0 + $0x80] sm:$0xff]   ;;  %v1909_v8 = vld [vmem:[%s2252_s0 + $0x18] sm:$0xff]   ;;  %v1913_v12 = vld [vmem:[%s2252_s0 + $0x28] sm:$0xff]  }
   0x4   :  { %1835 = vmatprep.mubr.msk.bf16.mxu0 %vm372_vm1, %v1903_v2  ;;  %1867 = vmatprep.mubr.msk.bf16.mxu1 %vm372_vm1, %v1904_v3  ;;  %v1910_v9 = vld [vmem:[%s2252_s0 + $0x98] sm:$0xff]   ;;  %v1911_v10 = vld [vmem:[%s2252_s0 + $0x20] sm:$0xff]   ;;  %v1914_v13 = vld [vmem:[%s2252_s0 + $0xa8] sm:$0xff]  }
   0x5   :  { %v1912_v11 = vld [vmem:[%s2252_s0 + $0xa0] sm:$0xff]   ;;  %v1915_v14 = vld [vmem:[%s2252_s0 + $0x30] sm:$0xff]   ;;  %v1917_v16 = vld [vmem:[%s2252_s0 + $0x38] sm:$0xff]  }
   0x6   :  { %1836 = vmatmul.mubr.msk.bf16.vlgmr.msra.gmra.mrb[0].mxu0 %vm372_vm1, %v1905_v4  ;;  %1868 = vmatmul.mubr.msk.bf16.vlgmr.msra.gmra.mrb[0].mxu1 %vm372_vm1, %v1906_v5  ;;  %v1916_v15 = vld [vmem:[%s2252_s0 + $0xb0] sm:$0xff]   ;;  %v1918_v17 = vld [vmem:[%s2252_s0 + $0xb8] sm:$0xff]   ;;  %v1919_v18 = vld [vmem:[%s2252_s0 + $0x40] sm:$0xff]  }
   0x7   :  { %1839 = vmatprep.mubr.msk.bf16.mxu0 %vm372_vm1, %v1907_v6  ;;  %1871 = vmatprep.mubr.msk.bf16.mxu1 %vm372_vm1, %v1908_v7  ;;  %v1920_v19 = vld [vmem:[%s2252_s0 + $0xc0] sm:$0xff]   ;;  %v1921_v20 = vld [vmem:[%s2252_s0 + $0x48] sm:$0xff]   ;;  %v1923_v22 = vld [vmem:[%s2252_s0 + $0x50] sm:$0xff]  }
   0x8   :  { %v1922_v21 = vld [vmem:[%s2252_s0 + $0xc8] sm:$0xff]   ;;  %v1924_v23 = vld [vmem:[%s2252_s0 + $0xd0] sm:$0xff]   ;;  %v1925_v24 = vld [vmem:[%s2252_s0 + $0x58] sm:$0xff]  }
   0x9   :  { %v1926_v25 = vld [vmem:[%s2252_s0 + $0xd8] sm:$0xff]   ;;  %v1927_v26 = vld [vmem:[%s2252_s0 + $0x60] sm:$0xff]   ;;  %v1929_v28 = vld [vmem:[%s2252_s0 + $0x68] sm:$0xff]  }
   0xa   :  { %v1928_v27 = vld [vmem:[%s2252_s0 + $0xe0] sm:$0xff]   ;;  %v1930_v29 = vld [vmem:[%s2252_s0 + $0xe8] sm:$0xff]   ;;  %v1931_v30 = vld [vmem:[%s2252_s0 + $0x70] sm:$0xff]  }
   0xb   :  { %v1932_v31 = vld [vmem:[%s2252_s0 + $0xf0] sm:$0xff]   ;;  %v1933_v32 = vld [vmem:[%s2252_s0 + $0x78] sm:$0xff]   ;;  %v2089_v34 = vld [vmem:[%s2253_s2] ss:$0 sm:$0xff] }
   0xc   :  { %v1934_v33 = vld [vmem:[%s2252_s0 + $0xf8] sm:$0xff]  }
   0xe   :  { %1840 = vmatmul.mubr.msk.bf16.gmra.mrb[4].mxu0 %vm372_vm1, %v1909_v8  ;;  %1872 = vmatmul.mubr.msk.bf16.gmra.mrb[4].mxu1 %vm372_vm1, %v1910_v9 }
   0xf   :  { %1843 = vmatprep.mubr.msk.bf16.mxu0 %vm372_vm1, %v1911_v10  ;;  %1875 = vmatprep.mubr.msk.bf16.mxu1 %vm372_vm1, %v1912_v11 }
  0x16   :  { %1844 = vmatmul.mubr.msk.bf16.gmra.mrb[8].mxu0 %vm372_vm1, %v1913_v12  ;;  %1876 = vmatmul.mubr.msk.bf16.gmra.mrb[8].mxu1 %vm372_vm1, %v1914_v13 }
  0x17   :  { %1847 = vmatprep.mubr.msk.bf16.mxu0 %vm372_vm1, %v1915_v14  ;;  %1879 = vmatprep.mubr.msk.bf16.mxu1 %vm372_vm1, %v1916_v15 }
  0x1e   :  { %1848 = vmatmul.mubr.msk.bf16.gmra.mrb[12].mxu0 %vm372_vm1, %v1917_v16  ;;  %1880 = vmatmul.mubr.msk.bf16.gmra.mrb[12].mxu1 %vm372_vm1, %v1918_v17 }
  0x1f   :  { %1851 = vmatprep.mubr.msk.bf16.mxu0 %vm372_vm1, %v1919_v18  ;;  %1883 = vmatprep.mubr.msk.bf16.mxu1 %vm372_vm1, %v1920_v19 }
  0x26   :  { %1852 = vmatmul.mubr.msk.bf16.gmra.mrb[16].mxu0 %vm372_vm1, %v1921_v20  ;;  %1884 = vmatmul.mubr.msk.bf16.gmra.mrb[16].mxu1 %vm372_vm1, %v1922_v21 }
  0x27   :  { %1855 = vmatprep.mubr.msk.bf16.mxu0 %vm372_vm1, %v1923_v22  ;;  %1887 = vmatprep.mubr.msk.bf16.mxu1 %vm372_vm1, %v1924_v23 }
  0x2e   :  { %1856 = vmatmul.mubr.msk.bf16.gmra.mrb[20].mxu0 %vm372_vm1, %v1925_v24  ;;  %1888 = vmatmul.mubr.msk.bf16.gmra.mrb[20].mxu1 %vm372_vm1, %v1926_v25 }
  0x2f   :  { %1859 = vmatprep.mubr.msk.bf16.mxu0 %vm372_vm1, %v1927_v26  ;;  %1891 = vmatprep.mubr.msk.bf16.mxu1 %vm372_vm1, %v1928_v27 }
  0x36   :  { %1860 = vmatmul.mubr.msk.bf16.gmra.mrb[24].mxu0 %vm372_vm1, %v1929_v28  ;;  %1892 = vmatmul.mubr.msk.bf16.gmra.mrb[24].mxu1 %vm372_vm1, %v1930_v29 }
  0x37   :  { %1863 = vmatprep.mubr.msk.bf16.mxu0 %vm372_vm1, %v1931_v30  ;;  %1895 = vmatprep.mubr.msk.bf16.mxu1 %vm372_vm1, %v1932_v31 }
  0x3e   :  { %1864 = vmatmul.mubr.msk.bf16.gmra.mrb[28].mxu0 %vm372_vm1, %v1933_v32  ;;  %1896 = vmatmul.mubr.msk.bf16.gmra.mrb[28].mxu1 %vm372_vm1, %v1934_v33 }
  0xd9   :  { %v1837_v35 = vpop.f32.mrb[0].mxu0  ;;  %v1869_v37 = vpop.f32.mrb[0].mxu1 }
  0xda   :  { %v966_v36 = vadd.f32 %v1837_v35, %v2089_v34  ;;  %v507_v38 = vpop.f32.mrb[1].mxu0  ;;  %v998_v39 = vadd.f32 %v1869_v37, %v2089_v34  ;;  %v635_v41 = vpop.f32.mrb[1].mxu1 }
  0xdb   :  { %v964_v40 = vadd.f32 %v2089_v34, %v507_v38  ;;  %v1838_v42 = vpop.f32.mrb[2].mxu0  ;;  %v996_v43 = vadd.f32 %v2089_v34, %v635_v41  ;;  %v1870_v45 = vpop.f32.mrb[2].mxu1 }
  0xdc   :  { %v967_v44 = vadd.f32 %v1838_v42, %v2089_v34  ;;  %v510_v46 = vpop.f32.mrb[3].mxu0  ;;  %v999_v47 = vadd.f32 %v1870_v45, %v2089_v34  ;;  %v638_v49 = vpop.f32.mrb[3].mxu1  ;;  %v1030_v50 = vmax.f32 %v966_v36, 0.0  ;;  %v1062_v53 = vmax.f32 %v998_v39, 0.0 }
  0xdd   :  { %v965_v48 = vadd.f32 %v2089_v34, %v510_v46  ;;  %v997_v52 = vadd.f32 %v2089_v34, %v638_v49  ;;  %v1028_v54 = vmax.f32 %v964_v40, 0.0  ;;  %v1060_v57 = vmax.f32 %v996_v43, 0.0 }
  0xde   :  { %v1031_v51 = vmax.f32 %v967_v44, 0.0  ;;  %v1063_v55 = vmax.f32 %v999_v47, 0.0 }
  0xdf   :  { %v1029_v56 = vmax.f32 %v965_v48, 0.0  ;;  %v1061_v59 = vmax.f32 %v997_v52, 0.0 }
  0xe0   :  { %v1617_v58 = vpack.c.bf16 %v1031_v51, %v1030_v50  ;;  %v1697_v60 = vpack.c.bf16 %v1063_v55, %v1062_v53 }
  0xe1   :  { %v1612_v61 = vpack.c.bf16 %v1029_v56, %v1028_v54  ;;  %v1841_v62 = vpop.f32.mrb[4].mxu0  ;;  %v1692_v63 = vpack.c.bf16 %v1061_v59, %v1060_v57  ;;  %v1873_v1 = vpop.f32.mrb[4].mxu1 }
  0xe2   :  { %1769 = vst [vmem:[%s2254_s3 + $0x8] sm:$0xff] %v1617_v58   ;;  %v970_v0 = vadd.f32 %v1841_v62, %v2089_v34  ;;  %v523_v2 = vpop.f32.mrb[5].mxu0  ;;  %1785 = vst [vmem:[%s2254_s3 + $0x88] sm:$0xff] %v1697_v60   ;;  %v1002_v3 = vadd.f32 %v1873_v1, %v2089_v34  ;;  %v651_v5 = vpop.f32.mrb[5].mxu1 }
  0xe3   :  { %1613 = vst [vmem:[%s2254_s3] sm:$0xff] %v1612_v61   ;;  %v968_v4 = vadd.f32 %v2089_v34, %v523_v2  ;;  %v1842_v6 = vpop.f32.mrb[6].mxu0  ;;  %1784 = vst [vmem:[%s2254_s3 + $0x80] sm:$0xff] %v1692_v63   ;;  %v1000_v7 = vadd.f32 %v2089_v34, %v651_v5  ;;  %v1874_v9 = vpop.f32.mrb[6].mxu1 }
  0xe4   :  { %v971_v8 = vadd.f32 %v1842_v6, %v2089_v34  ;;  %v526_v10 = vpop.f32.mrb[7].mxu0  ;;  %v1003_v11 = vadd.f32 %v1874_v9, %v2089_v34  ;;  %v654_v13 = vpop.f32.mrb[7].mxu1  ;;  %v1034_v14 = vmax.f32 %v970_v0, 0.0  ;;  %v1066_v17 = vmax.f32 %v1002_v3, 0.0 }
  0xe5   :  { %v969_v12 = vadd.f32 %v2089_v34, %v526_v10  ;;  %v1001_v16 = vadd.f32 %v2089_v34, %v654_v13  ;;  %v1032_v18 = vmax.f32 %v968_v4, 0.0  ;;  %v1064_v21 = vmax.f32 %v1000_v7, 0.0 }
  0xe6   :  { %v1035_v15 = vmax.f32 %v971_v8, 0.0  ;;  %v1067_v19 = vmax.f32 %v1003_v11, 0.0 }
  0xe7   :  { %v1033_v20 = vmax.f32 %v969_v12, 0.0  ;;  %v1065_v23 = vmax.f32 %v1001_v16, 0.0 }
  0xe8   :  { %v1627_v22 = vpack.c.bf16 %v1035_v15, %v1034_v14  ;;  %v1707_v24 = vpack.c.bf16 %v1067_v19, %v1066_v17 }
  0xe9   :  { %v1622_v25 = vpack.c.bf16 %v1033_v20, %v1032_v18  ;;  %v1845_v26 = vpop.f32.mrb[8].mxu0  ;;  %v1702_v27 = vpack.c.bf16 %v1065_v23, %v1064_v21  ;;  %v1877_v29 = vpop.f32.mrb[8].mxu1 }
  0xea   :  { %1771 = vst [vmem:[%s2254_s3 + $0x18] sm:$0xff] %v1627_v22   ;;  %v974_v28 = vadd.f32 %v1845_v26, %v2089_v34  ;;  %v539_v30 = vpop.f32.mrb[9].mxu0  ;;  %1787 = vst [vmem:[%s2254_s3 + $0x98] sm:$0xff] %v1707_v24   ;;  %v1006_v31 = vadd.f32 %v1877_v29, %v2089_v34  ;;  %v667_v33 = vpop.f32.mrb[9].mxu1 }
  0xeb   :  { %1770 = vst [vmem:[%s2254_s3 + $0x10] sm:$0xff] %v1622_v25   ;;  %v972_v32 = vadd.f32 %v2089_v34, %v539_v30  ;;  %v1846_v35 = vpop.f32.mrb[10].mxu0  ;;  %1786 = vst [vmem:[%s2254_s3 + $0x90] sm:$0xff] %v1702_v27   ;;  %v1004_v36 = vadd.f32 %v2089_v34, %v667_v33  ;;  %v1878_v38 = vpop.f32.mrb[10].mxu1 }
  0xec   :  { %v975_v37 = vadd.f32 %v1846_v35, %v2089_v34  ;;  %v542_v39 = vpop.f32.mrb[11].mxu0  ;;  %v1007_v40 = vadd.f32 %v1878_v38, %v2089_v34  ;;  %v670_v42 = vpop.f32.mrb[11].mxu1  ;;  %v1038_v43 = vmax.f32 %v974_v28, 0.0  ;;  %v1070_v46 = vmax.f32 %v1006_v31, 0.0 }
  0xed   :  { %v973_v41 = vadd.f32 %v2089_v34, %v542_v39  ;;  %v1005_v45 = vadd.f32 %v2089_v34, %v670_v42  ;;  %v1036_v47 = vmax.f32 %v972_v32, 0.0  ;;  %v1068_v50 = vmax.f32 %v1004_v36, 0.0 }
  0xee   :  { %v1039_v44 = vmax.f32 %v975_v37, 0.0  ;;  %v1071_v48 = vmax.f32 %v1007_v40, 0.0 }
  0xef   :  { %v1037_v49 = vmax.f32 %v973_v41, 0.0  ;;  %v1069_v52 = vmax.f32 %v1005_v45, 0.0 }
  0xf0   :  { %v1637_v51 = vpack.c.bf16 %v1039_v44, %v1038_v43  ;;  %v1717_v53 = vpack.c.bf16 %v1071_v48, %v1070_v46 }
  0xf1   :  { %v1632_v54 = vpack.c.bf16 %v1037_v49, %v1036_v47  ;;  %v1849_v55 = vpop.f32.mrb[12].mxu0  ;;  %v1712_v56 = vpack.c.bf16 %v1069_v52, %v1068_v50  ;;  %v1881_v58 = vpop.f32.mrb[12].mxu1 }
  0xf2   :  { %1773 = vst [vmem:[%s2254_s3 + $0x28] sm:$0xff] %v1637_v51   ;;  %v978_v57 = vadd.f32 %v1849_v55, %v2089_v34  ;;  %v555_v59 = vpop.f32.mrb[13].mxu0  ;;  %1789 = vst [vmem:[%s2254_s3 + $0xa8] sm:$0xff] %v1717_v53   ;;  %v1010_v60 = vadd.f32 %v1881_v58, %v2089_v34  ;;  %v683_v62 = vpop.f32.mrb[13].mxu1 }
  0xf3   :  { %1772 = vst [vmem:[%s2254_s3 + $0x20] sm:$0xff] %v1632_v54   ;;  %v976_v61 = vadd.f32 %v2089_v34, %v555_v59  ;;  %v1850_v63 = vpop.f32.mrb[14].mxu0  ;;  %1788 = vst [vmem:[%s2254_s3 + $0xa0] sm:$0xff] %v1712_v56   ;;  %v1008_v0 = vadd.f32 %v2089_v34, %v683_v62  ;;  %v1882_v2 = vpop.f32.mrb[14].mxu1 }
  0xf4   :  { %v979_v1 = vadd.f32 %v1850_v63, %v2089_v34  ;;  %v558_v3 = vpop.f32.mrb[15].mxu0  ;;  %v1011_v4 = vadd.f32 %v1882_v2, %v2089_v34  ;;  %v686_v6 = vpop.f32.mrb[15].mxu1  ;;  %v1042_v7 = vmax.f32 %v978_v57, 0.0  ;;  %v1074_v10 = vmax.f32 %v1010_v60, 0.0 }
  0xf5   :  { %v977_v5 = vadd.f32 %v2089_v34, %v558_v3  ;;  %v1009_v9 = vadd.f32 %v2089_v34, %v686_v6  ;;  %v1040_v11 = vmax.f32 %v976_v61, 0.0  ;;  %v1072_v14 = vmax.f32 %v1008_v0, 0.0 }
  0xf6   :  { %v1043_v8 = vmax.f32 %v979_v1, 0.0  ;;  %v1075_v12 = vmax.f32 %v1011_v4, 0.0 }
  0xf7   :  { %v1041_v13 = vmax.f32 %v977_v5, 0.0  ;;  %v1073_v16 = vmax.f32 %v1009_v9, 0.0 }
  0xf8   :  { %v1647_v15 = vpack.c.bf16 %v1043_v8, %v1042_v7  ;;  %v1727_v17 = vpack.c.bf16 %v1075_v12, %v1074_v10 }
  0xf9   :  { %v1642_v18 = vpack.c.bf16 %v1041_v13, %v1040_v11  ;;  %v1853_v19 = vpop.f32.mrb[16].mxu0  ;;  %v1722_v20 = vpack.c.bf16 %v1073_v16, %v1072_v14  ;;  %v1885_v22 = vpop.f32.mrb[16].mxu1 }
  0xfa   :  { %1775 = vst [vmem:[%s2254_s3 + $0x38] sm:$0xff] %v1647_v15   ;;  %v982_v21 = vadd.f32 %v1853_v19, %v2089_v34  ;;  %v571_v23 = vpop.f32.mrb[17].mxu0  ;;  %1791 = vst [vmem:[%s2254_s3 + $0xb8] sm:$0xff] %v1727_v17   ;;  %v1014_v24 = vadd.f32 %v1885_v22, %v2089_v34  ;;  %v699_v26 = vpop.f32.mrb[17].mxu1 }
  0xfb   :  { %1774 = vst [vmem:[%s2254_s3 + $0x30] sm:$0xff] %v1642_v18   ;;  %v980_v25 = vadd.f32 %v2089_v34, %v571_v23  ;;  %v1854_v27 = vpop.f32.mrb[18].mxu0  ;;  %1790 = vst [vmem:[%s2254_s3 + $0xb0] sm:$0xff] %v1722_v20   ;;  %v1012_v28 = vadd.f32 %v2089_v34, %v699_v26  ;;  %v1886_v30 = vpop.f32.mrb[18].mxu1 }
  0xfc   :  { %v983_v29 = vadd.f32 %v1854_v27, %v2089_v34  ;;  %v574_v31 = vpop.f32.mrb[19].mxu0  ;;  %v1015_v32 = vadd.f32 %v1886_v30, %v2089_v34  ;;  %v702_v35 = vpop.f32.mrb[19].mxu1  ;;  %v1046_v36 = vmax.f32 %v982_v21, 0.0  ;;  %v1078_v39 = vmax.f32 %v1014_v24, 0.0 }
  0xfd   :  { %v981_v33 = vadd.f32 %v2089_v34, %v574_v31  ;;  %v1013_v38 = vadd.f32 %v2089_v34, %v702_v35  ;;  %v1044_v40 = vmax.f32 %v980_v25, 0.0  ;;  %v1076_v43 = vmax.f32 %v1012_v28, 0.0 }
  0xfe   :  { %v1047_v37 = vmax.f32 %v983_v29, 0.0  ;;  %v1079_v41 = vmax.f32 %v1015_v32, 0.0 }
  0xff   :  { %v1045_v42 = vmax.f32 %v981_v33, 0.0  ;;  %v1077_v45 = vmax.f32 %v1013_v38, 0.0 }
 0x100   :  { %v1657_v44 = vpack.c.bf16 %v1047_v37, %v1046_v36  ;;  %v1737_v46 = vpack.c.bf16 %v1079_v41, %v1078_v39 }
 0x101   :  { %v1652_v47 = vpack.c.bf16 %v1045_v42, %v1044_v40  ;;  %v1857_v48 = vpop.f32.mrb[20].mxu0  ;;  %v1732_v49 = vpack.c.bf16 %v1077_v45, %v1076_v43  ;;  %v1889_v51 = vpop.f32.mrb[20].mxu1 }
 0x102   :  { %1777 = vst [vmem:[%s2254_s3 + $0x48] sm:$0xff] %v1657_v44   ;;  %v986_v50 = vadd.f32 %v1857_v48, %v2089_v34  ;;  %v587_v52 = vpop.f32.mrb[21].mxu0  ;;  %1793 = vst [vmem:[%s2254_s3 + $0xc8] sm:$0xff] %v1737_v46   ;;  %v1018_v53 = vadd.f32 %v1889_v51, %v2089_v34  ;;  %v715_v55 = vpop.f32.mrb[21].mxu1 }
 0x103   :  { %1776 = vst [vmem:[%s2254_s3 + $0x40] sm:$0xff] %v1652_v47   ;;  %v984_v54 = vadd.f32 %v2089_v34, %v587_v52  ;;  %v1858_v56 = vpop.f32.mrb[22].mxu0  ;;  %1792 = vst [vmem:[%s2254_s3 + $0xc0] sm:$0xff] %v1732_v49   ;;  %v1016_v57 = vadd.f32 %v2089_v34, %v715_v55  ;;  %v1890_v59 = vpop.f32.mrb[22].mxu1 }
 0x104   :  { %v987_v58 = vadd.f32 %v1858_v56, %v2089_v34  ;;  %v590_v60 = vpop.f32.mrb[23].mxu0  ;;  %v1019_v61 = vadd.f32 %v1890_v59, %v2089_v34  ;;  %v718_v63 = vpop.f32.mrb[23].mxu1  ;;  %v1050_v0 = vmax.f32 %v986_v50, 0.0  ;;  %v1082_v3 = vmax.f32 %v1018_v53, 0.0 }
 0x105   :  { %v985_v62 = vadd.f32 %v2089_v34, %v590_v60  ;;  %v1017_v2 = vadd.f32 %v2089_v34, %v718_v63  ;;  %v1048_v4 = vmax.f32 %v984_v54, 0.0  ;;  %v1080_v7 = vmax.f32 %v1016_v57, 0.0 }
 0x106   :  { %v1051_v1 = vmax.f32 %v987_v58, 0.0  ;;  %v1083_v5 = vmax.f32 %v1019_v61, 0.0 }
 0x107   :  { %v1049_v6 = vmax.f32 %v985_v62, 0.0  ;;  %v1081_v9 = vmax.f32 %v1017_v2, 0.0 }
 0x108   :  { %v1667_v8 = vpack.c.bf16 %v1051_v1, %v1050_v0  ;;  %v1747_v10 = vpack.c.bf16 %v1083_v5, %v1082_v3 }
 0x109   :  { %v1662_v11 = vpack.c.bf16 %v1049_v6, %v1048_v4  ;;  %v1861_v12 = vpop.f32.mrb[24].mxu0  ;;  %v1742_v13 = vpack.c.bf16 %v1081_v9, %v1080_v7  ;;  %v1893_v15 = vpop.f32.mrb[24].mxu1 }
 0x10a   :  { %1779 = vst [vmem:[%s2254_s3 + $0x58] sm:$0xff] %v1667_v8   ;;  %v990_v14 = vadd.f32 %v1861_v12, %v2089_v34  ;;  %v603_v16 = vpop.f32.mrb[25].mxu0  ;;  %1795 = vst [vmem:[%s2254_s3 + $0xd8] sm:$0xff] %v1747_v10   ;;  %v1022_v17 = vadd.f32 %v1893_v15, %v2089_v34  ;;  %v731_v19 = vpop.f32.mrb[25].mxu1 }
 0x10b   :  { %1778 = vst [vmem:[%s2254_s3 + $0x50] sm:$0xff] %v1662_v11   ;;  %v988_v18 = vadd.f32 %v2089_v34, %v603_v16  ;;  %v1862_v20 = vpop.f32.mrb[26].mxu0  ;;  %1794 = vst [vmem:[%s2254_s3 + $0xd0] sm:$0xff] %v1742_v13   ;;  %v1020_v21 = vadd.f32 %v2089_v34, %v731_v19  ;;  %v1894_v23 = vpop.f32.mrb[26].mxu1 }
 0x10c   :  { %v991_v22 = vadd.f32 %v1862_v20, %v2089_v34  ;;  %v606_v24 = vpop.f32.mrb[27].mxu0  ;;  %v1023_v25 = vadd.f32 %v1894_v23, %v2089_v34  ;;  %v734_v27 = vpop.f32.mrb[27].mxu1  ;;  %v1054_v28 = vmax.f32 %v990_v14, 0.0  ;;  %v1086_v31 = vmax.f32 %v1022_v17, 0.0 }
 0x10d   :  { %v989_v26 = vadd.f32 %v2089_v34, %v606_v24  ;;  %v1021_v30 = vadd.f32 %v2089_v34, %v734_v27  ;;  %v1052_v32 = vmax.f32 %v988_v18, 0.0  ;;  %v1084_v36 = vmax.f32 %v1020_v21, 0.0 }
 0x10e   :  { %v1055_v29 = vmax.f32 %v991_v22, 0.0  ;;  %v1087_v33 = vmax.f32 %v1023_v25, 0.0 }
 0x10f   :  { %v1053_v35 = vmax.f32 %v989_v26, 0.0  ;;  %v1085_v38 = vmax.f32 %v1021_v30, 0.0 }
 0x110   :  { %v1677_v37 = vpack.c.bf16 %v1055_v29, %v1054_v28  ;;  %v1757_v39 = vpack.c.bf16 %v1087_v33, %v1086_v31 }
 0x111   :  { %v1672_v40 = vpack.c.bf16 %v1053_v35, %v1052_v32  ;;  %v1865_v41 = vpop.f32.mrb[28].mxu0  ;;  %v1752_v42 = vpack.c.bf16 %v1085_v38, %v1084_v36  ;;  %v1897_v44 = vpop.f32.mrb[28].mxu1 }
 0x112   :  { %1781 = vst [vmem:[%s2254_s3 + $0x68] sm:$0xff] %v1677_v37   ;;  %v994_v43 = vadd.f32 %v1865_v41, %v2089_v34  ;;  %v619_v45 = vpop.f32.mrb[29].mxu0  ;;  %1797 = vst [vmem:[%s2254_s3 + $0xe8] sm:$0xff] %v1757_v39   ;;  %v1026_v46 = vadd.f32 %v1897_v44, %v2089_v34  ;;  %v747_v48 = vpop.f32.mrb[29].mxu1 }
 0x113   :  { %1780 = vst [vmem:[%s2254_s3 + $0x60] sm:$0xff] %v1672_v40   ;;  %v992_v47 = vadd.f32 %v2089_v34, %v619_v45  ;;  %v1866_v49 = vpop.f32.mrb[30].mxu0  ;;  %1796 = vst [vmem:[%s2254_s3 + $0xe0] sm:$0xff] %v1752_v42   ;;  %v1024_v50 = vadd.f32 %v2089_v34, %v747_v48  ;;  %v1898_v52 = vpop.f32.mrb[30].mxu1 }
 0x114   :  { %v995_v51 = vadd.f32 %v1866_v49, %v2089_v34  ;;  %v622_v53 = vpop.f32.mrb[31].mxu0  ;;  %v1027_v54 = vadd.f32 %v1898_v52, %v2089_v34  ;;  %v750_v56 = vpop.f32.mrb[31].mxu1  ;;  %v1058_v57 = vmax.f32 %v994_v43, 0.0  ;;  %v1090_v60 = vmax.f32 %v1026_v46, 0.0 }
 0x115   :  { %v993_v55 = vadd.f32 %v2089_v34, %v622_v53  ;;  %v1025_v59 = vadd.f32 %v2089_v34, %v750_v56  ;;  %v1056_v61 = vmax.f32 %v992_v47, 0.0  ;;  %v1088_v0 = vmax.f32 %v1024_v50, 0.0 }
 0x116   :  { %v1059_v58 = vmax.f32 %v995_v51, 0.0  ;;  %v1091_v62 = vmax.f32 %v1027_v54, 0.0 }
 0x117   :  { %v1057_v63 = vmax.f32 %v993_v55, 0.0  ;;  %v1089_v2 = vmax.f32 %v1025_v59, 0.0 }
 0x118   :  { %v1687_v1 = vpack.c.bf16 %v1059_v58, %v1058_v57  ;;  %v1767_v3 = vpack.c.bf16 %v1091_v62, %v1090_v60 }
 0x119   :  { %v1682_v4 = vpack.c.bf16 %v1057_v63, %v1056_v61  ;;  %v1762_v5 = vpack.c.bf16 %v1089_v2, %v1088_v0 }
 0x11a   :  { %1783 = vst [vmem:[%s2254_s3 + $0x78] sm:$0xff] %v1687_v1   ;;  %1799 = vst [vmem:[%s2254_s3 + $0xf8] sm:$0xff] %v1767_v3  }
 0x11b   :  { %1782 = vst [vmem:[%s2254_s3 + $0x70] sm:$0xff] %v1682_v4   ;;  %1798 = vst [vmem:[%s2254_s3 + $0xf0] sm:$0xff] %v1762_v5  }

// kernel: _forward.10
= control target key start
LH: loop header
LB: loop body
LE: loop exit
PB: predicated region body
PF: predicated region fallthrough
CT: control target
= control target key end

     0   :  { %s874_s1 = inlined_call_operand.vmem [shape: bf16[128,128], index: 1, kind: input, shape index: {}]   ;;  %s875_s0 = inlined_call_operand.vmem [shape: bf16[128,128], index: 0, kind: input, shape index: {}]   ;;  %s876_s3 = inlined_call_operand.vmem [shape: bf16[128,128], index: 3, kind: input, shape index: {}]   ;;  %s877_s2 = inlined_call_operand.vmem [shape: f32[1,128], index: 2, kind: input, shape index: {}]   ;;  %s878_s4 = inlined_call_operand.vmem [shape: bf16[128,128], index: 4, kind: output, shape index: {}]  }
   0x1   :  { %v700_v0 = vld [vmem:[%s874_s1] sm:$0xff]   ;;  %v701_v1 = vld [vmem:[%s874_s1 + $0x8] sm:$0xff]   ;;  %v702_v2 = vld [vmem:[%s874_s1 + $0x10] sm:$0xff]  }
   0x2   :  { %652 = vmatprep.subr.bf16.mxu0 %v700_v0  ;;  %684 = vmatprep.subr.bf16.mxu1 %v700_v0  ;;  %v703_v3 = vld [vmem:[%s874_s1 + $0x18] sm:$0xff]   ;;  %v708_v4 = vld [vmem:[%s875_s0] sm:$0xff]   ;;  %v705_v7 = vld [vmem:[%s874_s1 + $0x28] sm:$0xff]  }
   0x3   :  { %653 = vmatpush3.bf16.msra.mxu0 %v700_v0  ;;  %692 = vmatpush3.bf16.msra.mxu1 %v700_v0  ;;  %v709_v5 = vld [vmem:[%s875_s0 + $0x20] sm:$0xff]   ;;  %v706_v8 = vld [vmem:[%s874_s1 + $0x30] sm:$0xff]   ;;  %v707_v9 = vld [vmem:[%s874_s1 + $0x38] sm:$0xff]  }
   0x4   :  { %654 = vmatprep.subr.bf16.mxu0 %v701_v1  ;;  %685 = vmatprep.subr.bf16.mxu1 %v701_v1  ;;  %v704_v6 = vld [vmem:[%s874_s1 + $0x20] sm:$0xff]   ;;  %v710_v10 = vld [vmem:[%s875_s0 + $0x8] sm:$0xff]   ;;  %v712_v12 = vld [vmem:[%s875_s0 + $0x10] sm:$0xff]  }
   0x5   :  { %668 = vmatprep.mubr.bf16.mxu0 %v708_v4  ;;  %676 = vmatprep.mubr.bf16.mxu1 %v709_v5  ;;  %v711_v11 = vld [vmem:[%s875_s0 + $0x28] sm:$0xff]   ;;  %v713_v13 = vld [vmem:[%s875_s0 + $0x30] sm:$0xff]   ;;  %v714_v14 = vld [vmem:[%s875_s0 + $0x18] sm:$0xff]  }
   0x6   :  { %v715_v15 = vld [vmem:[%s875_s0 + $0x38] sm:$0xff]   ;;  %v622_v16 = vld [vmem:[%s876_s3 + $0x8] sm:$0xff]   ;;  %v551_v18 = vld [vmem:[%s876_s3] sm:$0xff]  }
   0x7   :  { %655 = vmatpush3.bf16.msra.mxu0 %v701_v1  ;;  %693 = vmatpush3.bf16.msra.mxu1 %v701_v1  ;;  %v626_v17 = vld [vmem:[%s876_s3 + $0x28] sm:$0xff]   ;;  %v625_v19 = vld [vmem:[%s876_s3 + $0x20] sm:$0xff]   ;;  %v809_v21 = vld [vmem:[%s876_s3 + $0x18] sm:$0xff]   ;;  %v556_v23 = vunpack.c.l.bf16 %v622_v16  ;;  %v552_v25 = vunpack.c.l.bf16 %v551_v18  ;;  %v557_v31 = vunpack.c.h.bf16 %v622_v16  ;;  %v553_v33 = vunpack.c.h.bf16 %v551_v18 }
   0x8   :  { %656 = vmatprep.subr.bf16.mxu0 %v702_v2  ;;  %686 = vmatprep.subr.bf16.mxu1 %v702_v2  ;;  %v804_v20 = vld [vmem:[%s877_s2] ss:$0 sm:$0xff]  ;;  %v814_v22 = vld [vmem:[%s876_s3 + $0x38] sm:$0xff]   ;;  %v572_v24 = vunpack.c.l.bf16 %v626_v17  ;;  %v568_v26 = vunpack.c.l.bf16 %v625_v19  ;;  %v819_v27 = vld [vmem:[%s876_s3 + $0x10] sm:$0xff]   ;;  %v573_v32 = vunpack.c.h.bf16 %v626_v17  ;;  %v569_v34 = vunpack.c.h.bf16 %v625_v19 }
   0x9   :  { %v824_v28 = vld [vmem:[%s876_s3 + $0x30] sm:$0xff]   ;;  %v564_v39 = vunpack.c.l.bf16 %v809_v21  ;;  %v580_v40 = vunpack.c.l.bf16 %v814_v22  ;;  %v560_v45 = vunpack.c.l.bf16 %v819_v27  ;;  %v565_v59 = vunpack.c.h.bf16 %v809_v21 }
   0xa   :  { %v576_v46 = vunpack.c.l.bf16 %v824_v28  ;;  %v581_v60 = vunpack.c.h.bf16 %v814_v22  ;;  %v561_v63 = vunpack.c.h.bf16 %v819_v27  ;;  %v577_v0 = vunpack.c.h.bf16 %v824_v28 }
   0xb   :  { %657 = vmatpush3.bf16.msra.mxu0 %v702_v2  ;;  %694 = vmatpush3.bf16.msra.mxu1 %v702_v2 }
   0xc   :  { %658 = vmatprep.subr.bf16.mxu0 %v703_v3  ;;  %687 = vmatprep.subr.bf16.mxu1 %v703_v3 }
   0xf   :  { %659 = vmatpush3.bf16.msra.mxu0 %v703_v3  ;;  %695 = vmatpush3.bf16.msra.mxu1 %v703_v3 }
  0x10   :  { %660 = vmatprep.subr.bf16.mxu0 %v704_v6  ;;  %688 = vmatprep.subr.bf16.mxu1 %v704_v6 }
  0x13   :  { %661 = vmatpush3.bf16.msra.mxu0 %v704_v6  ;;  %696 = vmatpush3.bf16.msra.mxu1 %v704_v6 }
  0x14   :  { %662 = vmatprep.subr.bf16.mxu0 %v705_v7  ;;  %689 = vmatprep.subr.bf16.mxu1 %v705_v7 }
  0x17   :  { %663 = vmatpush3.bf16.msra.mxu0 %v705_v7  ;;  %697 = vmatpush3.bf16.msra.mxu1 %v705_v7 }
  0x18   :  { %664 = vmatprep.subr.bf16.mxu0 %v706_v8  ;;  %690 = vmatprep.subr.bf16.mxu1 %v706_v8 }
  0x1b   :  { %665 = vmatpush3.bf16.msra.mxu0 %v706_v8  ;;  %698 = vmatpush3.bf16.msra.mxu1 %v706_v8 }
  0x1c   :  { %666 = vmatprep.subr.bf16.mxu0 %v707_v9  ;;  %691 = vmatprep.subr.bf16.mxu1 %v707_v9 }
  0x1f   :  { %667 = vmatpush3.bf16.msra.mxu0 %v707_v9  ;;  %699 = vmatpush3.bf16.msra.mxu1 %v707_v9 }
  0x22   :  { %669 = vmatmul.mubr.bf16.vlgmr.msra.gmra.mrb[0].mxu0 %v710_v10  ;;  %677 = vmatmul.mubr.bf16.vlgmr.msra.gmra.mrb[0].mxu1 %v711_v11 }
  0x23   :  { %672 = vmatprep.mubr.bf16.mxu0 %v712_v12  ;;  %680 = vmatprep.mubr.bf16.mxu1 %v713_v13 }
  0x2a   :  { %673 = vmatmul.mubr.bf16.gmra.mrb[4].mxu0 %v714_v14  ;;  %681 = vmatmul.mubr.bf16.gmra.mrb[4].mxu1 %v715_v15 }
  0xf5   :  { %v670_v29 = vpop.f32.mrb[0].mxu0  ;;  %v678_v30 = vpop.f32.mrb[0].mxu1 }
  0xf6   :  { %v339_v35 = vadd.f32 %v670_v29, %v804_v20  ;;  %v347_v36 = vadd.f32 %v678_v30, %v804_v20  ;;  %v216_v37 = vpop.f32.mrb[1].mxu0  ;;  %v248_v38 = vpop.f32.mrb[1].mxu1 }
  0xf7   :  { %v337_v41 = vadd.f32 %v804_v20, %v216_v37  ;;  %v345_v42 = vadd.f32 %v804_v20, %v248_v38  ;;  %v671_v43 = vpop.f32.mrb[2].mxu0  ;;  %v679_v44 = vpop.f32.mrb[2].mxu1 }
  0xf8   :  { %v387_v47 = vadd.f32 %v556_v23, %v339_v35  ;;  %v395_v48 = vadd.f32 %v572_v24, %v347_v36  ;;  %v340_v49 = vadd.f32 %v671_v43, %v804_v20  ;;  %v348_v50 = vadd.f32 %v679_v44, %v804_v20  ;;  %v219_v51 = vpop.f32.mrb[3].mxu0  ;;  %v251_v52 = vpop.f32.mrb[3].mxu1 }
  0xf9   :  { %v385_v53 = vadd.f32 %v552_v25, %v337_v41  ;;  %v393_v54 = vadd.f32 %v568_v26, %v345_v42  ;;  %v338_v55 = vadd.f32 %v804_v20, %v219_v51  ;;  %v346_v56 = vadd.f32 %v804_v20, %v251_v52 }
  0xfa   :  { %v388_v57 = vadd.f32 %v557_v31, %v340_v49  ;;  %v396_v58 = vadd.f32 %v573_v32, %v348_v50  ;;  %v403_v1 = vmax.f32 %v387_v47, 0.0  ;;  %v411_v2 = vmax.f32 %v395_v48, 0.0 }
  0xfb   :  { %v386_v61 = vadd.f32 %v553_v33, %v338_v55  ;;  %v394_v62 = vadd.f32 %v569_v34, %v346_v56  ;;  %v401_v5 = vmax.f32 %v385_v53, 0.0  ;;  %v409_v6 = vmax.f32 %v393_v54, 0.0 }
  0xfc   :  { %v404_v3 = vmax.f32 %v388_v57, 0.0  ;;  %v412_v4 = vmax.f32 %v396_v58, 0.0 }
  0xfd   :  { %v402_v7 = vmax.f32 %v386_v61, 0.0  ;;  %v410_v8 = vmax.f32 %v394_v62, 0.0  ;;  %v674_v9 = vpop.f32.mrb[4].mxu0  ;;  %v682_v10 = vpop.f32.mrb[4].mxu1 }
  0xfe   :  { %v590_v11 = vpack.c.bf16 %v404_v3, %v403_v1  ;;  %v610_v12 = vpack.c.bf16 %v412_v4, %v411_v2  ;;  %v343_v13 = vadd.f32 %v674_v9, %v804_v20  ;;  %v351_v14 = vadd.f32 %v682_v10, %v804_v20  ;;  %v232_v15 = vpop.f32.mrb[5].mxu0  ;;  %v264_v16 = vpop.f32.mrb[5].mxu1 }
  0xff   :  { %v585_v17 = vpack.c.bf16 %v402_v7, %v401_v5  ;;  %v605_v18 = vpack.c.bf16 %v410_v8, %v409_v6  ;;  %v341_v19 = vadd.f32 %v804_v20, %v232_v15  ;;  %v349_v21 = vadd.f32 %v804_v20, %v264_v16  ;;  %v675_v22 = vpop.f32.mrb[6].mxu0  ;;  %v683_v23 = vpop.f32.mrb[6].mxu1 }
 0x100   :  { %629 = vst [vmem:[%s878_s4 + $0x8] sm:$0xff] %v590_v11   ;;  %633 = vst [vmem:[%s878_s4 + $0x28] sm:$0xff] %v610_v12   ;;  %v391_v24 = vadd.f32 %v564_v39, %v343_v13  ;;  %v399_v25 = vadd.f32 %v580_v40, %v351_v14  ;;  %v344_v26 = vadd.f32 %v675_v22, %v804_v20  ;;  %v235_v28 = vpop.f32.mrb[7].mxu0  ;;  %v267_v29 = vpop.f32.mrb[7].mxu1 }
 0x101   :  { %v352_v27 = vadd.f32 %v683_v23, %v804_v20  ;;  %586 = vst [vmem:[%s878_s4] sm:$0xff] %v585_v17   ;;  %632 = vst [vmem:[%s878_s4 + $0x20] sm:$0xff] %v605_v18   ;;  %v389_v30 = vadd.f32 %v560_v45, %v341_v19  ;;  %v397_v31 = vadd.f32 %v576_v46, %v349_v21 }
 0x102   :  { %v342_v32 = vadd.f32 %v804_v20, %v235_v28  ;;  %v350_v33 = vadd.f32 %v804_v20, %v267_v29  ;;  %v392_v34 = vadd.f32 %v565_v59, %v344_v26  ;;  %v407_v38 = vmax.f32 %v391_v24, 0.0 }
 0x103   :  { %v400_v35 = vadd.f32 %v581_v60, %v352_v27  ;;  %v415_v39 = vmax.f32 %v399_v25, 0.0  ;;  %v405_v42 = vmax.f32 %v389_v30, 0.0  ;;  %v413_v43 = vmax.f32 %v397_v31, 0.0 }
 0x104   :  { %v390_v36 = vadd.f32 %v561_v63, %v342_v32  ;;  %v398_v37 = vadd.f32 %v577_v0, %v350_v33  ;;  %v408_v40 = vmax.f32 %v392_v34, 0.0 }
 0x105   :  { %v416_v41 = vmax.f32 %v400_v35, 0.0 }
 0x106   :  { %v406_v44 = vmax.f32 %v390_v36, 0.0  ;;  %v414_v47 = vmax.f32 %v398_v37, 0.0  ;;  %v600_v48 = vpack.c.bf16 %v408_v40, %v407_v38 }
 0x107   :  { %v620_v49 = vpack.c.bf16 %v416_v41, %v415_v39 }
 0x108   :  { %v595_v45 = vpack.c.bf16 %v406_v44, %v405_v42  ;;  %v615_v46 = vpack.c.bf16 %v414_v47, %v413_v43  ;;  %631 = vst [vmem:[%s878_s4 + $0x18] sm:$0xff] %v600_v48  }
 0x109   :  { %635 = vst [vmem:[%s878_s4 + $0x38] sm:$0xff] %v620_v49  }
 0x10a   :  { %630 = vst [vmem:[%s878_s4 + $0x10] sm:$0xff] %v595_v45   ;;  %634 = vst [vmem:[%s878_s4 + $0x30] sm:$0xff] %v615_v46  }

// kernel: _forward.9
= control target key start
LH: loop header
LB: loop body
LE: loop exit
PB: predicated region body
PF: predicated region fallthrough
CT: control target
= control target key end

     0   :  { %vm133_vm0 = vcmask 1041408   ;;  %vm108_vm1 = vcmask 31744   ;;  %s609_s1 = inlined_call_operand.vmem [shape: bf16[4,128], index: 1, kind: input, shape index: {}]   ;;  %s610_s0 = inlined_call_operand.vmem [shape: bf16[128,4], index: 0, kind: input, shape index: {}]   ;;  %s611_s2 = inlined_call_operand.vmem [shape: f32[1,128], index: 2, kind: input, shape index: {}]   ;;  %s612_s3 = inlined_call_operand.vmem [shape: bf16[128,128], index: 3, kind: output, shape index: {}]  }
   0x1   :  { %v67_v0 = vld [vmem:[%s609_s1] sm:$0x3]  ;;  %v521_v4 = vld [vmem:[%s610_s0 + $0x8] sm:$0xff]   ;;  %v523_v6 = vld [vmem:[%s610_s0 + $0x10] sm:$0xff]  }
   0x2   :  { %517 = vmatprep.subr.msk.bf16.mxu0 %vm133_vm0, %v67_v0  ;;  %518 = vmatprep.subr.msk.bf16.mxu1 %vm133_vm0, %v67_v0  ;;  %v135_v1 = vsel %vm133_vm0, %v67_v0, 0  ;;  %v519_v2 = vld [vmem:[%s610_s0] sm:$0xff]   ;;  %v522_v5 = vld [vmem:[%s610_s0 + $0x28] sm:$0xff]   ;;  %v524_v7 = vld [vmem:[%s610_s0 + $0x30] sm:$0xff]  }
   0x3   :  { %498 = vmatpush3.bf16.msra.mxu0 %v135_v1  ;;  %516 = vmatpush3.bf16.msra.mxu1 %v135_v1  ;;  %v520_v3 = vld [vmem:[%s610_s0 + $0x20] sm:$0xff]   ;;  %v525_v8 = vld [vmem:[%s610_s0 + $0x18] sm:$0xff]  }
   0x4   :  { %499 = vmatprep.mubr.msk.bf16.mxu0 %vm108_vm1, %v519_v2  ;;  %507 = vmatprep.mubr.msk.bf16.mxu1 %vm108_vm1, %v520_v3  ;;  %v526_v9 = vld [vmem:[%s610_s0 + $0x38] sm:$0xff]   ;;  %v408_v11 = vld [vmem:[%s611_s2] ss:$0 sm:$0xff] }
   0x6   :  { %500 = vmatmul.mubr.msk.bf16.vlgmr.msra.gmra.mrb[0].mxu0 %vm108_vm1, %v521_v4  ;;  %508 = vmatmul.mubr.msk.bf16.vlgmr.msra.gmra.mrb[0].mxu1 %vm108_vm1, %v522_v5 }
   0x7   :  { %503 = vmatprep.mubr.msk.bf16.mxu0 %vm108_vm1, %v523_v6  ;;  %511 = vmatprep.mubr.msk.bf16.mxu1 %vm108_vm1, %v524_v7 }
   0xe   :  { %504 = vmatmul.mubr.msk.bf16.gmra.mrb[4].mxu0 %vm108_vm1, %v525_v8  ;;  %512 = vmatmul.mubr.msk.bf16.gmra.mrb[4].mxu1 %vm108_vm1, %v526_v9 }
  0xd9   :  { %v501_v10 = vpop.f32.mrb[0].mxu0  ;;  %v509_v12 = vpop.f32.mrb[0].mxu1 }
  0xda   :  { %v171_v13 = vpop.f32.mrb[1].mxu0  ;;  %v203_v14 = vpop.f32.mrb[1].mxu1  ;;  %v294_v16 = vadd.f32 %v501_v10, %v408_v11  ;;  %v302_v20 = vadd.f32 %v509_v12, %v408_v11 }
  0xdb   :  { %v502_v15 = vpop.f32.mrb[2].mxu0  ;;  %v510_v18 = vpop.f32.mrb[2].mxu1  ;;  %v292_v21 = vadd.f32 %v408_v11, %v171_v13  ;;  %v300_v25 = vadd.f32 %v408_v11, %v203_v14 }
  0xdc   :  { %v295_v17 = vadd.f32 %v502_v15, %v408_v11  ;;  %v174_v19 = vpop.f32.mrb[3].mxu0  ;;  %v303_v22 = vadd.f32 %v510_v18, %v408_v11  ;;  %v206_v24 = vpop.f32.mrb[3].mxu1 }
  0xdd   :  { %v293_v23 = vadd.f32 %v408_v11, %v174_v19  ;;  %v301_v27 = vadd.f32 %v408_v11, %v206_v24 }
  0xde   :  { %v449_v26 = vpack.c.bf16 %v295_v17, %v294_v16  ;;  %v469_v28 = vpack.c.bf16 %v303_v22, %v302_v20 }
  0xdf   :  { %v444_v29 = vpack.c.bf16 %v293_v23, %v292_v21  ;;  %v464_v30 = vpack.c.bf16 %v301_v27, %v300_v25 }
  0xe0   :  { %481 = vst [vmem:[%s612_s3 + $0x8] sm:$0xff] %v449_v26   ;;  %485 = vst [vmem:[%s612_s3 + $0x28] sm:$0xff] %v469_v28  }
  0xe1   :  { %445 = vst [vmem:[%s612_s3] sm:$0xff] %v444_v29   ;;  %v505_v31 = vpop.f32.mrb[4].mxu0  ;;  %484 = vst [vmem:[%s612_s3 + $0x20] sm:$0xff] %v464_v30   ;;  %v513_v32 = vpop.f32.mrb[4].mxu1 }
  0xe2   :  { %v187_v33 = vpop.f32.mrb[5].mxu0  ;;  %v219_v34 = vpop.f32.mrb[5].mxu1  ;;  %v298_v36 = vadd.f32 %v505_v31, %v408_v11  ;;  %v306_v40 = vadd.f32 %v513_v32, %v408_v11 }
  0xe3   :  { %v506_v35 = vpop.f32.mrb[6].mxu0  ;;  %v514_v38 = vpop.f32.mrb[6].mxu1  ;;  %v296_v41 = vadd.f32 %v408_v11, %v187_v33  ;;  %v304_v45 = vadd.f32 %v408_v11, %v219_v34 }
  0xe4   :  { %v299_v37 = vadd.f32 %v506_v35, %v408_v11  ;;  %v190_v39 = vpop.f32.mrb[7].mxu0  ;;  %v307_v42 = vadd.f32 %v514_v38, %v408_v11  ;;  %v222_v44 = vpop.f32.mrb[7].mxu1 }
  0xe5   :  { %v297_v43 = vadd.f32 %v408_v11, %v190_v39  ;;  %v305_v47 = vadd.f32 %v408_v11, %v222_v44 }
  0xe6   :  { %v459_v46 = vpack.c.bf16 %v299_v37, %v298_v36  ;;  %v479_v48 = vpack.c.bf16 %v307_v42, %v306_v40 }
  0xe7   :  { %v454_v49 = vpack.c.bf16 %v297_v43, %v296_v41  ;;  %v474_v50 = vpack.c.bf16 %v305_v47, %v304_v45 }
  0xe8   :  { %483 = vst [vmem:[%s612_s3 + $0x18] sm:$0xff] %v459_v46   ;;  %487 = vst [vmem:[%s612_s3 + $0x38] sm:$0xff] %v479_v48  }
  0xe9   :  { %482 = vst [vmem:[%s612_s3 + $0x10] sm:$0xff] %v454_v49   ;;  %486 = vst [vmem:[%s612_s3 + $0x30] sm:$0xff] %v474_v50  }

// kernel: _forward.8
= control target key start
LH: loop header
LB: loop body
LE: loop exit
PB: predicated region body
PF: predicated region fallthrough
CT: control target
= control target key end

     0   :  { %s1659_s12 = smov 0   ;;  %s1661_s13 = smov 0   ;;  %s1873_s0 = inlined_call_operand.vmem [shape: bf16[128,1152], index: 0, kind: input, shape index: {}]   ;;  %s1874_s1 = inlined_call_operand.vmem [shape: bf16[1152,128], index: 1, kind: input, shape index: {}]   ;;  %s1875_s2 = inlined_call_operand.vmem [shape: f32[1,128], index: 2, kind: input, shape index: {}]   ;;  %s1876_s3 = inlined_call_operand.vmem [shape: bf16[128,128], index: 3, kind: output, shape index: {}]  }
   0x1   :  { %s1663_s14 = smov 0   ;;  %s1665_s15 = smov 0  }
   0x2   :  { %s1667_s16 = smov 0  }
   0x3 LB: > { %s25_s17 = sadd.s32 1, %s1632_s15  ;;  %p48_p1 = scmp.ne.s32.totalorder %s1624_s13, %s1620_s12  ;;  %s1636_s16 = sphi %s1667_s16, %s13_s16   ;;  %s1632_s15 = sphi %s1665_s15, %s1880_s15   ;;  %s1628_s14 = sphi %s1663_s14, %s1879_s14   ;;  %s1624_s13 = sphi %s1661_s13, %s1878_s13   ;;  %s1620_s12 = sphi %s1659_s12, %s1877_s12  }
   0x4   : > { %p26_p0 = scmp.ge.s32.totalorder %s25_s17, 3  ;;  %p49_p2 = scmp.eq.s32.totalorder %s1636_s16, 0 }
   0x5   : > { %s41_s19 = sadd.s32 1, %s1624_s13  ;;  %p1216_p5 = scmp.ge.s32.totalorder %s1636_s16, 3 }
   0x6   : > { %s1882_s17 = smov (%p26_p0, %s25_s17), 0  ;;  %p50_p3 = por %p49_p2, %p48_p1 }
   0x7   : > { %s37_s18 = ssub.s32 %s1632_s15, %s1882_s17  ;;  %162 = sbr.rel (%p1216_p5) target bundleno = 37 (0x25), region = 20 }
   0x8   : > { %p39_p4 = scmp.eq.s32.totalorder %s37_s18, 0 }
   0xa   : > { %s1694_s20 = scalar_select %p39_p4, %s1624_s13, %s41_s19  }
   0xe   : > { %165 = sbr.rel (!%p50_p3) target bundleno = 37 (0x25), region = 24  ;;  %s167_s21 = sand.u32 (%p50_p3), 1, %s1624_s13  }
   0xf   : > { %s1323_s22 = smul.u32 (%p50_p3), 12, %s1632_s15 }
  0x10   : > { %s1499_s23 = smul.u32 (%p50_p3), 192, %s167_s21 }
  0x11   : > { %s1702_s26 = scalar_lea.vmem (%p50_p3), %s1873_s0, %s1323_s22 }
  0x12   : > { %v190_v0 = vld [vmem:[%s1702_s26] sm:$0xff] (%p50_p3)  ;;  %v194_v2 = vld [vmem:[%s1702_s26 + $0x48] sm:$0xff] (%p50_p3)  ;;  %s1707_s27 = scalar_lea.vmem (%p50_p3), [#allocation3], %s1499_s23  ;;  %v198_v4 = vld [vmem:[%s1702_s26 + $0x90] sm:$0xff] (%p50_p3) }
  0x13   : > { %v192_v1 = vld [vmem:[%s1702_s26 + $0x24] sm:$0xff] (%p50_p3)  ;;  %191 = vst [vmem:[%s1707_s27] sm:$0xff] (%p50_p3), %v190_v0  ;;  %195 = vst [vmem:[%s1707_s27 + $0x18] sm:$0xff] (%p50_p3), %v194_v2  ;;  %v196_v3 = vld [vmem:[%s1702_s26 + $0x6c] sm:$0xff] (%p50_p3) }
  0x14   : > { %193 = vst [vmem:[%s1707_s27 + $0xc] sm:$0xff] (%p50_p3), %v192_v1  ;;  %v200_v5 = vld [vmem:[%s1702_s26 + $0xb4] sm:$0xff] (%p50_p3)  ;;  %197 = vst [vmem:[%s1707_s27 + $0x24] sm:$0xff] (%p50_p3), %v196_v3  ;;  %v204_v7 = vld [vmem:[%s1702_s26 + $0xfc] sm:$0xff] (%p50_p3) }
  0x15   : > { %199 = vst [vmem:[%s1707_s27 + $0x30] sm:$0xff] %v198_v4  ;;  %201 = vst [vmem:[%s1707_s27 + $0x3c] sm:$0xff] %v200_v5  ;;  %v202_v6 = vld [vmem:[%s1702_s26 + $0xd8] sm:$0xff]  ;;  %v206_v8 = vld [vmem:[%s1702_s26 + $0x120] sm:$0xff] }
  0x16   : > { %203 = vst [vmem:[%s1707_s27 + $0x48] sm:$0xff] %v202_v6  ;;  %205 = vst [vmem:[%s1707_s27 + $0x54] sm:$0xff] %v204_v7  ;;  %v208_v9 = vld [vmem:[%s1702_s26 + $0x144] sm:$0xff]  ;;  %v212_v11 = vld [vmem:[%s1702_s26 + $0x18c] sm:$0xff] }
  0x17   : > { %207 = vst [vmem:[%s1707_s27 + $0x60] sm:$0xff] %v206_v8  ;;  %v210_v10 = vld [vmem:[%s1702_s26 + $0x168] sm:$0xff]  ;;  %209 = vst [vmem:[%s1707_s27 + $0x6c] sm:$0xff] %v208_v9  ;;  %v214_v12 = vld [vmem:[%s1702_s26 + $0x1b0] sm:$0xff] }
  0x18   : > { %211 = vst [vmem:[%s1707_s27 + $0x78] sm:$0xff] %v210_v10  ;;  %213 = vst [vmem:[%s1707_s27 + $0x84] sm:$0xff] %v212_v11  ;;  %v216_v13 = vld [vmem:[%s1702_s26 + $0x1d4] sm:$0xff]  ;;  %v220_v15 = vld [vmem:[%s1702_s26 + $0x21c] sm:$0xff] }
  0x19   : > { %v218_v14 = vld [vmem:[%s1702_s26 + $0x1f8] sm:$0xff]  ;;  %215 = vst [vmem:[%s1707_s27 + $0x90] sm:$0xff] %v214_v12  ;;  %217 = vst [vmem:[%s1707_s27 + $0x9c] sm:$0xff] %v216_v13  ;;  %v1218_v16 = vld [vmem:[%s1702_s26 + $0x8] sm:$0xf] }
  0x1a   : > { %219 = vst [vmem:[%s1707_s27 + $0xa8] sm:$0xff] %v218_v14  ;;  %v1220_v17 = vld [vmem:[%s1702_s26 + $0x2c] sm:$0xf]  ;;  %221 = vst [vmem:[%s1707_s27 + $0xb4] sm:$0xff] %v220_v15  ;;  %v1222_v18 = vld [vmem:[%s1702_s26 + $0x50] sm:$0xf] }
  0x1b   : > { %1219 = vst [vmem:[%s1707_s27 + $0x8] sm:$0xf] %v1218_v16  ;;  %1221 = vst [vmem:[%s1707_s27 + $0x14] sm:$0xf] %v1220_v17  ;;  %v1224_v19 = vld [vmem:[%s1702_s26 + $0x74] sm:$0xf] }
  0x1c   : > { %v1226_v20 = vld [vmem:[%s1702_s26 + $0x98] sm:$0xf]  ;;  %1223 = vst [vmem:[%s1707_s27 + $0x20] sm:$0xf] %v1222_v18  ;;  %1225 = vst [vmem:[%s1707_s27 + $0x2c] sm:$0xf] %v1224_v19 }
  0x1d   : > { %1227 = vst [vmem:[%s1707_s27 + $0x38] sm:$0xf] %v1226_v20  ;;  %v1228_v21 = vld [vmem:[%s1702_s26 + $0xbc] sm:$0xf]  ;;  %v1230_v22 = vld [vmem:[%s1702_s26 + $0xe0] sm:$0xf] }
  0x1e   : > { %v1232_v23 = vld [vmem:[%s1702_s26 + $0x104] sm:$0xf]  ;;  %1229 = vst [vmem:[%s1707_s27 + $0x44] sm:$0xf] %v1228_v21  ;;  %1231 = vst [vmem:[%s1707_s27 + $0x50] sm:$0xf] %v1230_v22 }
  0x1f   : > { %1233 = vst [vmem:[%s1707_s27 + $0x5c] sm:$0xf] %v1232_v23  ;;  %v1234_v24 = vld [vmem:[%s1702_s26 + $0x128] sm:$0xf]  ;;  %v1236_v25 = vld [vmem:[%s1702_s26 + $0x14c] sm:$0xf] }
  0x20   : > { %v1238_v26 = vld [vmem:[%s1702_s26 + $0x170] sm:$0xf]  ;;  %1235 = vst [vmem:[%s1707_s27 + $0x68] sm:$0xf] %v1234_v24  ;;  %1237 = vst [vmem:[%s1707_s27 + $0x74] sm:$0xf] %v1236_v25 }
  0x21   : > { %1239 = vst [vmem:[%s1707_s27 + $0x80] sm:$0xf] %v1238_v26  ;;  %v1240_v27 = vld [vmem:[%s1702_s26 + $0x194] sm:$0xf]  ;;  %v1242_v28 = vld [vmem:[%s1702_s26 + $0x1b8] sm:$0xf] }
  0x22   : > { %v1244_v29 = vld [vmem:[%s1702_s26 + $0x1dc] sm:$0xf]  ;;  %1241 = vst [vmem:[%s1707_s27 + $0x8c] sm:$0xf] %v1240_v27  ;;  %1243 = vst [vmem:[%s1707_s27 + $0x98] sm:$0xf] %v1242_v28 }
  0x23   : > { %1245 = vst [vmem:[%s1707_s27 + $0xa4] sm:$0xf] %v1244_v29  ;;  %v1246_v30 = vld [vmem:[%s1702_s26 + $0x200] sm:$0xf]  ;;  %v1248_v31 = vld [vmem:[%s1702_s26 + $0x224] sm:$0xf] }
  0x24   : > { %1247 = vst [vmem:[%s1707_s27 + $0xb0] sm:$0xf] %v1246_v30  ;;  %1249 = vst [vmem:[%s1707_s27 + $0xbc] sm:$0xf] %v1248_v31 }
  0x25 PF: > { %p1250_p6 = scmp.ge.s32.totalorder %s1636_s16, 1  ;;  %p277_p7 = scmp.lt.s32.totalorder %s1636_s16, 4 }
  0x27   : > { %p278_p8 = pnand %p1250_p6, %p277_p7 }
  0x28   : > { %s284_s28 = sand.u32 (!%p278_p8), 1, %s1620_s12   ;;  %s323_s29 = smul.u32 (!%p278_p8), 48, %s1628_s14 }
  0x29   : > { %281 = sbr.rel (%p278_p8) target bundleno = 383 (0x17f), region = 54  ;;  %p1252_p10 = scmp.ne.s32.totalorder (!%p278_p8), %s1628_s14, 0 }
  0x2a   : > { %s1500_s30 = smul.u32 (!%p278_p8), 192, %s284_s28  ;;  %p324_p9 = scmp.lt.s32.totalorder (!%p278_p8), %s323_s29, 143 }
  0x2c   : > { %s1779_s8 = scalar_lea.vmem (!%p278_p8), [#allocation3], %s1500_s30 }
  0x30   : > { %s1884_s29 = smov (!%p324_p9, %s323_s29), 143  ;;  %348 = sbr.rel (%p1252_p10) target bundleno = 58 (0x3a), region = 62 }
  0x31   : > { %s1251_s4 = sshll.u32 %s1884_s29, 2  ;;  %v1638_v32 = vmov (!%p1252_p10), 0.0  }
  0x32   : > { %s1777_s7 = scalar_lea.vmem %s1874_s1, %s1251_s4  ;;  %349 = vst [vmem:[#allocation2] sm:$0xff] (!%p1252_p10), %v1638_v32  ;;  %350 = vst [vmem:[#allocation2 + $0x8] sm:$0xff] (!%p1252_p10), %v1638_v32 }
  0x33   : > { %351 = vst [vmem:[#allocation2 + $0x10] sm:$0xff] (!%p1252_p10), %v1638_v32  ;;  %352 = vst [vmem:[#allocation2 + $0x18] sm:$0xff] (!%p1252_p10), %v1638_v32 }
  0x34   : > { %353 = vst [vmem:[#allocation2 + $0x20] sm:$0xff] (!%p1252_p10), %v1638_v32  ;;  %354 = vst [vmem:[#allocation2 + $0x28] sm:$0xff] (!%p1252_p10), %v1638_v32 }
  0x35   : > { %355 = vst [vmem:[#allocation2 + $0x30] sm:$0xff] (!%p1252_p10), %v1638_v32  ;;  %356 = vst [vmem:[#allocation2 + $0x38] sm:$0xff] (!%p1252_p10), %v1638_v32 }
  0x36   : > { %357 = vst [vmem:[#allocation2 + $0x40] sm:$0xff] (!%p1252_p10), %v1638_v32  ;;  %358 = vst [vmem:[#allocation2 + $0x48] sm:$0xff] (!%p1252_p10), %v1638_v32 }
  0x37   : > { %359 = vst [vmem:[#allocation2 + $0x50] sm:$0xff] %v1638_v32  ;;  %360 = vst [vmem:[#allocation2 + $0x58] sm:$0xff] %v1638_v32 }
  0x38   : > { %361 = vst [vmem:[#allocation2 + $0x60] sm:$0xff] %v1638_v32  ;;  %362 = vst [vmem:[#allocation2 + $0x68] sm:$0xff] %v1638_v32 }
  0x39   : > { %363 = vst [vmem:[#allocation2 + $0x70] sm:$0xff] %v1638_v32  ;;  %364 = vst [vmem:[#allocation2 + $0x78] sm:$0xff] %v1638_v32 }
  0x3a PF: > { %v1542_v33 = vld [vmem:[%s1777_s7 + $0x40] sm:$0xff]   ;;  %v1545_v36 = vld [vmem:[%s1777_s7 + $0x48] sm:$0xff]   ;;  %v1548_v39 = vld [vmem:[%s1777_s7 + $0x50] sm:$0xff]   ;;  %p1301_p11 = scmp.ne.s32.totalorder %s1628_s14, 2 }
  0x3b   : > { %v1543_v34 = vld [vmem:[%s1777_s7] sm:$0xff]   ;;  %1387 = vmatprep.subr.bf16.mxu0 %v1542_v33  ;;  %v1546_v37 = vld [vmem:[%s1777_s7 + $0x8] sm:$0xff]   ;;  %v1549_v40 = vld [vmem:[%s1777_s7 + $0x10] sm:$0xff]  }
  0x3c   : > { %v1544_v35 = vld [vmem:[%s1777_s7 + $0x80] sm:$0xff]   ;;  %1388 = vmatpush3.bf16.msra.mxu0 %v1543_v34  ;;  %v1547_v38 = vld [vmem:[%s1777_s7 + $0x88] sm:$0xff]   ;;  %v1550_v41 = vld [vmem:[%s1777_s7 + $0x90] sm:$0xff]  }
  0x3d   : > { %1467 = vmatprep.subr.bf16.mxu1 %v1544_v35  ;;  %1389 = vmatprep.subr.bf16.mxu0 %v1545_v36  ;;  %v1551_v42 = vld [vmem:[%s1777_s7 + $0x58] sm:$0xff]   ;;  %v1554_v45 = vld [vmem:[%s1777_s7 + $0x60] sm:$0xff]   ;;  %v1557_v48 = vld [vmem:[%s1777_s7 + $0x68] sm:$0xff]  }
  0x3e   : > { %1468 = vmatpush3.bf16.msra.mxu1 %v1544_v35  ;;  %v1552_v43 = vld [vmem:[%s1777_s7 + $0x18] sm:$0xff]   ;;  %v1556_v46 = vld [vmem:[%s1777_s7 + $0xa0] sm:$0xff]   ;;  %v1559_v49 = vld [vmem:[%s1777_s7 + $0xa8] sm:$0xff]  }
  0x3f   : > { %1469 = vmatprep.subr.bf16.mxu1 %v1547_v38  ;;  %v1553_v44 = vld [vmem:[%s1777_s7 + $0x98] sm:$0xff]   ;;  %v1555_v47 = vld [vmem:[%s1777_s7 + $0x20] sm:$0xff]   ;;  %v1558_v50 = vld [vmem:[%s1777_s7 + $0x28] sm:$0xff]  }
  0x40   : > { %1390 = vmatpush3.bf16.msra.mxu0 %v1546_v37  ;;  %v1560_v51 = vld [vmem:[%s1777_s7 + $0x70] sm:$0xff]   ;;  %v1563_v54 = vld [vmem:[%s1777_s7 + $0x78] sm:$0xff]   ;;  %v1566_v59 = vld [vmem:[%s1779_s8] ss:$12 sps:$4 sm:$0xff]  }
  0x41   : > { %1391 = vmatprep.subr.bf16.mxu0 %v1548_v39  ;;  %v1561_v52 = vld [vmem:[%s1777_s7 + $0x30] sm:$0xff]   ;;  %v1565_v55 = vld [vmem:[%s1777_s7 + $0xb8] sm:$0xff]   ;;  %v1570_v61 = vld [vmem:[%s1779_s8 + $0x20] ss:$12 sps:$4 sm:$0xff]  }
  0x42   : > { %1470 = vmatpush3.bf16.msra.mxu1 %v1547_v38  ;;  %v1562_v53 = vld [vmem:[%s1777_s7 + $0xb0] sm:$0xff]   ;;  %v1564_v58 = vld [vmem:[%s1777_s7 + $0x38] sm:$0xff]   ;;  %v1586_v5 = vld [vmem:[%s1779_s8 + $0x80] ss:$12 sps:$4 sm:$0xff]  }
  0x43   : > { %1471 = vmatprep.subr.bf16.mxu1 %v1550_v41  ;;  %v1568_v56 = vld [vmem:[%s1779_s8 + $0x4] ss:$12 sps:$4 sm:$0xff]   ;;  %v1569_v57 = vld [vmem:[%s1779_s8 + $0x8] ss:$12 sps:$4 sm:$0xff]   ;;  %v1579_v4 = vld [vmem:[%s1779_s8 + $0x4c] ss:$12 sps:$4 sm:$0xff]  }
  0x44   : > { %1392 = vmatpush3.bf16.msra.mxu0 %v1549_v40  ;;  %765 = vmatprep.mubr.bf16.mxu0 %v1568_v56  ;;  %v1571_v60 = vld [vmem:[%s1779_s8 + $0x1c] ss:$12 sps:$4 sm:$0xff]   ;;  %v1577_v62 = vld [vmem:[%s1779_s8 + $0x38] ss:$12 sps:$4 sm:$0xff]   ;;  %v1574_v0 = vld [vmem:[%s1779_s8 + $0x34] ss:$12 sps:$4 sm:$0xff]  }
  0x45   : > { %1393 = vmatprep.subr.bf16.mxu0 %v1551_v42  ;;  %1483 = vmatprep.mubr.bf16.mxu1 %v1569_v57  ;;  %v1573_v63 = vld [vmem:[%s1779_s8 + $0x18] ss:$12 sps:$4 sm:$0xff]   ;;  %v1578_v1 = vld [vmem:[%s1779_s8 + $0x50] ss:$12 sps:$4 sm:$0xff]   ;;  %v1585_v2 = vld [vmem:[%s1779_s8 + $0x68] ss:$12 sps:$4 sm:$0xff]  }
  0x46   : > { %1472 = vmatpush3.bf16.msra.mxu1 %v1550_v41  ;;  %v1576_v3 = vld [vmem:[%s1779_s8 + $0x30] ss:$12 sps:$4 sm:$0xff]   ;;  %v1593_v6 = vld [vmem:[%s1779_s8 + $0x98] ss:$12 sps:$4 sm:$0xff]   ;;  %v1581_v7 = vld [vmem:[%s1779_s8 + $0x48] ss:$12 sps:$4 sm:$0xff]  }
  0x47   : > { %1473 = vmatprep.subr.bf16.mxu1 %v1553_v44  ;;  %v1582_v8 = vld [vmem:[%s1779_s8 + $0x64] ss:$12 sps:$4 sm:$0xff]   ;;  %v1584_v10 = vld [vmem:[%s1779_s8 + $0x60] ss:$12 sps:$4 sm:$0xff]   ;;  %v1587_v11 = vld [vmem:[%s1779_s8 + $0x7c] ss:$12 sps:$4 sm:$0xff]  }
  0x48   : > { %1394 = vmatpush3.bf16.msra.mxu0 %v1552_v43  ;;  %v1594_v9 = vld [vmem:[%s1779_s8 + $0xb0] ss:$12 sps:$4 sm:$0xff]   ;;  %v1589_v12 = vld [vmem:[%s1779_s8 + $0x78] ss:$12 sps:$4 sm:$0xff]   ;;  %v1590_v13 = vld [vmem:[%s1779_s8 + $0x94] ss:$12 sps:$4 sm:$0xff]  }
  0x49   : > { %1395 = vmatprep.subr.bf16.mxu0 %v1554_v45  ;;  %v1592_v14 = vld [vmem:[%s1779_s8 + $0x90] ss:$12 sps:$4 sm:$0xff]   ;;  %v1595_v15 = vld [vmem:[%s1779_s8 + $0xac] ss:$12 sps:$4 sm:$0xff]   ;;  %v1597_v16 = vld [vmem:[%s1779_s8 + $0xa8] ss:$12 sps:$4 sm:$0xff]  }
  0x4a   : > { %1474 = vmatpush3.bf16.msra.mxu1 %v1553_v44  ;;  %v365_v23 = vld [vmem:[#allocation2] sm:$0xff]  ;;  %v366_v28 = vld [vmem:[#allocation2 + $0x8] sm:$0xff]  ;;  %v367_v38 = vld [vmem:[#allocation2 + $0x10] sm:$0xff] }
  0x4b   : > { %1475 = vmatprep.subr.bf16.mxu1 %v1556_v46  ;;  %v368_v44 = vld [vmem:[#allocation2 + $0x18] sm:$0xff] }
  0x4c   : > { %1396 = vmatpush3.bf16.msra.mxu0 %v1555_v47 }
  0x4d   : > { %1397 = vmatprep.subr.bf16.mxu0 %v1557_v48 }
  0x4e   : > { %1476 = vmatpush3.bf16.msra.mxu1 %v1556_v46 }
  0x4f   : > { %1477 = vmatprep.subr.bf16.mxu1 %v1559_v49 }
  0x50   : > { %1398 = vmatpush3.bf16.msra.mxu0 %v1558_v50 }
  0x51   : > { %1399 = vmatprep.subr.bf16.mxu0 %v1560_v51 }
  0x52   : > { %1478 = vmatpush3.bf16.msra.mxu1 %v1559_v49 }
  0x53   : > { %1479 = vmatprep.subr.bf16.mxu1 %v1562_v53 }
  0x54   : > { %1400 = vmatpush3.bf16.msra.mxu0 %v1561_v52 }
  0x55   : > { %1401 = vmatprep.subr.bf16.mxu0 %v1563_v54 }
  0x56   : > { %1480 = vmatpush3.bf16.msra.mxu1 %v1562_v53 }
  0x57   : > { %1481 = vmatprep.subr.bf16.mxu1 %v1565_v55 }
  0x58   : > { %1402 = vmatpush3.bf16.msra.mxu0 %v1564_v58 }
  0x5a   : > { %1482 = vmatpush3.bf16.msra.mxu1 %v1565_v55  ;;  %v369_v55 = vld [vmem:[#allocation2 + $0x20] sm:$0xff] }
  0x5b   : > { %766 = vmatmul.mubr.bf16.vlgmr.msra.gmra.mrb[0].mxu0 %v1566_v59 }
  0x5c   : > { %773 = vmatprep.mubr.bf16.mxu0 %v1571_v60  ;;  %v370_v60 = vld [vmem:[#allocation2 + $0x28] sm:$0xff] }
  0x5d   : > { %1484 = vmatmul.mubr.bf16.vlgmr.msra.gmra.mrb[0].mxu1 %v1570_v61 }
  0x5e   : > { %1487 = vmatprep.mubr.bf16.mxu1 %v1577_v62 }
  0x63   : > { %774 = vmatmul.mubr.bf16.gmra.mrb[4].mxu0 %v1573_v63 }
  0x64   : > { %781 = vmatprep.mubr.bf16.mxu0 %v1574_v0 }
  0x65   : > { %1488 = vmatmul.mubr.bf16.gmra.mrb[4].mxu1 %v1578_v1 }
  0x66   : > { %1491 = vmatprep.mubr.bf16.mxu1 %v1585_v2 }
  0x6b   : > { %782 = vmatmul.mubr.bf16.gmra.mrb[8].mxu0 %v1576_v3 }
  0x6c   : > { %789 = vmatprep.mubr.bf16.mxu0 %v1579_v4 }
  0x6d   : > { %1492 = vmatmul.mubr.bf16.gmra.mrb[8].mxu1 %v1586_v5 }
  0x6e   : > { %1495 = vmatprep.mubr.bf16.mxu1 %v1593_v6  ;;  %v371_v6 = vld [vmem:[#allocation2 + $0x30] sm:$0xff] }
  0x73   : > { %790 = vmatmul.mubr.bf16.gmra.mrb[12].mxu0 %v1581_v7 }
  0x74   : > { %797 = vmatprep.mubr.bf16.mxu0 %v1582_v8 }
  0x75   : > { %1496 = vmatmul.mubr.bf16.gmra.mrb[12].mxu1 %v1594_v9 }
  0x7b   : > { %798 = vmatmul.mubr.bf16.gmra.mrb[16].mxu0 %v1584_v10 }
  0x7c   : > { %805 = vmatprep.mubr.bf16.mxu0 %v1587_v11 }
  0x83   : > { %806 = vmatmul.mubr.bf16.gmra.mrb[20].mxu0 %v1589_v12  ;;  %v372_v12 = vld [vmem:[#allocation2 + $0x38] sm:$0xff] }
  0x84   : > { %813 = vmatprep.mubr.bf16.mxu0 %v1590_v13 }
  0x8b   : > { %814 = vmatmul.mubr.bf16.gmra.mrb[24].mxu0 %v1592_v14 }
  0x8c   : > { %821 = vmatprep.mubr.bf16.mxu0 %v1595_v15 }
  0x93   : > { %822 = vmatmul.mubr.bf16.gmra.mrb[28].mxu0 %v1597_v16 }
 0x12e   : > { %v1403_v17 = vpop.f32.mrb[0].mxu0 }
 0x12f   : > { %v1404_v18 = vpop.f32.mrb[1].mxu0 }
 0x130   : > { %v1405_v19 = vadd.f32 %v1404_v18, %v1403_v17  ;;  %v1406_v20 = vpop.f32.mrb[2].mxu0  ;;  %v1485_v21 = vpop.f32.mrb[0].mxu1 }
 0x131   : > { %v1407_v22 = vpop.f32.mrb[3].mxu0  ;;  %v864_v24 = vpop.f32.mrb[1].mxu1 }
 0x132   : > { %v1408_v25 = vadd.f32 %v1407_v22, %v1406_v20  ;;  %v865_v26 = vadd.f32 %v1405_v19, %v864_v24  ;;  %v1486_v27 = vpop.f32.mrb[2].mxu1  ;;  %v373_v22 = vld [vmem:[#allocation2 + $0x40] sm:$0xff] }
 0x133   : > { %v867_v29 = vpop.f32.mrb[3].mxu1 }
 0x134   : > { %v927_v30 = vadd.f32 %v865_v26, %v365_v23  ;;  %v868_v31 = vadd.f32 %v1408_v25, %v867_v29  ;;  %v374_v25 = vld [vmem:[#allocation2 + $0x48] sm:$0xff] }
 0x136   : > { %943 = vst [vmem:[#allocation2] sm:$0xff] %v927_v30  ;;  %v928_v32 = vadd.f32 %v868_v31, %v366_v28  ;;  %v1409_v33 = vpop.f32.mrb[4].mxu0 }
 0x137   : > { %v1410_v34 = vpop.f32.mrb[5].mxu0 }
 0x138   : > { %944 = vst [vmem:[#allocation2 + $0x8] sm:$0xff] %v928_v32  ;;  %v1411_v35 = vadd.f32 %v1410_v34, %v1409_v33  ;;  %v1412_v36 = vpop.f32.mrb[6].mxu0  ;;  %v1489_v37 = vpop.f32.mrb[4].mxu1  ;;  %v375_v33 = vld [vmem:[#allocation2 + $0x50] sm:$0xff] }
 0x139   : > { %v1413_v39 = vpop.f32.mrb[7].mxu0  ;;  %v880_v40 = vpop.f32.mrb[5].mxu1 }
 0x13a   : > { %v873_v41 = vadd.f32 %v1485_v21, %v1411_v35  ;;  %v1414_v42 = vadd.f32 %v1413_v39, %v1412_v36  ;;  %v1490_v43 = vpop.f32.mrb[6].mxu1 }
 0x13b   : > { %v883_v45 = vpop.f32.mrb[7].mxu1 }
 0x13c   : > { %v929_v46 = vadd.f32 %v873_v41, %v367_v38  ;;  %v876_v47 = vadd.f32 %v1486_v27, %v1414_v42 }
 0x13e   : > { %945 = vst [vmem:[#allocation2 + $0x10] sm:$0xff] %v929_v46  ;;  %v930_v48 = vadd.f32 %v876_v47, %v368_v44  ;;  %v1415_v49 = vpop.f32.mrb[8].mxu0  ;;  %v377_v46 = vld [vmem:[#allocation2 + $0x60] sm:$0xff] }
 0x13f   : > { %v1416_v50 = vpop.f32.mrb[9].mxu0 }
 0x140   : > { %946 = vst [vmem:[#allocation2 + $0x18] sm:$0xff] %v930_v48  ;;  %v1417_v51 = vadd.f32 %v1416_v50, %v1415_v49  ;;  %v1418_v52 = vpop.f32.mrb[10].mxu0  ;;  %v1493_v53 = vpop.f32.mrb[8].mxu1  ;;  %v378_v49 = vld [vmem:[#allocation2 + $0x68] sm:$0xff] }
 0x141   : > { %v1419_v54 = vpop.f32.mrb[11].mxu0  ;;  %v896_v56 = vpop.f32.mrb[9].mxu1 }
 0x142   : > { %v1420_v57 = vadd.f32 %v1419_v54, %v1418_v52  ;;  %v881_v58 = vadd.f32 %v1417_v51, %v880_v40  ;;  %v1494_v59 = vpop.f32.mrb[10].mxu1 }
 0x143   : > { %v899_v61 = vpop.f32.mrb[11].mxu1 }
 0x144   : > { %v931_v62 = vadd.f32 %v881_v58, %v369_v55  ;;  %v884_v63 = vadd.f32 %v1420_v57, %v883_v45  ;;  %v379_v57 = vld [vmem:[#allocation2 + $0x70] sm:$0xff] }
 0x146   : > { %947 = vst [vmem:[#allocation2 + $0x20] sm:$0xff] %v931_v62  ;;  %v932_v0 = vadd.f32 %v884_v63, %v370_v60  ;;  %v1421_v1 = vpop.f32.mrb[12].mxu0 }
 0x147   : > { %v1422_v2 = vpop.f32.mrb[13].mxu0 }
 0x148   : > { %948 = vst [vmem:[#allocation2 + $0x28] sm:$0xff] %v932_v0  ;;  %v1423_v3 = vadd.f32 %v1422_v2, %v1421_v1  ;;  %v1424_v4 = vpop.f32.mrb[14].mxu0  ;;  %v1497_v5 = vpop.f32.mrb[12].mxu1  ;;  %v963_v1 = vld [vmem:[#allocation2] sm:$0xff] (!%p1301_p11)  ;;  %v964_v2 = vld [vmem:[#allocation2 + $0x8] sm:$0xff] (!%p1301_p11) }
 0x149   : > { %v1425_v7 = vpop.f32.mrb[15].mxu0  ;;  %v912_v8 = vpop.f32.mrb[13].mxu1 }
 0x14a   : > { %v889_v9 = vadd.f32 %v1489_v37, %v1423_v3  ;;  %v1426_v10 = vadd.f32 %v1425_v7, %v1424_v4  ;;  %v1498_v11 = vpop.f32.mrb[14].mxu1  ;;  %v376_v37 = vld [vmem:[#allocation2 + $0x58] sm:$0xff]  ;;  %v1302_v3 = vld [vmem:[%s1875_s2] ss:$0 sm:$0xff] (!%p1301_p11)  ;;  %v965_v7 = vld [vmem:[#allocation2 + $0x10] sm:$0xff] (!%p1301_p11) }
 0x14b   : > { %v915_v13 = vpop.f32.mrb[15].mxu1  ;;  %v986_v4 = vadd.f32 (!%p1301_p11), %v1302_v3, %v963_v1 }
 0x14c   : > { %v933_v14 = vadd.f32 %v889_v9, %v371_v6  ;;  %v892_v15 = vadd.f32 %v1490_v43, %v1426_v10  ;;  %v987_v6 = vadd.f32 (!%p1301_p11), %v1302_v3, %v964_v2  ;;  %v988_v9 = vadd.f32 (!%p1301_p11), %v1302_v3, %v965_v7 }
 0x14e   : > { %949 = vst [vmem:[#allocation2 + $0x30] sm:$0xff] %v933_v14  ;;  %v934_v16 = vadd.f32 %v892_v15, %v372_v12  ;;  %v1427_v17 = vpop.f32.mrb[16].mxu0  ;;  %v1002_v15 = vmax.f32 (!%p1301_p11), %v986_v4, 0.0 }
 0x14f   : > { %v1428_v18 = vpop.f32.mrb[17].mxu0 }
 0x150   : > { %950 = vst [vmem:[#allocation2 + $0x38] sm:$0xff] %v934_v16  ;;  %v1429_v19 = vadd.f32 %v1428_v18, %v1427_v17  ;;  %v1430_v20 = vpop.f32.mrb[18].mxu0  ;;  %v1003_v16 = vmax.f32 (!%p1301_p11), %v987_v6, 0.0 }
 0x151   : > { %v1431_v21 = vpop.f32.mrb[19].mxu0 }
 0x152   : > { %v1432_v23 = vadd.f32 %v1431_v21, %v1430_v20  ;;  %v897_v24 = vadd.f32 %v1429_v19, %v896_v56 }
 0x154   : > { %v935_v26 = vadd.f32 %v897_v24, %v373_v22  ;;  %v900_v27 = vadd.f32 %v1432_v23, %v899_v61  ;;  %v380_v61 = vld [vmem:[#allocation2 + $0x78] sm:$0xff]  ;;  %v1004_v22 = vmax.f32 (!%p1301_p11), %v988_v9, 0.0 }
 0x156   : > { %951 = vst [vmem:[#allocation2 + $0x40] sm:$0xff] %v935_v26  ;;  %v936_v28 = vadd.f32 %v900_v27, %v374_v25  ;;  %v1433_v29 = vpop.f32.mrb[20].mxu0 }
 0x157   : > { %v1434_v30 = vpop.f32.mrb[21].mxu0  ;;  %v970_v14 = vld [vmem:[#allocation2 + $0x38] sm:$0xff] (!%p1301_p11) }
 0x158   : > { %952 = vst [vmem:[#allocation2 + $0x48] sm:$0xff] %v936_v28  ;;  %v1435_v31 = vadd.f32 %v1434_v30, %v1433_v29  ;;  %v1436_v32 = vpop.f32.mrb[22].mxu0  ;;  %v993_v25 = vadd.f32 (!%p1301_p11), %v1302_v3, %v970_v14  ;;  %v1343_v28 = vpack.c.bf16 (!%p1301_p11), %v1003_v16, %v1002_v15 }
 0x159   : > { %v1437_v34 = vpop.f32.mrb[23].mxu0 }
 0x15a   : > { %v905_v35 = vadd.f32 %v1493_v53, %v1435_v31  ;;  %v1438_v36 = vadd.f32 %v1437_v34, %v1436_v32  ;;  %v1009_v34 = vmax.f32 (!%p1301_p11), %v993_v25, 0.0  ;;  %1344 = vst [vmem:[%s1876_s3] sm:$0xff] (!%p1301_p11), %v1343_v28  }
 0x15c   : > { %v937_v38 = vadd.f32 %v905_v35, %v375_v33  ;;  %v908_v39 = vadd.f32 %v1494_v59, %v1438_v36 }
 0x15d   : > { %v971_v19 = vld [vmem:[#allocation2 + $0x40] sm:$0xff] (!%p1301_p11) }
 0x15e   : > { %953 = vst [vmem:[#allocation2 + $0x50] sm:$0xff] %v937_v38  ;;  %v938_v40 = vadd.f32 %v908_v39, %v376_v37  ;;  %v1439_v41 = vpop.f32.mrb[24].mxu0  ;;  %v994_v31 = vadd.f32 (!%p1301_p11), %v1302_v3, %v971_v19 }
 0x15f   : > { %v1440_v42 = vpop.f32.mrb[25].mxu0  ;;  %v972_v20 = vld [vmem:[#allocation2 + $0x48] sm:$0xff] (!%p1301_p11) }
 0x160   : > { %954 = vst [vmem:[#allocation2 + $0x58] sm:$0xff] %v938_v40  ;;  %v1441_v43 = vadd.f32 %v1440_v42, %v1439_v41  ;;  %v1442_v44 = vpop.f32.mrb[26].mxu0  ;;  %v995_v35 = vadd.f32 (!%p1301_p11), %v1302_v3, %v972_v20  ;;  %v1010_v40 = vmax.f32 (!%p1301_p11), %v994_v31, 0.0 }
 0x161   : > { %v1443_v45 = vpop.f32.mrb[27].mxu0 }
 0x162   : > { %v1444_v47 = vadd.f32 %v1443_v45, %v1442_v44  ;;  %v913_v48 = vadd.f32 %v1441_v43, %v912_v8  ;;  %v967_v8 = vld [vmem:[#allocation2 + $0x20] sm:$0xff] (!%p1301_p11)  ;;  %v1011_v44 = vmax.f32 (!%p1301_p11), %v995_v35, 0.0 }
 0x163   : > { %v990_v12 = vadd.f32 (!%p1301_p11), %v1302_v3, %v967_v8 }
 0x164   : > { %v939_v50 = vadd.f32 %v913_v48, %v377_v46  ;;  %v916_v51 = vadd.f32 %v1444_v47, %v915_v13  ;;  %v969_v13 = vld [vmem:[#allocation2 + $0x30] sm:$0xff] (!%p1301_p11) }
 0x165   : > { %v992_v18 = vadd.f32 (!%p1301_p11), %v1302_v3, %v969_v13  ;;  %v973_v21 = vld [vmem:[#allocation2 + $0x50] sm:$0xff] (!%p1301_p11)  ;;  %v1006_v24 = vmax.f32 (!%p1301_p11), %v990_v12, 0.0 }
 0x166   : > { %955 = vst [vmem:[#allocation2 + $0x60] sm:$0xff] %v939_v50  ;;  %v940_v52 = vadd.f32 %v916_v51, %v378_v49  ;;  %v1445_v53 = vpop.f32.mrb[28].mxu0  ;;  %v996_v36 = vadd.f32 (!%p1301_p11), %v1302_v3, %v973_v21  ;;  %v1363_v51 = vpack.c.bf16 (!%p1301_p11), %v1011_v44, %v1010_v40 }
 0x167   : > { %v1446_v54 = vpop.f32.mrb[29].mxu0  ;;  %v974_v26 = vld [vmem:[#allocation2 + $0x58] sm:$0xff] (!%p1301_p11)  ;;  %v1008_v30 = vmax.f32 (!%p1301_p11), %v992_v18, 0.0 }
 0x168   : > { %956 = vst [vmem:[#allocation2 + $0x68] sm:$0xff] %v940_v52  ;;  %v1447_v55 = vadd.f32 %v1446_v54, %v1445_v53  ;;  %v1448_v56 = vpop.f32.mrb[30].mxu0  ;;  %v997_v41 = vadd.f32 (!%p1301_p11), %v1302_v3, %v974_v26  ;;  %v1012_v45 = vmax.f32 (!%p1301_p11), %v996_v36, 0.0  ;;  %1383 = vst [vmem:[%s1876_s3 + $0x20] sm:$0xff] (!%p1301_p11), %v1363_v51  }
 0x169   : > { %v1449_v58 = vpop.f32.mrb[31].mxu0  ;;  %v1358_v43 = vpack.c.bf16 (!%p1301_p11), %v1009_v34, %v1008_v30 }
 0x16a   : > { %v921_v59 = vadd.f32 %v1497_v5, %v1447_v55  ;;  %v1450_v60 = vadd.f32 %v1449_v58, %v1448_v56  ;;  %962 = sbr.rel (%p1301_p11) target bundleno = 383 (0x17f), region = 66  ;;  %v966_v5 = vld [vmem:[#allocation2 + $0x18] sm:$0xff] (!%p1301_p11)  ;;  %v1013_v47 = vmax.f32 (!%p1301_p11), %v997_v41, 0.0 }
 0x16b   : > { %v989_v10 = vadd.f32 (!%p1301_p11), %v1302_v3, %v966_v5  ;;  %1382 = vst [vmem:[%s1876_s3 + $0x18] sm:$0xff] (!%p1301_p11), %v1358_v43  }
 0x16c   : > { %v941_v62 = vadd.f32 %v921_v59, %v379_v57  ;;  %v924_v63 = vadd.f32 %v1498_v11, %v1450_v60  ;;  %v968_v11 = vld [vmem:[#allocation2 + $0x28] sm:$0xff] (!%p1301_p11)  ;;  %v1368_v53 = vpack.c.bf16 (!%p1301_p11), %v1013_v47, %v1012_v45 }
 0x16d   : > { %v991_v17 = vadd.f32 (!%p1301_p11), %v1302_v3, %v968_v11  ;;  %v1005_v23 = vmax.f32 (!%p1301_p11), %v989_v10, 0.0  ;;  %v975_v27 = vld [vmem:[#allocation2 + $0x60] sm:$0xff] (!%p1301_p11) }
 0x16e   : > { %957 = vst [vmem:[#allocation2 + $0x70] sm:$0xff] %v941_v62  ;;  %v942_v0 = vadd.f32 %v924_v63, %v380_v61  ;;  %v998_v42 = vadd.f32 (!%p1301_p11), %v1302_v3, %v975_v27  ;;  %1384 = vst [vmem:[%s1876_s3 + $0x28] sm:$0xff] (!%p1301_p11), %v1368_v53  }
 0x16f   : > { %v1007_v29 = vmax.f32 (!%p1301_p11), %v991_v17, 0.0  ;;  %v976_v32 = vld [vmem:[#allocation2 + $0x68] sm:$0xff] (!%p1301_p11)  ;;  %v1348_v33 = vpack.c.bf16 (!%p1301_p11), %v1005_v23, %v1004_v22 }
 0x170   : > { %958 = vst [vmem:[#allocation2 + $0x78] sm:$0xff] %v942_v0  ;;  %v999_v46 = vadd.f32 (!%p1301_p11), %v1302_v3, %v976_v32  ;;  %v1014_v48 = vmax.f32 (!%p1301_p11), %v998_v42, 0.0 }
 0x171   : > { %v1353_v39 = vpack.c.bf16 %v1007_v29, %v1006_v24  ;;  %1380 = vst [vmem:[%s1876_s3 + $0x8] sm:$0xff] %v1348_v33  }
 0x172   : > { %v1015_v52 = vmax.f32 %v999_v46, 0.0 }
 0x173   : > { %1381 = vst [vmem:[%s1876_s3 + $0x10] sm:$0xff] %v1353_v39  }
 0x174   : > { %v1373_v56 = vpack.c.bf16 %v1015_v52, %v1014_v48 }
 0x175   : > { %v977_v37 = vld [vmem:[#allocation2 + $0x70] sm:$0xff] }
 0x176   : > { %v1000_v49 = vadd.f32 %v1302_v3, %v977_v37  ;;  %1385 = vst [vmem:[%s1876_s3 + $0x30] sm:$0xff] %v1373_v56  }
 0x177   : > { %v978_v38 = vld [vmem:[#allocation2 + $0x78] sm:$0xff] }
 0x178   : > { %v1001_v50 = vadd.f32 %v1302_v3, %v978_v38  ;;  %v1016_v54 = vmax.f32 %v1000_v49, 0.0 }
 0x17a   : > { %v1017_v55 = vmax.f32 %v1001_v50, 0.0 }
 0x17c   : > { %v1378_v57 = vpack.c.bf16 %v1017_v55, %v1016_v54 }
 0x17e   : > { %1386 = vst [vmem:[%s1876_s3 + $0x38] sm:$0xff] %v1378_v57  }
 0x17f PF: > { %s13_s16 = sadd.s32 1, %s1636_s16   ;;  %s1877_s12 = smov %s1624_s13 }
 0x180   : > { %p10_p12 = scmp.ge.s32.totalorder %s13_s16, 5   ;;  %s1878_s13 = smov %s1694_s20 }
 0x181   : > { %s1879_s14 = smov %s1632_s15  ;;  %s1880_s15 = smov %s1882_s17 }
 0x182   :  { %12 = sbr.rel (!%p10_p12) target bundleno = 3 (0x3), region = 113 }

// kernel: _forward.11
= control target key start
LH: loop header
LB: loop body
LE: loop exit
PB: predicated region body
PF: predicated region fallthrough
CT: control target
= control target key end

     0   :  { %s721_s1 = inlined_call_operand.vmem [shape: bf16[128,128], index: 1, kind: input, shape index: {}]   ;;  %s722_s0 = inlined_call_operand.vmem [shape: bf16[128,128], index: 0, kind: input, shape index: {}]   ;;  %s723_s2 = inlined_call_operand.vmem [shape: f32[1,128], index: 2, kind: input, shape index: {}]   ;;  %s724_s3 = inlined_call_operand.vmem [shape: bf16[128,128], index: 3, kind: output, shape index: {}]  }
   0x1   :  { %v610_v0 = vld [vmem:[%s721_s1] sm:$0xff]   ;;  %v611_v1 = vld [vmem:[%s721_s1 + $0x8] sm:$0xff]   ;;  %v612_v2 = vld [vmem:[%s721_s1 + $0x10] sm:$0xff]  }
   0x2   :  { %562 = vmatprep.subr.bf16.mxu0 %v610_v0  ;;  %594 = vmatprep.subr.bf16.mxu1 %v610_v0  ;;  %v613_v3 = vld [vmem:[%s721_s1 + $0x18] sm:$0xff]   ;;  %v618_v4 = vld [vmem:[%s722_s0] sm:$0xff]   ;;  %v615_v7 = vld [vmem:[%s721_s1 + $0x28] sm:$0xff]  }
   0x3   :  { %563 = vmatpush3.bf16.msra.mxu0 %v610_v0  ;;  %602 = vmatpush3.bf16.msra.mxu1 %v610_v0  ;;  %v619_v5 = vld [vmem:[%s722_s0 + $0x20] sm:$0xff]   ;;  %v616_v8 = vld [vmem:[%s721_s1 + $0x30] sm:$0xff]   ;;  %v617_v9 = vld [vmem:[%s721_s1 + $0x38] sm:$0xff]  }
   0x4   :  { %564 = vmatprep.subr.bf16.mxu0 %v611_v1  ;;  %595 = vmatprep.subr.bf16.mxu1 %v611_v1  ;;  %v614_v6 = vld [vmem:[%s721_s1 + $0x20] sm:$0xff]   ;;  %v620_v10 = vld [vmem:[%s722_s0 + $0x8] sm:$0xff]   ;;  %v622_v12 = vld [vmem:[%s722_s0 + $0x10] sm:$0xff]  }
   0x5   :  { %578 = vmatprep.mubr.bf16.mxu0 %v618_v4  ;;  %586 = vmatprep.mubr.bf16.mxu1 %v619_v5  ;;  %v621_v11 = vld [vmem:[%s722_s0 + $0x28] sm:$0xff]   ;;  %v623_v13 = vld [vmem:[%s722_s0 + $0x30] sm:$0xff]   ;;  %v624_v14 = vld [vmem:[%s722_s0 + $0x18] sm:$0xff]  }
   0x6   :  { %v625_v15 = vld [vmem:[%s722_s0 + $0x38] sm:$0xff]   ;;  %v466_v16 = vld [vmem:[%s723_s2] ss:$0 sm:$0xff] }
   0x7   :  { %565 = vmatpush3.bf16.msra.mxu0 %v611_v1  ;;  %603 = vmatpush3.bf16.msra.mxu1 %v611_v1 }
   0x8   :  { %566 = vmatprep.subr.bf16.mxu0 %v612_v2  ;;  %596 = vmatprep.subr.bf16.mxu1 %v612_v2 }
   0xb   :  { %567 = vmatpush3.bf16.msra.mxu0 %v612_v2  ;;  %604 = vmatpush3.bf16.msra.mxu1 %v612_v2 }
   0xc   :  { %568 = vmatprep.subr.bf16.mxu0 %v613_v3  ;;  %597 = vmatprep.subr.bf16.mxu1 %v613_v3 }
   0xf   :  { %569 = vmatpush3.bf16.msra.mxu0 %v613_v3  ;;  %605 = vmatpush3.bf16.msra.mxu1 %v613_v3 }
  0x10   :  { %570 = vmatprep.subr.bf16.mxu0 %v614_v6  ;;  %598 = vmatprep.subr.bf16.mxu1 %v614_v6 }
  0x13   :  { %571 = vmatpush3.bf16.msra.mxu0 %v614_v6  ;;  %606 = vmatpush3.bf16.msra.mxu1 %v614_v6 }
  0x14   :  { %572 = vmatprep.subr.bf16.mxu0 %v615_v7  ;;  %599 = vmatprep.subr.bf16.mxu1 %v615_v7 }
  0x17   :  { %573 = vmatpush3.bf16.msra.mxu0 %v615_v7  ;;  %607 = vmatpush3.bf16.msra.mxu1 %v615_v7 }
  0x18   :  { %574 = vmatprep.subr.bf16.mxu0 %v616_v8  ;;  %600 = vmatprep.subr.bf16.mxu1 %v616_v8 }
  0x1b   :  { %575 = vmatpush3.bf16.msra.mxu0 %v616_v8  ;;  %608 = vmatpush3.bf16.msra.mxu1 %v616_v8 }
  0x1c   :  { %576 = vmatprep.subr.bf16.mxu0 %v617_v9  ;;  %601 = vmatprep.subr.bf16.mxu1 %v617_v9 }
  0x1f   :  { %577 = vmatpush3.bf16.msra.mxu0 %v617_v9  ;;  %609 = vmatpush3.bf16.msra.mxu1 %v617_v9 }
  0x22   :  { %579 = vmatmul.mubr.bf16.vlgmr.msra.gmra.mrb[0].mxu0 %v620_v10  ;;  %587 = vmatmul.mubr.bf16.vlgmr.msra.gmra.mrb[0].mxu1 %v621_v11 }
  0x23   :  { %582 = vmatprep.mubr.bf16.mxu0 %v622_v12  ;;  %590 = vmatprep.mubr.bf16.mxu1 %v623_v13 }
  0x2a   :  { %583 = vmatmul.mubr.bf16.gmra.mrb[4].mxu0 %v624_v14  ;;  %591 = vmatmul.mubr.bf16.gmra.mrb[4].mxu1 %v625_v15 }
  0xf5   :  { %v580_v17 = vpop.f32.mrb[0].mxu0  ;;  %v588_v18 = vpop.f32.mrb[0].mxu1 }
  0xf6   :  { %v336_v19 = vadd.f32 %v580_v17, %v466_v16  ;;  %v344_v20 = vadd.f32 %v588_v18, %v466_v16  ;;  %v213_v21 = vpop.f32.mrb[1].mxu0  ;;  %v245_v22 = vpop.f32.mrb[1].mxu1 }
  0xf7   :  { %v334_v23 = vadd.f32 %v466_v16, %v213_v21  ;;  %v342_v24 = vadd.f32 %v466_v16, %v245_v22  ;;  %v581_v25 = vpop.f32.mrb[2].mxu0  ;;  %v589_v26 = vpop.f32.mrb[2].mxu1 }
  0xf8   :  { %v337_v27 = vadd.f32 %v581_v25, %v466_v16  ;;  %v345_v28 = vadd.f32 %v589_v26, %v466_v16  ;;  %v216_v29 = vpop.f32.mrb[3].mxu0  ;;  %v248_v30 = vpop.f32.mrb[3].mxu1  ;;  %v352_v33 = vmax.f32 %v336_v19, 0.0  ;;  %v360_v34 = vmax.f32 %v344_v20, 0.0 }
  0xf9   :  { %v335_v31 = vadd.f32 %v466_v16, %v216_v29  ;;  %v343_v32 = vadd.f32 %v466_v16, %v248_v30  ;;  %v350_v37 = vmax.f32 %v334_v23, 0.0  ;;  %v358_v38 = vmax.f32 %v342_v24, 0.0 }
  0xfa   :  { %v353_v35 = vmax.f32 %v337_v27, 0.0  ;;  %v361_v36 = vmax.f32 %v345_v28, 0.0 }
  0xfb   :  { %v351_v39 = vmax.f32 %v335_v31, 0.0  ;;  %v359_v40 = vmax.f32 %v343_v32, 0.0 }
  0xfc   :  { %v507_v41 = vpack.c.bf16 %v353_v35, %v352_v33  ;;  %v527_v42 = vpack.c.bf16 %v361_v36, %v360_v34 }
  0xfd   :  { %v502_v43 = vpack.c.bf16 %v351_v39, %v350_v37  ;;  %v522_v44 = vpack.c.bf16 %v359_v40, %v358_v38  ;;  %v584_v45 = vpop.f32.mrb[4].mxu0  ;;  %v592_v46 = vpop.f32.mrb[4].mxu1 }
  0xfe   :  { %539 = vst [vmem:[%s724_s3 + $0x8] sm:$0xff] %v507_v41   ;;  %543 = vst [vmem:[%s724_s3 + $0x28] sm:$0xff] %v527_v42   ;;  %v340_v47 = vadd.f32 %v584_v45, %v466_v16  ;;  %v348_v48 = vadd.f32 %v592_v46, %v466_v16  ;;  %v229_v49 = vpop.f32.mrb[5].mxu0  ;;  %v261_v50 = vpop.f32.mrb[5].mxu1 }
  0xff   :  { %503 = vst [vmem:[%s724_s3] sm:$0xff] %v502_v43   ;;  %542 = vst [vmem:[%s724_s3 + $0x20] sm:$0xff] %v522_v44   ;;  %v338_v51 = vadd.f32 %v466_v16, %v229_v49  ;;  %v346_v52 = vadd.f32 %v466_v16, %v261_v50  ;;  %v585_v53 = vpop.f32.mrb[6].mxu0  ;;  %v593_v54 = vpop.f32.mrb[6].mxu1 }
 0x100   :  { %v341_v55 = vadd.f32 %v585_v53, %v466_v16  ;;  %v349_v56 = vadd.f32 %v593_v54, %v466_v16  ;;  %v232_v57 = vpop.f32.mrb[7].mxu0  ;;  %v264_v58 = vpop.f32.mrb[7].mxu1  ;;  %v356_v61 = vmax.f32 %v340_v47, 0.0  ;;  %v364_v62 = vmax.f32 %v348_v48, 0.0 }
 0x101   :  { %v339_v59 = vadd.f32 %v466_v16, %v232_v57  ;;  %v347_v60 = vadd.f32 %v466_v16, %v264_v58  ;;  %v354_v1 = vmax.f32 %v338_v51, 0.0  ;;  %v362_v2 = vmax.f32 %v346_v52, 0.0 }
 0x102   :  { %v357_v63 = vmax.f32 %v341_v55, 0.0  ;;  %v365_v0 = vmax.f32 %v349_v56, 0.0 }
 0x103   :  { %v355_v3 = vmax.f32 %v339_v59, 0.0  ;;  %v363_v4 = vmax.f32 %v347_v60, 0.0 }
 0x104   :  { %v517_v5 = vpack.c.bf16 %v357_v63, %v356_v61  ;;  %v537_v6 = vpack.c.bf16 %v365_v0, %v364_v62 }
 0x105   :  { %v512_v7 = vpack.c.bf16 %v355_v3, %v354_v1  ;;  %v532_v8 = vpack.c.bf16 %v363_v4, %v362_v2 }
 0x106   :  { %541 = vst [vmem:[%s724_s3 + $0x18] sm:$0xff] %v517_v5   ;;  %545 = vst [vmem:[%s724_s3 + $0x38] sm:$0xff] %v537_v6  }
 0x107   :  { %540 = vst [vmem:[%s724_s3 + $0x10] sm:$0xff] %v512_v7   ;;  %544 = vst [vmem:[%s724_s3 + $0x30] sm:$0xff] %v532_v8  }

// kernel: _forward.12
= control target key start
LH: loop header
LB: loop body
LE: loop exit
PB: predicated region body
PF: predicated region fallthrough
CT: control target
= control target key end

     0   :  { %s3399_s12 = smov 0   ;;  %s3401_s13 = smov 0   ;;  %s3873_s0 = inlined_call_operand.vmem [shape: bf16[2,1,10,10,128], index: 0, kind: input, shape index: {}]   ;;  %s3874_s1 = inlined_call_operand.vmem [shape: bf16[1152,128], index: 1, kind: input, shape index: {}]   ;;  %s3875_s2 = inlined_call_operand.vmem [shape: f32[1,128], index: 2, kind: input, shape index: {}]   ;;  %s3876_s3 = inlined_call_operand.vmem [shape: bf16[2,8,8,128], index: 3, kind: output, shape index: {}]  }
   0x1   :  { %s3403_s14 = smov 0  }
   0x2 LB: > { %s32_s15 = sadd.s32 1, %s3373_s13  ;;  %p2599_p0 = scmp.ge.s32.totalorder %s3377_s14, 1  ;;  %s3377_s14 = sphi %s3403_s14, %s13_s14   ;;  %s3373_s13 = sphi %s3401_s13, %s3882_s13   ;;  %s3369_s12 = sphi %s3399_s12, %s3881_s12  }
   0x3   : > { %p34_p1 = scmp.ge.s32.totalorder %s32_s15, 2  ;;  %p183_p2 = scmp.lt.s32.totalorder %s3377_s14, 3 }
   0x5   : > { %s3884_s15 = smov (%p34_p1, %s32_s15), 0  ;;  %p184_p3 = pnand %p2599_p0, %p183_p2 }
   0x6   : > { %v3271_v0 = vld [vmem:[%s3874_s1] sm:$0xff] (!%p184_p3)   ;;  %v3273_v2 = vld [vmem:[%s3874_s1 + $0x8] sm:$0xff] (!%p184_p3)   ;;  %p225_p4 = scmp.lt.s32.totalorder (!%p184_p3), %s3369_s12, 1  ;;  %v3275_v4 = vld [vmem:[%s3874_s1 + $0x10] sm:$0xff] (!%p184_p3)   ;;  %vm464_vm0 = vsmask.f32 (!%p184_p3), 3328 }
   0x7   : > { %187 = sbr.rel (%p184_p3) target bundleno = 392 (0x188), region = 32  ;;  %v3272_v1 = vld [vmem:[%s3874_s1 + $0x100] sm:$0xff] (!%p184_p3)   ;;  %2950 = vmatprep.subr.bf16.mxu1 (!%p184_p3), %v3271_v0  ;;  %v3274_v3 = vld [vmem:[%s3874_s1 + $0x108] sm:$0xff] (!%p184_p3)   ;;  %v3276_v5 = vld [vmem:[%s3874_s1 + $0x110] sm:$0xff] (!%p184_p3)   ;;  %vm465_vm1 = vsmask.f32 (!%p184_p3), 7440 }
   0x8   : > { %3046 = vmatprep.subr.bf16.mxu0 (!%p184_p3), %v3272_v1  ;;  %2951 = vmatpush3.bf16.msra.mxu1 (!%p184_p3), %v3271_v0  ;;  %v3277_v6 = vld [vmem:[%s3874_s1 + $0x18] sm:$0xff] (!%p184_p3)   ;;  %v3279_v8 = vld [vmem:[%s3874_s1 + $0x20] sm:$0xff] (!%p184_p3)   ;;  %v3281_v10 = vld [vmem:[%s3874_s1 + $0x28] sm:$0xff] (!%p184_p3)   ;;  %vm780_vm3 = vcmask (!%p184_p3), 1042432   ;;  %vm781_vm4 = vcmask (!%p184_p3), 1046532  }
   0x9   : > { %3047 = vmatpush3.bf16.msra.mxu0 (!%p184_p3), %v3272_v1  ;;  %2952 = vmatprep.subr.bf16.mxu1 (!%p184_p3), %v3273_v2  ;;  %v3278_v7 = vld [vmem:[%s3874_s1 + $0x118] sm:$0xff] (!%p184_p3)   ;;  %v3280_v9 = vld [vmem:[%s3874_s1 + $0x120] sm:$0xff] (!%p184_p3)   ;;  %v3282_v12 = vld [vmem:[%s3874_s1 + $0x128] sm:$0xff] (!%p184_p3)  }
   0xa   : > { %3048 = vmatprep.subr.bf16.mxu0 (!%p184_p3), %v3274_v3  ;;  %v3283_v18 = vld [vmem:[%s3874_s1 + $0x30] sm:$0xff] (!%p184_p3)   ;;  %v3285_v27 = vld [vmem:[%s3874_s1 + $0x38] sm:$0xff] (!%p184_p3)   ;;  %vm3480_vm2 = vmor (!%p184_p3), %vm464_vm0, %vm465_vm1 }
   0xb   : > { %v3284_v23 = vld [vmem:[%s3874_s1 + $0x130] sm:$0xff] (!%p184_p3)   ;;  %v3286_v30 = vld [vmem:[%s3874_s1 + $0x138] sm:$0xff] (!%p184_p3)   ;;  %v3288_v46 = vld [vmem:[%s3874_s1 + $0x40] sm:$0xff] (!%p184_p3)  }
   0xc   : > { %2953 = vmatpush3.bf16.msra.mxu1 (!%p184_p3), %v3273_v2  ;;  %v3289_v52 = vld [vmem:[%s3874_s1 + $0x140] sm:$0xff] (!%p184_p3)   ;;  %v3291_v63 = vld [vmem:[%s3874_s1 + $0x48] sm:$0xff] (!%p184_p3)   ;;  %vm3567_vm5 = vmor (!%p184_p3), %vm780_vm3, %vm781_vm4 }
   0xd   : > { %3049 = vmatpush3.bf16.msra.mxu0 (!%p184_p3), %v3274_v3  ;;  %2954 = vmatprep.subr.bf16.mxu1 (!%p184_p3), %v3275_v4  ;;  %v3292_v3 = vld [vmem:[%s3874_s1 + $0x148] sm:$0xff] (!%p184_p3)  }
   0xe   : > { %s3886_s12 = smov (!%p225_p4, %s3369_s12), 1  ;;  %3050 = vmatprep.subr.bf16.mxu0 %v3276_v5 }
   0xf   : > { %s3246_s5 = smul.u32 80, %s3886_s12 }
  0x10   : > { %2955 = vmatpush3.bf16.msra.mxu1 %v3275_v4 }
  0x11   : > { %3051 = vmatpush3.bf16.msra.mxu0 %v3276_v5  ;;  %2956 = vmatprep.subr.bf16.mxu1 %v3277_v6  ;;  %s3456_s18 = scalar_lea.vmem %s3873_s0, %s3246_s5  ;;  %v3293_v5 = vld [vmem:[%s3874_s1 + $0x50] sm:$0xff]   ;;  %s2818_s5 = sshll.u32 %s3886_s12, 5 }
  0x12   : > { %3052 = vmatprep.subr.bf16.mxu0 %v3278_v7  ;;  %v3287_v11 = vld [vmem:[%s3456_s18] ss:$8 sps:$4 sm:$0xff]   ;;  %v2668_v14 = vld [vmem:[%s3456_s18 + $0xc] sm:$0x1]  ;;  %v2669_v15 = vld [vmem:[%s3456_s18 + $0x10] sm:$0xf]  ;;  %s252_s8 = scalar_lea.vmem %s3876_s3, %s2818_s5 }
  0x13   : > { %2966 = vmatprep.mubr.bf16.mxu1 %v3287_v11  ;;  %v2667_v13 = vld [vmem:[%s3456_s18 + $0x8] sm:$0xf]  ;;  %v2670_v19 = vld [vmem:[%s3456_s18 + $0x14] sm:$0x1]  ;;  %v1196_v20 = vshll.u32 %v2668_v14, 16  ;;  %v1201_v21 = vshrl.u32 %v2669_v15, 16 }
  0x14   : > { %2957 = vmatpush3.bf16.msra.mxu1 %v3277_v6  ;;  %v1187_v16 = vshrl.u32 %v2667_v13, 16  ;;  %v1190_v17 = vshll.u32 %v2667_v13, 16  ;;  %v1204_v22 = vshll.u32 %v2669_v15, 16  ;;  %v1210_v26 = vshll.u32 %v2670_v19, 16  ;;  %v2671_v36 = vld [vmem:[%s3456_s18 + $0x18] sm:$0xf] }
  0x15   : > { %3053 = vmatpush3.bf16.msra.mxu0 %v3278_v7  ;;  %2958 = vmatprep.subr.bf16.mxu1 %v3279_v8  ;;  %v1203_v28 = vrot.slane %v1201_v21, 4  ;;  %v1198_v32 = vrot.slane %v1196_v20, 5  ;;  %v2672_v37 = vld [vmem:[%s3456_s18 + $0x1c] sm:$0x1]  ;;  %v2673_v39 = vld [vmem:[%s3456_s18 + $0x20] sm:$0xf] }
  0x16   : > { %3054 = vmatprep.subr.bf16.mxu0 %v3280_v9  ;;  %v1189_v24 = vrot.slane %v1187_v16, 4  ;;  %v1192_v25 = vrot.slane %v1190_v17, 5  ;;  %v1206_v29 = vrot.slane %v1204_v22, 5  ;;  %v1212_v35 = vrot.slane %v1210_v26, 5  ;;  %v2674_v40 = vld [vmem:[%s3456_s18 + $0x24] sm:$0x1] }
  0x17   : > { %v1215_v41 = vshrl.u32 %v2671_v36, 16  ;;  %v1218_v43 = vshll.u32 %v2671_v36, 16  ;;  %v1224_v44 = vshll.u32 %v2672_v37, 16  ;;  %v1229_v45 = vshrl.u32 %v2673_v39, 16  ;;  %v3290_v53 = vld [vmem:[%s3456_s18 + $0x10] ss:$8 sps:$4 sm:$0xff]  }
  0x18   : > { %2959 = vmatpush3.bf16.msra.mxu1 %v3279_v8  ;;  %v1193_v31 = vor.u32 %v1192_v25, %v1189_v24  ;;  %v1207_v34 = vor.u32 %v1206_v29, %v1203_v28  ;;  %v1232_v49 = vshll.u32 %v2673_v39, 16  ;;  %v1238_v50 = vshll.u32 %v2674_v40, 16  ;;  %v3301_v6 = vld [vmem:[%s3456_s18 + $0x20] ss:$8 sps:$4 sm:$0xff]   ;;  %v3294_v7 = vld [vmem:[%s3874_s1 + $0x150] sm:$0xff]   ;;  %v3295_v8 = vld [vmem:[%s3874_s1 + $0x58] sm:$0xff]  }
  0x19   : > { %3055 = vmatpush3.bf16.msra.mxu0 %v3280_v9  ;;  %2960 = vmatprep.subr.bf16.mxu1 %v3281_v10  ;;  %v1217_v48 = vrot.slane %v1215_v41, 4  ;;  %v1220_v54 = vrot.slane %v1218_v43, 5  ;;  %v1226_v55 = vrot.slane %v1224_v44, 5  ;;  %v1231_v56 = vrot.slane %v1229_v45, 4  ;;  %v2675_v9 = vld [vmem:[%s3456_s18 + $0x28] sm:$0xf] }
  0x1a   : > { %3056 = vmatprep.subr.bf16.mxu0 %v3282_v12  ;;  %v1194_v38 = vrot.slane %v1193_v31, 4  ;;  %v1208_v42 = vrot.slane %v1207_v34, 4  ;;  %v1234_v58 = vrot.slane %v1232_v49, 5  ;;  %v1240_v59 = vrot.slane %v1238_v50, 5  ;;  %v2677_v11 = vld [vmem:[%s3456_s18 + $0x30] sm:$0xf] }
  0x1b   : > { %v1221_v60 = vor.u32 %v1220_v54, %v1217_v48  ;;  %v1243_v13 = vshrl.u32 %v2675_v9, 16  ;;  %v1246_v14 = vshll.u32 %v2675_v9, 16  ;;  %v1257_v16 = vshrl.u32 %v2677_v11, 16  ;;  %v3296_v19 = vld [vmem:[%s3874_s1 + $0x158] sm:$0xff]   ;;  %v3297_v20 = vld [vmem:[%s3874_s1 + $0x60] sm:$0xff]  }
  0x1c   : > { %2961 = vmatpush3.bf16.msra.mxu1 %v3281_v10  ;;  %v1199_v47 = vsel %vm3480_vm2, %v1194_v38, %v1198_v32  ;;  %v1213_v51 = vsel %vm3480_vm2, %v1208_v42, %v1212_v35  ;;  %v1235_v61 = vor.u32 %v1234_v58, %v1231_v56  ;;  %v2676_v10 = vld [vmem:[%s3456_s18 + $0x2c] sm:$0x1]  ;;  %v1260_v17 = vshll.u32 %v2677_v11, 16  ;;  %v2679_v29 = vld [vmem:[%s3456_s18 + $0x38] sm:$0xf]  ;;  %v3298_v38 = vld [vmem:[%s3874_s1 + $0x160] sm:$0xff]  }
  0x1d   : > { %3057 = vmatpush3.bf16.msra.mxu0 %v3282_v12  ;;  %2962 = vmatprep.subr.bf16.mxu1 %v3283_v18  ;;  %v2683_v57 = vcombine.low %v1199_v47, %v1213_v51  ;;  %v1222_v62 = vrot.slane %v1221_v60, 4  ;;  %v2678_v12 = vld [vmem:[%s3456_s18 + $0x34] sm:$0x1]  ;;  %v1252_v15 = vshll.u32 %v2676_v10, 16  ;;  %v1245_v21 = vrot.slane %v1243_v13, 4  ;;  %v3299_v47 = vld [vmem:[%s3874_s1 + $0x68] sm:$0xff]  }
  0x1e   : > { %3058 = vmatprep.subr.bf16.mxu0 %v3284_v23  ;;  %v1236_v0 = vrot.slane %v1235_v61, 4  ;;  %v1248_v22 = vrot.slane %v1246_v14, 5  ;;  %v1259_v24 = vrot.slane %v1257_v16, 4  ;;  %v1262_v25 = vrot.slane %v1260_v17, 5  ;;  %v2681_v31 = vld [vmem:[%s3456_s18 + $0x40] sm:$0xf] }
  0x1f   : > { %3062 = vmatprep.mubr.bf16.mxu0 %v2683_v57  ;;  %v1227_v1 = vsel %vm3480_vm2, %v1222_v62, %v1226_v55  ;;  %v2682_v34 = vld [vmem:[%s3456_s18 + $0x44] sm:$0x1]  ;;  %v1271_v35 = vshrl.u32 %v2679_v29, 16  ;;  %v1274_v36 = vshll.u32 %v2679_v29, 16  ;;  %v1285_v40 = vshrl.u32 %v2681_v31, 16  ;;  %v3300_v56 = vld [vmem:[%s3874_s1 + $0x168] sm:$0xff]  }
  0x20   : > { %2963 = vmatpush3.bf16.msra.mxu1 %v3283_v18  ;;  %v1241_v2 = vsel %vm3480_vm2, %v1236_v0, %v1240_v59  ;;  %v1266_v18 = vshll.u32 %v2678_v12, 16  ;;  %v1249_v28 = vor.u32 %v1248_v22, %v1245_v21  ;;  %v1263_v32 = vor.u32 %v1262_v25, %v1259_v24  ;;  %v448_v54 = vld [vmem:[%s3456_s18] sm:$0xf]  ;;  %v449_v55 = vld [vmem:[%s3456_s18 + $0x4] sm:$0x1]  ;;  %v3302_v57 = vld [vmem:[%s3874_s1 + $0x70] sm:$0xff]  }
  0x21   : > { %3059 = vmatpush3.bf16.msra.mxu0 %v3284_v23  ;;  %2964 = vmatprep.subr.bf16.mxu1 %v3285_v27  ;;  %v2684_v4 = vcombine.low %v1227_v1, %v1241_v2  ;;  %v1254_v23 = vrot.slane %v1252_v15, 5  ;;  %v1288_v41 = vshll.u32 %v2681_v31, 16  ;;  %v1294_v42 = vshll.u32 %v2682_v34, 16  ;;  %v450_v60 = vld [vmem:[%s3456_s18 + $0x8] sm:$0xf]  ;;  %v3303_v13 = vld [vmem:[%s3874_s1 + $0x170] sm:$0xff]  }
  0x22   : > { %3060 = vmatprep.subr.bf16.mxu0 %v3286_v30  ;;  %v1268_v26 = vrot.slane %v1266_v18, 5  ;;  %v1250_v39 = vrot.slane %v1249_v28, 4  ;;  %v1264_v43 = vrot.slane %v1263_v32, 4  ;;  %v1273_v44 = vrot.slane %v1271_v35, 4  ;;  %v451_v61 = vld [vmem:[%s3456_s18 + $0xc] sm:$0x1] }
  0x23   : > { %v1276_v45 = vrot.slane %v1274_v36, 5  ;;  %v1287_v49 = vrot.slane %v1285_v40, 4  ;;  %v1290_v50 = vrot.slane %v1288_v41, 5  ;;  %v1296_v51 = vrot.slane %v1294_v42, 5  ;;  %v2695_v12 = vld [vmem:[%s3456_s18 + $0x8] sm:$0xe] }
  0x24   : > { %2965 = vmatpush3.bf16.msra.mxu1 %v3285_v27  ;;  %v3304_v27 = vld [vmem:[%s3456_s18 + $0x30] ss:$8 sps:$4 sm:$0xff]   ;;  %v1255_v48 = vsel %vm3480_vm2, %v1250_v39, %v1254_v23  ;;  %v468_v62 = vshrl.u32 %v448_v54, 16  ;;  %v477_v1 = vshll.u32 %v449_v55, 16  ;;  %v482_v2 = vshrl.u32 %v450_v60, 16 }
  0x25   : > { %3061 = vmatpush3.bf16.msra.mxu0 %v3286_v30  ;;  %2974 = vmatprep.subr.bf16.mxu1 %v3288_v46  ;;  %v2680_v30 = vld [vmem:[%s3456_s18 + $0x3c] sm:$0x1]  ;;  %v1291_v59 = vor.u32 %v1290_v50, %v1287_v49  ;;  %v2711_v21 = vrot.slane %v2695_v12, 9  ;;  %v2698_v24 = vld [vmem:[%s3456_s18 + $0x14] sm:$0x1]  ;;  %v3307_v50 = vld [vmem:[%s3874_s1 + $0x80] sm:$0xff]  }
  0x26   : > { %3070 = vmatprep.subr.bf16.mxu0 %v3289_v52  ;;  %v1280_v37 = vshll.u32 %v2680_v30, 16  ;;  %v479_v9 = vrot.slane %v477_v1, 5  ;;  %v484_v10 = vrot.slane %v482_v2, 4  ;;  %v3305_v15 = vld [vmem:[%s3874_s1 + $0x78] sm:$0xff]   ;;  %v1505_v28 = vrot.slane %v2698_v24, 5  ;;  %v3311_v12 = vld [vmem:[%s3874_s1 + $0x90] sm:$0xff]  }
  0x27   : > { %2967 = vmatmul.mubr.bf16.vlgmr.msra.gmra.mrb[0].mxu1 %v3290_v53  ;;  %v1277_v53 = vor.u32 %v1276_v45, %v1273_v44  ;;  %v452_v29 = vld [vmem:[%s3456_s18 + $0x10] sm:$0xf]  ;;  %v453_v32 = vld [vmem:[%s3456_s18 + $0x14] sm:$0x1]  ;;  %v454_v34 = vld [vmem:[%s3456_s18 + $0x18] sm:$0xf] }
  0x28   : > { %2975 = vmatpush3.bf16.msra.mxu1 %v3288_v46  ;;  %3063 = vmatmul.mubr.bf16.vlgmr.msra.gmra.mrb[0].mxu0 %v2684_v4  ;;  %v1282_v46 = vrot.slane %v1280_v37, 5  ;;  %v1292_v4 = vrot.slane %v1291_v59, 4  ;;  %v496_v35 = vshrl.u32 %v452_v29, 16  ;;  %v3306_v36 = vld [vmem:[%s3874_s1 + $0x178] sm:$0xff]   ;;  %v499_v40 = vshll.u32 %v452_v29, 16 }
  0x29   : > { %2976 = vmatprep.subr.bf16.mxu1 %v3291_v63  ;;  %3071 = vmatpush3.bf16.msra.mxu0 %v3289_v52  ;;  %v1269_v52 = vsel %vm3480_vm2, %v1264_v43, %v1268_v26  ;;  %v1278_v0 = vrot.slane %v1277_v53, 4  ;;  %v455_v39 = vld [vmem:[%s3456_s18 + $0x1c] sm:$0x1]  ;;  %v505_v41 = vshll.u32 %v453_v32, 16  ;;  %v2699_v42 = vld [vmem:[%s3456_s18 + $0x18] sm:$0xe] }
  0x2a   : > { %3072 = vmatprep.subr.bf16.mxu0 %v3292_v3  ;;  %2970 = vmatprep.mubr.bf16.mxu1 %v3301_v6  ;;  %v2685_v58 = vcombine.low %v1255_v48, %v1269_v52  ;;  %v1297_v14 = vsel %vm3480_vm2, %v1292_v4, %v1296_v51  ;;  %v498_v45 = vrot.slane %v496_v35, 4  ;;  %v2701_v48 = vld [vmem:[%s3456_s18 + $0x20] sm:$0xe]  ;;  %v501_v51 = vrot.slane %v499_v40, 5  ;;  %v2703_v29 = vld [vmem:[%s3456_s18 + $0x28] sm:$0xe] }
  0x2b   : > { %v507_v52 = vrot.slane %v505_v41, 5  ;;  %v513_v53 = vshll.u32 %v454_v34, 16  ;;  %v2704_v32 = vld [vmem:[%s3456_s18 + $0x2c] sm:$0x1]  ;;  %v3313_v35 = vld [vmem:[%s3874_s1 + $0x98] sm:$0xff]  }
  0x2c   : > { %2977 = vmatpush3.bf16.msra.mxu1 %v3291_v63  ;;  %v471_v63 = vshll.u32 %v448_v54, 16  ;;  %3066 = vmatprep.mubr.bf16.mxu0 %v2685_v58  ;;  %v2702_v54 = vld [vmem:[%s3456_s18 + $0x24] sm:$0x1]  ;;  %v502_v59 = vor.u32 %v501_v51, %v498_v45  ;;  %v2790_v33 = vld [vmem:[%s3456_s18 + $0x3c] sm:$0x1] }
  0x2d   : > { %2978 = vmatprep.subr.bf16.mxu1 %v3293_v5  ;;  %3073 = vmatpush3.bf16.msra.mxu0 %v3292_v3  ;;  %v485_v3 = vshll.u32 %v450_v60, 16  ;;  %v515_v60 = vrot.slane %v513_v53, 5  ;;  %v3316_v45 = vld [vmem:[%s3874_s1 + $0x1a0] sm:$0xff]   ;;  %v463_v53 = vld [vmem:[%s3456_s18 + $0x3c] sm:$0x1] }
  0x2e   : > { %3074 = vmatprep.subr.bf16.mxu0 %v3294_v7  ;;  %v473_v6 = vrot.slane %v471_v63, 5  ;;  %v3308_v63 = vld [vmem:[%s3874_s1 + $0x180] sm:$0xff]   ;;  %v503_v1 = vrot.slane %v502_v59, 4  ;;  %v2707_v59 = vld [vmem:[%s3456_s18 + $0x38] sm:$0xe] }
  0x2f   : > { %2971 = vmatmul.mubr.bf16.gmra.mrb[4].mxu1 %v3304_v27  ;;  %v487_v11 = vrot.slane %v485_v3, 5 }
  0x30   : > { %2979 = vmatpush3.bf16.msra.mxu1 %v3293_v5  ;;  %v470_v5 = vrot.slane %v468_v62, 4  ;;  %v1513_v62 = vrot.slane %v2702_v54, 5 }
  0x31   : > { %2980 = vmatprep.subr.bf16.mxu1 %v3295_v8  ;;  %3075 = vmatpush3.bf16.msra.mxu0 %v3294_v7  ;;  %v491_v7 = vshll.u32 %v451_v61, 16  ;;  %v488_v23 = vor.u32 %v487_v11, %v484_v10  ;;  %v2714_v61 = vrot.slane %v2701_v48, 9  ;;  %v3309_v11 = vld [vmem:[%s3874_s1 + $0x88] sm:$0xff]   ;;  %v460_v48 = vld [vmem:[%s3456_s18 + $0x30] sm:$0xf] }
  0x32   : > { %3076 = vmatprep.subr.bf16.mxu0 %v3296_v19  ;;  %v474_v16 = vor.u32 %v473_v6, %v470_v5  ;;  %v508_v5 = vsel %vm3480_vm2, %v503_v1, %v507_v52  ;;  %v462_v52 = vld [vmem:[%s3456_s18 + $0x38] sm:$0xf]  ;;  %v552_v54 = vshrl.u32 %v460_v48, 16  ;;  %v2709_v1 = vld [vmem:[%s3456_s18 + $0x40] sm:$0xe] }
  0x33   : > { %v493_v17 = vrot.slane %v491_v7, 5  ;;  %v489_v30 = vrot.slane %v488_v23, 4  ;;  %v1514_v4 = vsel %vm3567_vm5, %v2714_v61, %v1513_v62 }
  0x34   : > { %2981 = vmatpush3.bf16.msra.mxu1 %v3295_v8  ;;  %v1283_v8 = vsel %vm3480_vm2, %v1278_v0, %v1282_v46  ;;  %v475_v27 = vrot.slane %v474_v16, 4  ;;  %v510_v46 = vshrl.u32 %v454_v34, 16  ;;  %v458_v16 = vld [vmem:[%s3456_s18 + $0x28] sm:$0xf]  ;;  %v2705_v34 = vld [vmem:[%s3456_s18 + $0x30] sm:$0xe] }
  0x35   : > { %2982 = vmatprep.subr.bf16.mxu1 %v3297_v20  ;;  %3077 = vmatpush3.bf16.msra.mxu0 %v3296_v19  ;;  %v2696_v19 = vld [vmem:[%s3456_s18 + $0xc] sm:$0x1]  ;;  %v2686_v22 = vcombine.low %v1283_v8, %v1297_v14  ;;  %v494_v43 = vsel %vm3480_vm2, %v489_v30, %v493_v17  ;;  %v456_v14 = vld [vmem:[%s3456_s18 + $0x20] sm:$0xf]  ;;  %v541_v23 = vshll.u32 %v458_v16, 16  ;;  %v2716_v40 = vrot.slane %v2705_v34, 9 }
  0x36   : > { %3078 = vmatprep.subr.bf16.mxu0 %v3298_v38  ;;  %v1501_v25 = vrot.slane %v2696_v19, 5  ;;  %v480_v37 = vsel %vm3480_vm2, %v475_v27, %v479_v9  ;;  %v512_v55 = vrot.slane %v510_v46, 4  ;;  %v3310_v9 = vld [vmem:[%s3874_s1 + $0x188] sm:$0xff]   ;;  %v524_v19 = vshrl.u32 %v456_v14, 16 }
  0x37   : > { %3067 = vmatmul.mubr.bf16.gmra.mrb[4].mxu0 %v2686_v22  ;;  %v2615_v49 = vcombine.low %v480_v37, %v494_v43  ;;  %v459_v17 = vld [vmem:[%s3456_s18 + $0x2c] sm:$0x1]  ;;  %v538_v22 = vshrl.u32 %v458_v16, 16  ;;  %v2706_v37 = vld [vmem:[%s3456_s18 + $0x34] sm:$0x1]  ;;  %v554_v62 = vrot.slane %v552_v54, 4 }
  0x38   : > { %2983 = vmatpush3.bf16.msra.mxu1 %v3297_v20  ;;  %v2697_v20 = vld [vmem:[%s3456_s18 + $0x10] sm:$0xe]  ;;  %v1502_v31 = vsel %vm3567_vm5, %v2711_v21, %v1501_v25  ;;  %v516_v2 = vor.u32 %v515_v60, %v512_v55  ;;  %v547_v24 = vshll.u32 %v459_v17, 16  ;;  %v3314_v25 = vld [vmem:[%s3874_s1 + $0x198] sm:$0xff]   ;;  %v1521_v43 = vrot.slane %v2706_v37, 5 }
  0x39   : > { %2984 = vmatprep.subr.bf16.mxu1 %v3299_v47  ;;  %3079 = vmatpush3.bf16.msra.mxu0 %v3298_v38  ;;  %v2712_v26 = vrot.slane %v2697_v20, 9  ;;  %v527_v20 = vshll.u32 %v456_v14, 16  ;;  %v2708_v60 = vld [vmem:[%s3456_s18 + $0x3c] sm:$0x1] }
  0x3a   : > { %3080 = vmatprep.subr.bf16.mxu0 %v3300_v56  ;;  %2990 = vmatprep.mubr.bf16.mxu1 %v2615_v49  ;;  %v517_v6 = vrot.slane %v516_v2, 4  ;;  %v461_v49 = vld [vmem:[%s3456_s18 + $0x34] sm:$0x1]  ;;  %v1522_v51 = vsel %vm3567_vm5, %v2716_v40, %v1521_v43  ;;  %v3318_v2 = vld [vmem:[%s3874_s1 + $0x1a8] sm:$0xff]   ;;  %v3322_v37 = vld [vmem:[%s3874_s1 + $0x1b8] sm:$0xff]  }
  0x3b   : > { %v1506_v38 = vsel %vm3567_vm5, %v2712_v26, %v1505_v28  ;;  %v526_v26 = vrot.slane %v524_v19, 4  ;;  %v529_v27 = vrot.slane %v527_v20, 5  ;;  %v540_v28 = vrot.slane %v538_v22, 4  ;;  %v748_v20 = vld [vmem:[%s3456_s18] sm:$0xe] }
  0x3c   : > { %2985 = vmatpush3.bf16.msra.mxu1 %v3299_v47  ;;  %v2719_v44 = vcombine.low %v1502_v31, %v1506_v38  ;;  %v2700_v47 = vld [vmem:[%s3456_s18 + $0x1c] sm:$0x1]  ;;  %v543_v31 = vrot.slane %v541_v23, 5  ;;  %v2715_v38 = vrot.slane %v2703_v29, 9  ;;  %v749_v23 = vld [vmem:[%s3456_s18 + $0x4] sm:$0x1] }
  0x3d   : > { %2986 = vmatprep.subr.bf16.mxu1 %v3302_v57  ;;  %3081 = vmatpush3.bf16.msra.mxu0 %v3300_v56  ;;  %v519_v56 = vshll.u32 %v455_v39, 16  ;;  %v1509_v58 = vrot.slane %v2700_v47, 5  ;;  %v1517_v39 = vrot.slane %v2704_v32, 5  ;;  %v751_v29 = vld [vmem:[%s3456_s18 + $0xc] sm:$0x1]  ;;  %v3319_v32 = vld [vmem:[%s3874_s1 + $0xb0] sm:$0xff]  }
  0x3e   : > { %3082 = vmatprep.subr.bf16.mxu0 %v3303_v13  ;;  %3086 = vmatprep.mubr.bf16.mxu0 %v2719_v44  ;;  %v544_v41 = vor.u32 %v543_v31, %v540_v28  ;;  %v3315_v44 = vld [vmem:[%s3874_s1 + $0xa0] sm:$0xff]   ;;  %v752_v43 = vld [vmem:[%s3456_s18 + $0x10] sm:$0xe] }
  0x3f   : > { %v521_v3 = vrot.slane %v519_v56, 5  ;;  %v1518_v47 = vsel %vm3567_vm5, %v2715_v38, %v1517_v39  ;;  %v3324_v39 = vld [vmem:[%s3456_s18 + $0x10] ss:$8 sps:$4 sm:$0xff]  }
  0x40   : > { %2987 = vmatpush3.bf16.msra.mxu1 %v3302_v57  ;;  %v2713_v57 = vrot.slane %v2699_v42, 9  ;;  %v549_v42 = vrot.slane %v547_v24, 5  ;;  %v2721_v56 = vcombine.low %v1518_v47, %v1522_v51  ;;  %v750_v24 = vld [vmem:[%s3456_s18 + $0x8] sm:$0xe]  ;;  %v755_v47 = vld [vmem:[%s3456_s18 + $0x1c] sm:$0x1] }
  0x41   : > { %2988 = vmatprep.subr.bf16.mxu1 %v3305_v15  ;;  %3083 = vmatpush3.bf16.msra.mxu0 %v3303_v13  ;;  %v522_v8 = vsel %vm3480_vm2, %v517_v6, %v521_v3  ;;  %v3312_v13 = vld [vmem:[%s3874_s1 + $0x190] sm:$0xff]   ;;  %v575_v6 = vshll.u32 %v463_v53, 16  ;;  %v2628_v31 = vrot.slane %v750_v24, 9  ;;  %v797_v51 = vrot.slane %v755_v47, 5  ;;  %v3323_v53 = vld [vmem:[%s3874_s1 + $0xc0] sm:$0xff]  }
  0x42   : > { %v1510_v0 = vsel %vm3567_vm5, %v2713_v57, %v1509_v58  ;;  %3084 = vmatprep.subr.bf16.mxu0 %v3306_v36  ;;  %v2616_v10 = vcombine.low %v508_v5, %v522_v8  ;;  %v555_v57 = vshll.u32 %v460_v48, 16  ;;  %v561_v58 = vshll.u32 %v461_v49, 16  ;;  %v2755_v47 = vld [vmem:[%s3456_s18 + $0x20] sm:$0xf] }
  0x43   : > { %v2720_v7 = vcombine.low %v1510_v0, %v1514_v4  ;;  %v569_v0 = vshll.u32 %v462_v52, 16  ;;  %v577_v14 = vrot.slane %v575_v6, 5  ;;  %v2629_v48 = vrot.slane %v752_v43, 9  ;;  %v3332_v6 = vld [vmem:[%s3874_s1 + $0x1d8] sm:$0xff]  }
  0x44   : > { %2989 = vmatpush3.bf16.msra.mxu1 %v3305_v15  ;;  %v457_v15 = vld [vmem:[%s3456_s18 + $0x24] sm:$0x1]  ;;  %v557_v4 = vrot.slane %v555_v57, 5  ;;  %v563_v5 = vrot.slane %v561_v58, 5  ;;  %v3328_v58 = vld [vmem:[%s3874_s1 + $0x1c8] sm:$0xff]  }
  0x45   : > { %2998 = vmatprep.subr.bf16.mxu1 %v3307_v50  ;;  %3085 = vmatpush3.bf16.msra.mxu0 %v3306_v36  ;;  %v533_v21 = vshll.u32 %v457_v15, 16  ;;  %v530_v36 = vor.u32 %v529_v27, %v526_v26  ;;  %v2718_v15 = vrot.slane %v2709_v1, 9  ;;  %v3320_v26 = vld [vmem:[%s3874_s1 + $0x1b0] sm:$0xff]   ;;  %v759_v1 = vld [vmem:[%s3456_s18 + $0x2c] sm:$0x1] }
  0x46   : > { %3094 = vmatprep.subr.bf16.mxu0 %v3308_v63 }
  0x47   : > { %2991 = vmatmul.mubr.bf16.vlgmr.msra.gmra.mrb[0].mxu1 %v2616_v10  ;;  %v535_v30 = vrot.slane %v533_v21, 5  ;;  %v531_v46 = vrot.slane %v530_v36, 4  ;;  %v2717_v10 = vrot.slane %v2707_v59, 9  ;;  %v3327_v59 = vld [vmem:[%s3874_s1 + $0xc8] sm:$0xff]  }
  0x48   : > { %3087 = vmatmul.mubr.bf16.vlgmr.msra.gmra.mrb[0].mxu0 %v2720_v7  ;;  %2999 = vmatpush3.bf16.msra.mxu1 %v3307_v50  ;;  %v545_v50 = vrot.slane %v544_v41, 4  ;;  %v2710_v7 = vld [vmem:[%s3456_s18 + $0x44] sm:$0x1]  ;;  %v3321_v41 = vld [vmem:[%s3874_s1 + $0xb8] sm:$0xff]  }
  0x49   : > { %3095 = vmatpush3.bf16.msra.mxu0 %v3308_v63  ;;  %3000 = vmatprep.subr.bf16.mxu1 %v3309_v11  ;;  %v536_v55 = vsel %vm3480_vm2, %v531_v46, %v535_v30  ;;  %v566_v63 = vshrl.u32 %v462_v52, 16  ;;  %v1529_v16 = vrot.slane %v2710_v7, 5  ;;  %v785_v30 = vrot.slane %v749_v23, 5  ;;  %v754_v46 = vld [vmem:[%s3456_s18 + $0x18] sm:$0xe]  ;;  %v3325_v52 = vld [vmem:[%s3874_s1 + $0x1c0] sm:$0xff]  }
  0x4a   : > { %3096 = vmatprep.subr.bf16.mxu0 %v3310_v9  ;;  %v550_v61 = vsel %vm3480_vm2, %v545_v50, %v549_v42  ;;  %3090 = vmatprep.mubr.bf16.mxu0 %v2721_v56  ;;  %v2630_v50 = vrot.slane %v754_v46, 9  ;;  %v3326_v56 = vld [vmem:[%s3456_s18 + $0x20] ss:$8 sps:$4 sm:$0xff]  }
  0x4b   : > { %v2617_v3 = vcombine.low %v536_v55, %v550_v61  ;;  %v568_v8 = vrot.slane %v566_v63, 4  ;;  %v1530_v22 = vsel %vm3567_vm5, %v2718_v15, %v1529_v16  ;;  %v3330_v61 = vld [vmem:[%s3874_s1 + $0x1d0] sm:$0xff]   ;;  %v757_v63 = vld [vmem:[%s3456_s18 + $0x24] sm:$0x1]  ;;  %v3339_v23 = vld [vmem:[%s3456_s18 + $0x40] ss:$8 sps:$4 sm:$0xff]  }
  0x4c   : > { %3001 = vmatpush3.bf16.msra.mxu1 %v3309_v11  ;;  %v1525_v11 = vrot.slane %v2708_v60, 5  ;;  %v798_v55 = vsel %vm3567_vm5, %v2630_v50, %v797_v51  ;;  %v3329_v60 = vld [vmem:[%s3874_s1 + $0xd0] sm:$0xff]   ;;  %v2756_v50 = vld [vmem:[%s3456_s18 + $0x24] sm:$0x1]  ;;  %v2757_v51 = vld [vmem:[%s3456_s18 + $0x28] sm:$0xf] }
  0x4d   : > { %3097 = vmatpush3.bf16.msra.mxu0 %v3310_v9  ;;  %3002 = vmatprep.subr.bf16.mxu1 %v3311_v12  ;;  %v571_v9 = vrot.slane %v569_v0, 5  ;;  %v758_v0 = vld [vmem:[%s3456_s18 + $0x28] sm:$0xe] }
  0x4e   : > { %3098 = vmatprep.subr.bf16.mxu0 %v3312_v13  ;;  %2994 = vmatprep.mubr.bf16.mxu1 %v2617_v3  ;;  %v1526_v19 = vsel %vm3567_vm5, %v2717_v10, %v1525_v11  ;;  %v801_v3 = vrot.slane %v757_v63, 5  ;;  %v761_v10 = vld [vmem:[%s3456_s18 + $0x34] sm:$0x1] }
  0x4f   : > { %v572_v17 = vor.u32 %v571_v9, %v568_v8  ;;  %v2722_v28 = vcombine.low %v1526_v19, %v1530_v22  ;;  %v3337_v8 = vld [vmem:[%s3456_s18 + $0x30] ss:$8 sps:$4 sm:$0xff]   ;;  %v809_v15 = vrot.slane %v761_v10, 5 }
  0x50   : > { %3003 = vmatpush3.bf16.msra.mxu1 %v3311_v12  ;;  %v3317_v12 = vld [vmem:[%s3874_s1 + $0xa8] sm:$0xff]   ;;  %v760_v9 = vld [vmem:[%s3456_s18 + $0x30] sm:$0xe] }
  0x51   : > { %3099 = vmatpush3.bf16.msra.mxu0 %v3312_v13  ;;  %3004 = vmatprep.subr.bf16.mxu1 %v3313_v35  ;;  %v558_v13 = vor.u32 %v557_v4, %v554_v62  ;;  %v573_v27 = vrot.slane %v572_v17, 4  ;;  %v756_v62 = vld [vmem:[%s3456_s18 + $0x20] sm:$0xe]  ;;  %v2632_v4 = vrot.slane %v758_v0, 9 }
  0x52   : > { %3100 = vmatprep.subr.bf16.mxu0 %v3314_v25  ;;  %3091 = vmatmul.mubr.bf16.gmra.mrb[4].mxu0 %v2722_v28  ;;  %v3343_v28 = vld [vmem:[%s3456_s18 + $0x8] ss:$8 sps:$4 sm:$0xff]  }
  0x53   : > { %v559_v21 = vrot.slane %v558_v13, 4  ;;  %v578_v36 = vsel %vm3480_vm2, %v573_v27, %v577_v14  ;;  %3110 = vmatprep.mubr.bf16.mxu0 %v3324_v39  ;;  %v763_v13 = vld [vmem:[%s3456_s18 + $0x3c] sm:$0x1]  ;;  %v2633_v14 = vrot.slane %v760_v9, 9  ;;  %v3336_v27 = vld [vmem:[%s3874_s1 + $0x1e8] sm:$0xff]  }
  0x54   : > { %3005 = vmatpush3.bf16.msra.mxu1 %v3313_v35  ;;  %v789_v35 = vrot.slane %v751_v29, 5  ;;  %v813_v19 = vrot.slane %v763_v13, 5  ;;  %v2751_v29 = vld [vmem:[%s3456_s18 + $0x10] sm:$0xf]  ;;  %v2760_v13 = vld [vmem:[%s3456_s18 + $0x34] sm:$0x1] }
  0x55   : > { %3101 = vmatpush3.bf16.msra.mxu0 %v3314_v25  ;;  %3006 = vmatprep.subr.bf16.mxu1 %v3315_v44  ;;  %v2627_v25 = vrot.slane %v748_v20, 9  ;;  %v564_v34 = vsel %vm3480_vm2, %v559_v21, %v563_v5  ;;  %v805_v5 = vrot.slane %v759_v1, 5  ;;  %v3331_v20 = vld [vmem:[%s3874_s1 + $0xd8] sm:$0xff]   ;;  %v810_v21 = vsel %vm3567_vm5, %v2633_v14, %v809_v15 }
  0x56   : > { %3102 = vmatprep.subr.bf16.mxu0 %v3316_v45  ;;  %v2618_v40 = vcombine.low %v564_v34, %v578_v36  ;;  %v790_v42 = vsel %vm3567_vm5, %v2628_v31, %v789_v35  ;;  %v2753_v31 = vld [vmem:[%s3456_s18 + $0x18] sm:$0xf]  ;;  %v1903_v34 = vshrl.u32 %v2751_v29, 16  ;;  %v1906_v35 = vshll.u32 %v2751_v29, 16 }
  0x57   : > { %v786_v38 = vsel %vm3567_vm5, %v2627_v25, %v785_v30  ;;  %v806_v11 = vsel %vm3567_vm5, %v2632_v4, %v805_v5  ;;  %v3334_v25 = vld [vmem:[%s3874_s1 + $0x1e0] sm:$0xff]   ;;  %v2752_v30 = vld [vmem:[%s3456_s18 + $0x14] sm:$0x1]  ;;  %v3341_v1 = vld [vmem:[%s3874_s1 + $0xf8] sm:$0xff]  }
  0x58   : > { %3007 = vmatpush3.bf16.msra.mxu1 %v3315_v44  ;;  %v2635_v44 = vcombine.low %v786_v38, %v790_v42  ;;  %v1912_v36 = vshll.u32 %v2752_v30, 16  ;;  %v1920_v38 = vshll.u32 %v2753_v31, 16  ;;  %v1908_v42 = vrot.slane %v1906_v35, 5  ;;  %v2761_v14 = vld [vmem:[%s3456_s18 + $0x38] sm:$0xf] }
  0x59   : > { %3103 = vmatpush3.bf16.msra.mxu0 %v3316_v45  ;;  %3008 = vmatprep.subr.bf16.mxu1 %v3317_v12  ;;  %v753_v45 = vld [vmem:[%s3456_s18 + $0x14] sm:$0x1]  ;;  %v3344_v30 = vld [vmem:[%s3456_s18 + $0x18] ss:$8 sps:$4 sm:$0xff]  }
  0x5a   : > { %3104 = vmatprep.subr.bf16.mxu0 %v3318_v2  ;;  %2995 = vmatmul.mubr.bf16.gmra.mrb[4].mxu1 %v2618_v40  ;;  %v793_v49 = vrot.slane %v753_v45, 5  ;;  %v3335_v40 = vld [vmem:[%s3874_s1 + $0xe8] sm:$0xff]   ;;  %v1914_v43 = vrot.slane %v1912_v36, 5  ;;  %v1922_v45 = vrot.slane %v1920_v38, 5  ;;  %v2763_v38 = vld [vmem:[%s3456_s18 + $0x40] sm:$0xf] }
  0x5b   : > { %3014 = vmatprep.mubr.bf16.mxu1 %v2635_v44 }
  0x5c   : > { %3009 = vmatpush3.bf16.msra.mxu1 %v3317_v12  ;;  %v794_v54 = vsel %vm3567_vm5, %v2629_v48, %v793_v49  ;;  %v762_v12 = vld [vmem:[%s3456_s18 + $0x38] sm:$0xe]  ;;  %v3338_v48 = vld [vmem:[%s3874_s1 + $0xf0] sm:$0xff]  }
  0x5d   : > { %3105 = vmatpush3.bf16.msra.mxu0 %v3318_v2  ;;  %3010 = vmatprep.subr.bf16.mxu1 %v3319_v32  ;;  %v2636_v57 = vcombine.low %v794_v54, %v798_v55  ;;  %v2631_v2 = vrot.slane %v756_v62, 9  ;;  %v2634_v17 = vrot.slane %v762_v12, 9  ;;  %v1931_v55 = vshrl.u32 %v2755_v47, 16  ;;  %v2759_v12 = vld [vmem:[%s3456_s18 + $0x30] sm:$0xf] }
  0x5e   : > { %3106 = vmatprep.subr.bf16.mxu0 %v3320_v26 }
  0x5f   : > { %v802_v7 = vsel %vm3567_vm5, %v2631_v2, %v801_v3  ;;  %v814_v22 = vsel %vm3567_vm5, %v2634_v17, %v813_v19  ;;  %v1933_v63 = vrot.slane %v1931_v55, 4  ;;  %v3342_v2 = vld [vmem:[%s3874_s1 + $0x1f8] sm:$0xff]   ;;  %v1959_v17 = vshrl.u32 %v2759_v12, 16 }
  0x60   : > { %3011 = vmatpush3.bf16.msra.mxu1 %v3319_v32  ;;  %v2637_v16 = vcombine.low %v802_v7, %v806_v11  ;;  %v2638_v24 = vcombine.low %v810_v21, %v814_v22  ;;  %v2754_v32 = vld [vmem:[%s3456_s18 + $0x1c] sm:$0x1]  ;;  %v1962_v19 = vshll.u32 %v2759_v12, 16  ;;  %v1973_v22 = vshrl.u32 %v2761_v14, 16 }
  0x61   : > { %3107 = vmatpush3.bf16.msra.mxu0 %v3320_v26  ;;  %3012 = vmatprep.subr.bf16.mxu1 %v3321_v41  ;;  %v3333_v26 = vld [vmem:[%s3874_s1 + $0xe0] sm:$0xff]   ;;  %v1926_v39 = vshll.u32 %v2754_v32, 16 }
  0x62   : > { %3108 = vmatprep.subr.bf16.mxu0 %v3322_v37  ;;  %v1975_v32 = vrot.slane %v1973_v22, 4 }
  0x63   : > { %v1928_v46 = vrot.slane %v1926_v39, 5  ;;  %v2764_v39 = vld [vmem:[%s3456_s18 + $0x44] sm:$0x1] }
  0x64   : > { %3013 = vmatpush3.bf16.msra.mxu1 %v3321_v41  ;;  %v1905_v41 = vrot.slane %v1903_v34, 4 }
  0x65   : > { %3109 = vmatpush3.bf16.msra.mxu0 %v3322_v37  ;;  %3022 = vmatprep.subr.bf16.mxu1 %v3323_v53  ;;  %v1917_v37 = vshrl.u32 %v2753_v31, 16 }
  0x66   : > { %3118 = vmatprep.subr.bf16.mxu0 %v3325_v52  ;;  %v1909_v49 = vor.u32 %v1908_v42, %v1905_v41  ;;  %v3346_v41 = vld [vmem:[%s3874_s1 + $0x208] sm:$0xff]  }
  0x67   : > { %3015 = vmatmul.mubr.bf16.vlgmr.msra.gmra.mrb[0].mxu1 %v2636_v57  ;;  %v1919_v44 = vrot.slane %v1917_v37, 4  ;;  %v1940_v57 = vshll.u32 %v2756_v50, 16  ;;  %v3347_v42 = vld [vmem:[%s3456_s18 + $0x28] ss:$8 sps:$4 sm:$0xff]  }
  0x68   : > { %3111 = vmatmul.mubr.bf16.vlgmr.msra.gmra.mrb[0].mxu0 %v3326_v56  ;;  %3023 = vmatpush3.bf16.msra.mxu1 %v3323_v53  ;;  %v3340_v53 = vld [vmem:[%s3874_s1 + $0x1f0] sm:$0xff]   ;;  %v1934_v56 = vshll.u32 %v2755_v47, 16  ;;  %v1996_v47 = vshll.u32 %v2764_v39, 16  ;;  %v2792_v39 = vld [vmem:[%s3456_s18 + $0x44] sm:$0x1] }
  0x69   : > { %3119 = vmatpush3.bf16.msra.mxu0 %v3325_v52  ;;  %3024 = vmatprep.subr.bf16.mxu1 %v3327_v59  ;;  %v2758_v52 = vld [vmem:[%s3456_s18 + $0x2c] sm:$0x1]  ;;  %v1923_v54 = vor.u32 %v1922_v45, %v1919_v44  ;;  %v1987_v45 = vshrl.u32 %v2763_v38, 16 }
  0x6a   : > { %3120 = vmatprep.subr.bf16.mxu0 %v3328_v58  ;;  %3114 = vmatprep.mubr.bf16.mxu0 %v3337_v8  ;;  %v1936_v0 = vrot.slane %v1934_v56, 5  ;;  %v1942_v8 = vrot.slane %v1940_v57, 5  ;;  %v2766_v44 = vld [vmem:[%s3456_s18 + $0x4c] sm:$0x1]  ;;  %v1998_v55 = vrot.slane %v1996_v47, 5  ;;  %v2241_v47 = vrot.slane %v2792_v39, 5 }
  0x6b   : > { %3018 = vmatprep.mubr.bf16.mxu1 %v2637_v16  ;;  %v1924_v62 = vrot.slane %v1923_v54, 4  ;;  %v2762_v16 = vld [vmem:[%s3456_s18 + $0x3c] sm:$0x1] }
  0x6c   : > { %3025 = vmatpush3.bf16.msra.mxu1 %v3327_v59  ;;  %v1945_v59 = vshrl.u32 %v2757_v51, 16  ;;  %v1937_v7 = vor.u32 %v1936_v0, %v1933_v63 }
  0x6d   : > { %3121 = vmatpush3.bf16.msra.mxu0 %v3328_v58  ;;  %3026 = vmatprep.subr.bf16.mxu1 %v3329_v60  ;;  %v1910_v58 = vrot.slane %v1909_v49, 4 }
  0x6e   : > { %3122 = vmatprep.subr.bf16.mxu0 %v3330_v61  ;;  %v1947_v4 = vrot.slane %v1945_v59, 4  ;;  %v1938_v15 = vrot.slane %v1937_v7, 4  ;;  %v2781_v7 = vld [vmem:[%s3456_s18 + $0x18] sm:$0xe] }
  0x6f   : > { %3019 = vmatmul.mubr.bf16.gmra.mrb[4].mxu1 %v2638_v24  ;;  %v1915_v3 = vsel %vm3480_vm2, %v1910_v58, %v1914_v43  ;;  %v1982_v24 = vshll.u32 %v2762_v16, 16 }
  0x70   : > { %3027 = vmatpush3.bf16.msra.mxu1 %v3329_v60  ;;  %3115 = vmatmul.mubr.bf16.gmra.mrb[4].mxu0 %v3339_v23  ;;  %v1948_v60 = vshll.u32 %v2757_v51, 16  ;;  %v1976_v23 = vshll.u32 %v2761_v14, 16  ;;  %v2010_v51 = vshll.u32 %v2766_v44, 16  ;;  %v2787_v14 = vld [vmem:[%s3456_s18 + $0x30] sm:$0xe] }
  0x71   : > { %3123 = vmatpush3.bf16.msra.mxu0 %v3330_v61  ;;  %3028 = vmatprep.subr.bf16.mxu1 %v3331_v20  ;;  %v1954_v61 = vshll.u32 %v2758_v52, 16  ;;  %v1984_v35 = vrot.slane %v1982_v24, 5 }
  0x72   : > { %3124 = vmatprep.subr.bf16.mxu0 %v3332_v6  ;;  %3038 = vmatprep.mubr.bf16.mxu1 %v3343_v28  ;;  %v1950_v5 = vrot.slane %v1948_v60, 5  ;;  %v1964_v28 = vrot.slane %v1962_v19, 5  ;;  %v1978_v34 = vrot.slane %v1976_v23, 5  ;;  %v2012_v59 = vrot.slane %v2010_v51, 5  ;;  %v3349_v60 = vld [vmem:[%s3874_s1 + $0x210] sm:$0xff]  }
  0x73   : > { %v1956_v9 = vrot.slane %v1954_v61, 5  ;;  %v2789_v19 = vld [vmem:[%s3456_s18 + $0x38] sm:$0xe] }
  0x74   : > { %3029 = vmatpush3.bf16.msra.mxu1 %v3331_v20  ;;  %v1951_v11 = vor.u32 %v1950_v5, %v1947_v4  ;;  %v1968_v20 = vshll.u32 %v2760_v13, 16  ;;  %v1979_v43 = vor.u32 %v1978_v34, %v1975_v32  ;;  %v2779_v4 = vld [vmem:[%s3456_s18 + $0x10] sm:$0xe]  ;;  %v2796_v13 = vrot.slane %v2781_v7, 9  ;;  %v2783_v34 = vld [vmem:[%s3456_s18 + $0x20] sm:$0xe] }
  0x75   : > { %3125 = vmatpush3.bf16.msra.mxu0 %v3332_v6  ;;  %3030 = vmatprep.subr.bf16.mxu1 %v3333_v26  ;;  %v1929_v6 = vsel %vm3480_vm2, %v1924_v62, %v1928_v46  ;;  %v1990_v46 = vshll.u32 %v2763_v38, 16  ;;  %v2800_v23 = vrot.slane %v2789_v19, 9  ;;  %v3353_v32 = vld [vmem:[%s3874_s1 + $0x230] sm:$0xff]   ;;  %v2791_v38 = vld [vmem:[%s3456_s18 + $0x40] sm:$0xe] }
  0x76   : > { %3126 = vmatprep.subr.bf16.mxu0 %v3334_v25  ;;  %v2767_v10 = vcombine.low %v1915_v3, %v1929_v6  ;;  %v1952_v21 = vrot.slane %v1951_v11, 4  ;;  %v1970_v29 = vrot.slane %v1968_v20, 5  ;;  %v1980_v52 = vrot.slane %v1979_v43, 4  ;;  %v2780_v6 = vld [vmem:[%s3456_s18 + $0x14] sm:$0x1] }
  0x77   : > { %v1992_v54 = vrot.slane %v1990_v46, 5  ;;  %v2795_v11 = vrot.slane %v2779_v4, 9  ;;  %v2217_v12 = vrot.slane %v2780_v6, 5  ;;  %v2799_v20 = vrot.slane %v2787_v14, 9 }
  0x78   : > { %3031 = vmatpush3.bf16.msra.mxu1 %v3333_v26  ;;  %3134 = vmatprep.mubr.bf16.mxu0 %v2767_v10  ;;  %v3345_v26 = vld [vmem:[%s3874_s1 + $0x200] sm:$0xff]   ;;  %v1957_v31 = vsel %vm3480_vm2, %v1952_v21, %v1956_v9  ;;  %v1985_v61 = vsel %vm3480_vm2, %v1980_v52, %v1984_v35  ;;  %v3350_v10 = vld [vmem:[%s3874_s1 + $0x218] sm:$0xff]   ;;  %v2801_v46 = vrot.slane %v2791_v38, 9 }
  0x79   : > { %3127 = vmatpush3.bf16.msra.mxu0 %v3334_v25  ;;  %3032 = vmatprep.subr.bf16.mxu1 %v3335_v40  ;;  %v1943_v25 = vsel %vm3480_vm2, %v1938_v15, %v1942_v8  ;;  %v2782_v8 = vld [vmem:[%s3456_s18 + $0x1c] sm:$0x1]  ;;  %v2218_v21 = vsel %vm3567_vm5, %v2795_v11, %v2217_v12  ;;  %v2784_v35 = vld [vmem:[%s3456_s18 + $0x24] sm:$0x1] }
  0x7a   : > { %3128 = vmatprep.subr.bf16.mxu0 %v3336_v27  ;;  %v2768_v36 = vcombine.low %v1943_v25, %v1957_v31  ;;  %v2221_v16 = vrot.slane %v2782_v8, 5  ;;  %v2237_v25 = vrot.slane %v2790_v33, 5  ;;  %v3352_v31 = vld [vmem:[%s3874_s1 + $0x228] sm:$0xff]   ;;  %v2225_v43 = vrot.slane %v2784_v35, 5 }
  0x7c   : > { %3033 = vmatpush3.bf16.msra.mxu1 %v3335_v40  ;;  %v2765_v40 = vld [vmem:[%s3456_s18 + $0x48] sm:$0xf]  ;;  %v2222_v24 = vsel %vm3567_vm5, %v2796_v13, %v2221_v16 }
  0x7d   : > { %3129 = vmatpush3.bf16.msra.mxu0 %v3336_v27  ;;  %3034 = vmatprep.subr.bf16.mxu1 %v3338_v48  ;;  %v1961_v27 = vrot.slane %v1959_v17, 4  ;;  %v2001_v49 = vshrl.u32 %v2765_v40, 16  ;;  %v2004_v50 = vshll.u32 %v2765_v40, 16  ;;  %v2788_v17 = vld [vmem:[%s3456_s18 + $0x34] sm:$0x1] }
  0x7e   : > { %3130 = vmatprep.subr.bf16.mxu0 %v3340_v53  ;;  %v2233_v22 = vrot.slane %v2788_v17, 5  ;;  %v2793_v40 = vld [vmem:[%s3456_s18 + $0x48] sm:$0xe] }
  0x7f   : > { %v1965_v37 = vor.u32 %v1964_v28, %v1961_v27  ;;  %v2003_v57 = vrot.slane %v2001_v49, 4  ;;  %v2006_v58 = vrot.slane %v2004_v50, 5  ;;  %v3351_v28 = vld [vmem:[%s3874_s1 + $0x220] sm:$0xff]   ;;  %v3354_v50 = vld [vmem:[%s3874_s1 + $0x238] sm:$0xff]  }
  0x80   : > { %3035 = vmatpush3.bf16.msra.mxu1 %v3338_v48  ;;  %v2234_v27 = vsel %vm3567_vm5, %v2799_v20, %v2233_v22 }
  0x81   : > { %3131 = vmatpush3.bf16.msra.mxu0 %v3340_v53  ;;  %3036 = vmatprep.subr.bf16.mxu1 %v3341_v1  ;;  %v1966_v48 = vrot.slane %v1965_v37, 4  ;;  %v1989_v53 = vrot.slane %v1987_v45, 4  ;;  %v2007_v0 = vor.u32 %v2006_v58, %v2003_v57  ;;  %v2786_v37 = vld [vmem:[%s3456_s18 + $0x2c] sm:$0x1] }
  0x82   : > { %3132 = vmatprep.subr.bf16.mxu0 %v3342_v2  ;;  %v2229_v45 = vrot.slane %v2786_v37, 5 }
  0x83   : > { %v1971_v56 = vsel %vm3480_vm2, %v1966_v48, %v1970_v29  ;;  %v1993_v62 = vor.u32 %v1992_v54, %v1989_v53  ;;  %v2008_v3 = vrot.slane %v2007_v0, 4  ;;  %v2238_v29 = vsel %vm3567_vm5, %v2800_v23, %v2237_v25 }
  0x84   : > { %3037 = vmatpush3.bf16.msra.mxu1 %v3341_v1  ;;  %v2769_v63 = vcombine.low %v1971_v56, %v1985_v61  ;;  %v3348_v1 = vld [vmem:[%s3456_s18 + $0x38] ss:$8 sps:$4 sm:$0xff]   ;;  %v2802_v48 = vrot.slane %v2793_v40, 9  ;;  %v2242_v53 = vsel %vm3567_vm5, %v2801_v46, %v2241_v47 }
  0x85   : > { %3133 = vmatpush3.bf16.msra.mxu0 %v3342_v2  ;;  %3166 = vmatprep.subr.bf16.mxu1 %v3345_v26  ;;  %v1994_v2 = vrot.slane %v1993_v62, 4  ;;  %v2013_v9 = vsel %vm3480_vm2, %v2008_v3, %v2012_v59 }
  0x86   : > { %3142 = vmatprep.subr.bf16.mxu0 %v3345_v26 }
  0x87   : > { %3039 = vmatmul.mubr.bf16.vlgmr.msra.gmra.mrb[0].mxu1 %v3344_v30  ;;  %v1999_v5 = vsel %vm3480_vm2, %v1994_v2, %v1998_v55  ;;  %v2805_v30 = vcombine.low %v2234_v27, %v2238_v29 }
  0x88   : > { %3135 = vmatmul.mubr.bf16.vlgmr.msra.gmra.mrb[0].mxu0 %v2768_v36  ;;  %3174 = vmatpush3.bf16.msra.mxu1 %v3345_v26  ;;  %v2770_v15 = vcombine.low %v1999_v5, %v2013_v9  ;;  %v2785_v36 = vld [vmem:[%s3456_s18 + $0x28] sm:$0xe]  ;;  %v2815_v9 = vld [vmem:[%s3875_s2] ss:$0 sm:$0xff] }
  0x89   : > { %3143 = vmatpush3.bf16.msra.mxu0 %v3345_v26  ;;  %3167 = vmatprep.subr.bf16.mxu1 %v3346_v41  ;;  %v2803_v26 = vcombine.low %v2218_v21, %v2222_v24  ;;  %v2798_v44 = vrot.slane %v2785_v36, 9 }
  0x8a   : > { %3144 = vmatprep.subr.bf16.mxu0 %v3346_v41  ;;  %3042 = vmatprep.mubr.bf16.mxu1 %v3347_v42  ;;  %v2797_v42 = vrot.slane %v2783_v34, 9 }
  0x8b   : > { %3138 = vmatprep.mubr.bf16.mxu0 %v2769_v63  ;;  %v2230_v52 = vsel %vm3567_vm5, %v2798_v44, %v2229_v45 }
  0x8c   : > { %3175 = vmatpush3.bf16.msra.mxu1 %v3346_v41  ;;  %v2226_v51 = vsel %vm3567_vm5, %v2797_v42, %v2225_v43 }
  0x8d   : > { %3145 = vmatpush3.bf16.msra.mxu0 %v3346_v41  ;;  %3168 = vmatprep.subr.bf16.mxu1 %v3349_v60  ;;  %v2794_v41 = vld [vmem:[%s3456_s18 + $0x4c] sm:$0x1]  ;;  %v2804_v55 = vcombine.low %v2226_v51, %v2230_v52 }
  0x8e   : > { %3146 = vmatprep.subr.bf16.mxu0 %v3349_v60  ;;  %v2245_v49 = vrot.slane %v2794_v41, 5 }
  0x8f   : > { %3043 = vmatmul.mubr.bf16.gmra.mrb[4].mxu1 %v3348_v1 }
  0x90   : > { %3139 = vmatmul.mubr.bf16.gmra.mrb[4].mxu0 %v2770_v15  ;;  %3176 = vmatpush3.bf16.msra.mxu1 %v3349_v60  ;;  %v2246_v54 = vsel %vm3567_vm5, %v2802_v48, %v2245_v49 }
  0x91   : > { %3147 = vmatpush3.bf16.msra.mxu0 %v3349_v60  ;;  %3169 = vmatprep.subr.bf16.mxu1 %v3350_v10  ;;  %v2806_v56 = vcombine.low %v2242_v53, %v2246_v54 }
  0x92   : > { %3148 = vmatprep.subr.bf16.mxu0 %v3350_v10  ;;  %3158 = vmatprep.mubr.bf16.mxu0 %v2803_v26 }
  0x93   : > { %3162 = vmatprep.mubr.bf16.mxu1 %v2805_v30 }
  0x94   : > { %3177 = vmatpush3.bf16.msra.mxu1 %v3350_v10 }
  0x95   : > { %3149 = vmatpush3.bf16.msra.mxu0 %v3350_v10  ;;  %3170 = vmatprep.subr.bf16.mxu1 %v3351_v28 }
  0x96   : > { %3150 = vmatprep.subr.bf16.mxu0 %v3351_v28 }
  0x98   : > { %3178 = vmatpush3.bf16.msra.mxu1 %v3351_v28 }
  0x99   : > { %3151 = vmatpush3.bf16.msra.mxu0 %v3351_v28  ;;  %3171 = vmatprep.subr.bf16.mxu1 %v3352_v31 }
  0x9a   : > { %3152 = vmatprep.subr.bf16.mxu0 %v3352_v31 }
  0x9c   : > { %3179 = vmatpush3.bf16.msra.mxu1 %v3352_v31 }
  0x9d   : > { %3153 = vmatpush3.bf16.msra.mxu0 %v3352_v31  ;;  %3172 = vmatprep.subr.bf16.mxu1 %v3353_v32 }
  0x9e   : > { %3154 = vmatprep.subr.bf16.mxu0 %v3353_v32 }
  0xa0   : > { %3180 = vmatpush3.bf16.msra.mxu1 %v3353_v32 }
  0xa1   : > { %3155 = vmatpush3.bf16.msra.mxu0 %v3353_v32  ;;  %3173 = vmatprep.subr.bf16.mxu1 %v3354_v50 }
  0xa2   : > { %3156 = vmatprep.subr.bf16.mxu0 %v3354_v50 }
  0xa4   : > { %3181 = vmatpush3.bf16.msra.mxu1 %v3354_v50 }
  0xa5   : > { %3157 = vmatpush3.bf16.msra.mxu0 %v3354_v50 }
  0xa7   : > { %3163 = vmatmul.mubr.bf16.vlgmr.msra.gmra.mrb[8].mxu1 %v2806_v56 }
  0xa8   : > { %3159 = vmatmul.mubr.bf16.vlgmr.msra.gmra.mrb[0].mxu0 %v2804_v55 }
 0x15a   : > { %v3040_v57 = vpop.f32.mrb[0].mxu1 }
 0x15b   : > { %v1123_v58 = vpop.f32.mrb[1].mxu1 }
 0x15c   : > { %v3041_v59 = vpop.f32.mrb[2].mxu1 }
 0x15d   : > { %v1126_v60 = vpop.f32.mrb[3].mxu1 }
 0x162   : > { %v3044_v61 = vpop.f32.mrb[4].mxu1 }
 0x163   : > { %v3140_v62 = vpop.f32.mrb[4].mxu0  ;;  %v1139_v0 = vpop.f32.mrb[5].mxu1 }
 0x164   : > { %v3186_v63 = vadd.f32 %v3140_v62, %v3044_v61  ;;  %v2152_v1 = vpop.f32.mrb[5].mxu0  ;;  %v3045_v18 = vpop.f32.mrb[6].mxu1 }
 0x165   : > { %v3188_v2 = vadd.f32 %v2152_v1, %v1139_v0  ;;  %v3141_v3 = vpop.f32.mrb[6].mxu0  ;;  %v1142_v5 = vpop.f32.mrb[7].mxu1 }
 0x166   : > { %v3190_v4 = vadd.f32 %v3141_v3, %v3045_v18  ;;  %v2155_v6 = vpop.f32.mrb[7].mxu0 }
 0x167   : > { %v3192_v7 = vadd.f32 %v2155_v6, %v1142_v5 }
 0x17a   : > { %v3164_v10 = vpop.f32.mrb[8].mxu1 }
 0x17b   : > { %v3160_v8 = vpop.f32.mrb[0].mxu0  ;;  %v3187_v12 = vadd.f32 %v3186_v63, %v3164_v10  ;;  %v2385_v14 = vpop.f32.mrb[9].mxu1 }
 0x17c   : > { %v3182_v11 = vadd.f32 %v3160_v8, %v3040_v57  ;;  %v2369_v13 = vpop.f32.mrb[1].mxu0  ;;  %v3189_v16 = vadd.f32 %v3188_v2, %v2385_v14  ;;  %v3165_v19 = vpop.f32.mrb[10].mxu1 }
 0x17d   : > { %v3183_v15 = vadd.f32 %v2369_v13, %v1123_v58  ;;  %v3161_v17 = vpop.f32.mrb[2].mxu0  ;;  %v2437_v21 = vadd.f32 %v3187_v12, %v2815_v9  ;;  %v3191_v22 = vadd.f32 %v3190_v4, %v3165_v19  ;;  %v2388_v24 = vpop.f32.mrb[11].mxu1 }
 0x17e   : > { %v2433_v20 = vadd.f32 %v3182_v11, %v2815_v9  ;;  %v3184_v33 = vadd.f32 %v3161_v17, %v3041_v59  ;;  %v2372_v23 = vpop.f32.mrb[3].mxu0  ;;  %v2435_v26 = vadd.f32 %v3189_v16, %v2815_v9  ;;  %v3193_v28 = vadd.f32 %v3192_v7, %v2388_v24 }
 0x17f   : > { %v2431_v25 = vadd.f32 %v3183_v15, %v2815_v9  ;;  %v3185_v27 = vadd.f32 %v2372_v23, %v1126_v60  ;;  %v2438_v30 = vadd.f32 %v3191_v22, %v2815_v9  ;;  %v2445_v35 = vmax.f32 %v2437_v21, 0.0 }
 0x180   : > { %v2434_v29 = vadd.f32 %v3184_v33, %v2815_v9  ;;  %v2436_v32 = vadd.f32 %v3193_v28, %v2815_v9  ;;  %v2441_v34 = vmax.f32 %v2433_v20, 0.0  ;;  %v2443_v39 = vmax.f32 %v2435_v26, 0.0 }
 0x181   : > { %v2432_v31 = vadd.f32 %v3185_v27, %v2815_v9  ;;  %v2446_v37 = vmax.f32 %v2438_v30, 0.0  ;;  %v2439_v38 = vmax.f32 %v2431_v25, 0.0 }
 0x182   : > { %v2442_v36 = vmax.f32 %v2434_v29, 0.0  ;;  %v2444_v41 = vmax.f32 %v2436_v32, 0.0 }
 0x183   : > { %v2440_v40 = vmax.f32 %v2432_v31, 0.0  ;;  %v2837_v43 = vpack.c.bf16 %v2446_v37, %v2445_v35 }
 0x184   : > { %v2827_v42 = vpack.c.bf16 %v2442_v36, %v2441_v34  ;;  %v2832_v45 = vpack.c.bf16 %v2444_v41, %v2443_v39 }
 0x185   : > { %v2822_v44 = vpack.c.bf16 %v2440_v40, %v2439_v38  ;;  %2841 = vst [vmem:[%s252_s8 + $0x18] sm:$0xff] %v2837_v43  }
 0x186   : > { %2839 = vst [vmem:[%s252_s8 + $0x8] sm:$0xff] %v2827_v42   ;;  %2840 = vst [vmem:[%s252_s8 + $0x10] sm:$0xff] %v2832_v45  }
 0x187   : > { %2823 = vst [vmem:[%s252_s8] sm:$0xff] %v2822_v44  }
 0x188 PF: > { %s13_s14 = sadd.s32 1, %s3377_s14   ;;  %s3881_s12 = smov %s3373_s13 }
 0x189   : > { %p10_p5 = scmp.ge.s32.totalorder %s13_s14, 4   ;;  %s3882_s13 = smov %s3884_s15 }
 0x18b   :  { %12 = sbr.rel (!%p10_p5) target bundleno = 2 (0x2), region = 70 }

</bundles_post_ra>
